<compile_context>
chip_gen: v6e
topology: v6e:2x2x1
jax: 0.10.0
libtpu: 0.0.40
codegen_flags: <defaults>
</compile_context>

<pallas_src>
import math

import jax
import jax.numpy as jnp
from jax.experimental import pallas as pl
from jax.experimental.pallas import tpu as pltpu

EPS = 1e-5
BN_SCALE = 1.0 / math.sqrt(1.0 + EPS)   # eval-mode BatchNorm1d with fresh stats

NUM_FEATURES = 44
EMBEDDING_DIM = 512
NUM_CLASSES = 6

CLASSIFICATION_WEIGHT = 1.0
GENERATION_WEIGHT = 0.001

# (in_dim, out_dim) of the 8 fused Linear layers (encoder: 2, classifier: 6)
LAYER_DIMS = [
    (NUM_FEATURES, 1000),      # encoder Linear(44, 1000)   + ReLU
    (1000, EMBEDDING_DIM),     # encoder Linear(1000, 512)  + BN + ReLU -> embedding
    (EMBEDDING_DIM, 1000),     # classifier Linear(512, 1000) + ReLU
    (1000, 200),               # classifier Linear(1000, 200) + ReLU
    (200, 200),                # classifier Linear(200, 200)  + ReLU
    (200, 200),                # classifier Linear(200, 200)  + ReLU
    (200, 200),                # classifier Linear(200, 200)  + ReLU
    (200, NUM_CLASSES),        # classifier Linear(200, 6)    (no activation)
]

# Padded shapes.  Input dim of layer 0 stays at the true 44 (the Mosaic matmul
# handles the unaligned K; avoids padding the features in HBM).  Output dims
# are padded to lane multiples of 128; the last layer pads only to 128.
PADDED_IN = [44, 1024, 512, 1024, 256, 256, 256, 256]
PADDED_OUT = [1024, 512, 1024, 256, 256, 256, 256, 128]
OUT_PAD = PADDED_OUT[-1]

# Exact eval-mode BatchNorm folding (see header for the graph mapping).
_S = BN_SCALE
PRE_SCALE = [_S, _S, _S, _S, _S, _S, _S, 1.0]
POST_SCALE = [1.0, _S, 1.0, 1.0, 1.0, 1.0, 1.0, 1.0]

# Offsets of each layer's bias / per-channel scale inside the concatenated
# blobs.  All offsets are multiples of 128 -> clean lane slices in the kernel.
BIAS_OFFSETS = [0]
for _o in PADDED_OUT:
    BIAS_OFFSETS.append(BIAS_OFFSETS[-1] + _o)
BIAS_TOTAL = BIAS_OFFSETS[-1]   # 3712 = 29 * 128


def _round_up(x, m):
    return ((x + m - 1) // m) * m


def _mlp_kernel(x_ref, wa_ref, wb_ref, wc_ref, wd_ref, we_ref, wl_ref,
                bias_ref, scale_ref, out_ref):
    """One M-tile of the fused 8-layer MLP.

    int8 weights are cast to bf16 (exact: |q| <= 127), matmuls accumulate in
    f32 on the MXU, per-output-channel dequant scale + bias + ReLU run in f32
    on the VPU, activations are carried in bf16 between layers.
    """
    o = BIAS_OFFSETS

    def lin(h, wq, lo, hi, relu=True):
        # int8 -> f32 -> bf16: both casts exact; two-step keeps lowering simple.
        w = wq.astype(jnp.float32).astype(jnp.bfloat16)
        z = jnp.dot(h, w, preferred_element_type=jnp.float32)
        z = z * scale_ref[:, lo:hi] + bias_ref[:, lo:hi]
        if relu:
            return jnp.maximum(z, 0.0).astype(jnp.bfloat16)
        return z                                   # final layer: f32 logits

    h = x_ref[...].astype(jnp.bfloat16)            # (tile_m, 44)
    h = lin(h, wa_ref[...], o[0], o[1])            # 44   -> 1024
    h = lin(h, wb_ref[...], o[1], o[2])            # 1024 -> 512   (embedding)
    h = lin(h, wc_ref[...], o[2], o[3])            # 512  -> 1024
    h = lin(h, wd_ref[...], o[3], o[4])            # 1024 -> 256
    h = lin(h, we_ref[0], o[4], o[5])              # 256  -> 256
    h = lin(h, we_ref[1], o[5], o[6])              # 256  -> 256
    h = lin(h, we_ref[2], o[6], o[7])              # 256  -> 256
    out_ref[...] = lin(h, wl_ref[...], o[7], o[8], relu=False)  # 256 -> 128


def init_params(key):
    """Deterministic weights with eval-mode BN folded in, int8-quantized.

    Classifier linears: xavier-uniform weights, zero biases (as in
    MultitaskModel._init_weights).  Encoder linears: xavier-style weights and
    small uniform biases.  Each padded weight is quantized to int8 with a
    per-output-channel symmetric scale; biases and scales are concatenated
    into one f32 blob each (all slice offsets 128-aligned).
    """
    ws_q, scales, biases = [], [], []
    for li, (fan_in, fan_out) in enumerate(LAYER_DIMS):
        key, wk, bk = jax.random.split(key, 3)
        bound = math.sqrt(6.0 / (fan_in + fan_out))
        w = jax.random.uniform(wk, (fan_in, fan_out), jnp.float32, -bound, bound)
        if li < 2:   # encoder linears keep (deterministic) non-zero biases
            bb = 1.0 / math.sqrt(fan_in)
            b = jax.random.uniform(bk, (fan_out,), jnp.float32, -bb, bb)
        else:        # classifier linears: zero biases (per _init_weights)
            b = jnp.zeros((fan_out,), jnp.float32)

        # Fold eval-mode BatchNorm scales (exact algebra).
        w = w * (PRE_SCALE[li] * POST_SCALE[li])
        b = b * POST_SCALE[li]

        pin, pout = PADDED_IN[li], PADDED_OUT[li]
        wp = jnp.zeros((pin, pout), jnp.float32).at[:fan_in, :fan_out].set(w)
        bp = jnp.zeros((pout,), jnp.float32).at[:fan_out].set(b)

        # Per-output-channel symmetric int8 quantization (padded cols -> 0).
        absmax = jnp.max(jnp.abs(wp), axis=0)
        s = jnp.where(absmax > 0.0, absmax / 127.0, 1.0)
        wq = jnp.clip(jnp.round(wp / s), -127.0, 127.0).astype(jnp.int8)

        ws_q.append(wq)
        scales.append(s)
        biases.append(bp)

    w_a, w_b, w_c, w_d = ws_q[:4]
    w_e = jnp.stack(ws_q[4:7], axis=0)                          # (3, 256, 256) int8
    w_l = ws_q[7]                                               # (256, 128)   int8
    bias = jnp.concatenate(biases, axis=0).reshape(1, BIAS_TOTAL)    # (1, 3712) f32
    scale = jnp.concatenate(scales, axis=0).reshape(1, BIAS_TOTAL)   # (1, 3712) f32
    return (w_a, w_b, w_c, w_d, w_e, w_l, bias, scale)


def multitask_forward(features, params, *, max_tile_m=256):
    """Equivalent of MultitaskModel.forward(features) (no input_ids / labels)."""
    batch = features.shape[0]
    tile_m = min(max_tile_m, _round_up(batch, 16))      # bf16 sublane tile = 16
    padded = _round_up(batch, tile_m)

    x = features.astype(jnp.float32)
    if padded != batch:
        x = jnp.pad(x, ((0, padded - batch), (0, 0)))   # batch-dim pad only

    w_a, w_b, w_c, w_d, w_e, w_l, bias, scale = params
    grid = (padded // tile_m,)

    const2 = lambda i: (0, 0)      # weights: same block every step -> fetched
    const3 = lambda i: (0, 0, 0)   # once, VMEM-resident across the whole grid

    out = pl.pallas_call(
        _mlp_kernel,
        out_shape=jax.ShapeDtypeStruct((padded, OUT_PAD), jnp.float32),
        grid=grid,
        in_specs=[
            pl.BlockSpec((tile_m, NUM_FEATURES), lambda i: (i, 0)),  # streamed x
            pl.BlockSpec((PADDED_IN[0], PADDED_OUT[0]), const2),     # w_a int8
            pl.BlockSpec((PADDED_IN[1], PADDED_OUT[1]), const2),     # w_b int8
            pl.BlockSpec((PADDED_IN[2], PADDED_OUT[2]), const2),     # w_c int8
            pl.BlockSpec((PADDED_IN[3], PADDED_OUT[3]), const2),     # w_d int8
            pl.BlockSpec((3, 256, 256), const3),                     # w_e int8
            pl.BlockSpec((256, OUT_PAD), const2),                    # w_l int8
            pl.BlockSpec((1, BIAS_TOTAL), const2),                   # bias  f32
            pl.BlockSpec((1, BIAS_TOTAL), const2),                   # scale f32
        ],
        out_specs=pl.BlockSpec((tile_m, OUT_PAD), lambda i: (i, 0)),
        compiler_params=pltpu.CompilerParams(
            dimension_semantics=("parallel",),        # megacore-shard M on v7x
            vmem_limit_bytes=24 * 1024 * 1024,        # ~9 MiB actual footprint
        ),
    )(x, w_a, w_b, w_c, w_d, w_e, w_l, bias, scale)

    class_logits = out[:batch, :NUM_CLASSES]
    # matches: return (class_logits, None, None, classification_w, generation_w)
    return class_logits, None, None, CLASSIFICATION_WEIGHT, GENERATION_WEIGHT


def _reference_forward(features, params):
    """Pure-JAX reference mirroring the kernel math (same int8 weights)."""
    w_a, w_b, w_c, w_d, w_e, w_l, bias, scale = params
    ws = [w_a, w_b, w_c, w_d, w_e[0], w_e[1], w_e[2], w_l]
    h = features.astype(jnp.bfloat16)
    for li, wq in enumerate(ws):
        lo, hi = BIAS_OFFSETS[li], BIAS_OFFSETS[li + 1]
        w = wq.astype(jnp.float32).astype(jnp.bfloat16)
        z = jnp.dot(h, w, preferred_element_type=jnp.float32)
        z = z * scale[:, lo:hi] + bias[:, lo:hi]
        h = jnp.maximum(z, 0.0).astype(jnp.bfloat16) if li < 7 else z
    return h[:, :NUM_CLASSES]


if __name__ == "__main__":
    key = jax.random.PRNGKey(0)
    key, fkey = jax.random.split(key)
    params = init_params(key)

    # batch=8  -> single tile (tile_m=16, grid=(1,))
    # batch=384 -> tile_m=256, padded=512, grid=(2,)  (exercises the M grid)
    for batch in (8, 384):
        features = jax.random.normal(jax.random.fold_in(fkey, batch),
                                     (batch, NUM_FEATURES), jnp.float32)

        class_logits, t5_loss, t5_logits, cw, gw = multitask_forward(features, params)
        class_logits = jax.block_until_ready(class_logits)

        assert class_logits.shape == (batch, NUM_CLASSES)
        assert class_logits.dtype == jnp.float32
        assert t5_loss is None and t5_logits is None
        assert cw == CLASSIFICATION_WEIGHT and gw == GENERATION_WEIGHT
        assert bool(jnp.all(jnp.isfinite(class_logits)))

        ref_logits = jax.block_until_ready(_reference_forward(features, params))
        max_err = float(jnp.max(jnp.abs(class_logits - ref_logits)))
        assert bool(jnp.allclose(class_logits, ref_logits, rtol=1e-2, atol=1e-3)), max_err

    print("KERNEL_OK")
</pallas_src>

<mosaic_0001>
module attributes {stable_mosaic.version = 11 : i64} {
  func.func @_mlp_kernel(%arg0: i32, %arg1: memref<16x44xf32, #tpu.memory_space<vmem>>, %arg2: memref<44x1024xi8, #tpu.memory_space<vmem>>, %arg3: memref<1024x512xi8, #tpu.memory_space<vmem>>, %arg4: memref<512x1024xi8, #tpu.memory_space<vmem>>, %arg5: memref<1024x256xi8, #tpu.memory_space<vmem>>, %arg6: memref<3x256x256xi8, #tpu.memory_space<vmem>>, %arg7: memref<256x128xi8, #tpu.memory_space<vmem>>, %arg8: memref<1x3712xf32, #tpu.memory_space<vmem>>, %arg9: memref<1x3712xf32, #tpu.memory_space<vmem>>, %arg10: memref<16x128xf32, #tpu.memory_space<vmem>>) attributes {dimension_semantics = [#tpu.dimension_semantics<parallel>], iteration_bounds = array<i64: 1>, scalar_prefetch = 0 : i64, scratch_operands = 0 : i64, tpu.core_type = #tpu.core_type<tc>, window_params = [{transform_indices = @transform_0, window_bounds = array<i64: 16, 44>}, {pipeline_mode = #tpu.pipeline_mode<synchronous>, transform_indices = @transform_1, window_bounds = array<i64: 44, 1024>}, {pipeline_mode = #tpu.pipeline_mode<synchronous>, transform_indices = @transform_2, window_bounds = array<i64: 1024, 512>}, {pipeline_mode = #tpu.pipeline_mode<synchronous>, transform_indices = @transform_3, window_bounds = array<i64: 512, 1024>}, {pipeline_mode = #tpu.pipeline_mode<synchronous>, transform_indices = @transform_4, window_bounds = array<i64: 1024, 256>}, {pipeline_mode = #tpu.pipeline_mode<synchronous>, transform_indices = @transform_5, window_bounds = array<i64: 3, 256, 256>}, {pipeline_mode = #tpu.pipeline_mode<synchronous>, transform_indices = @transform_6, window_bounds = array<i64: 256, 128>}, {pipeline_mode = #tpu.pipeline_mode<synchronous>, transform_indices = @transform_7, window_bounds = array<i64: 1, 3712>}, {pipeline_mode = #tpu.pipeline_mode<synchronous>, transform_indices = @transform_8, window_bounds = array<i64: 1, 3712>}, {transform_indices = @transform_9, window_bounds = array<i64: 16, 128>}]} {
    %c0 = arith.constant 0 : index
    %c0_0 = arith.constant 0 : index
    %0 = vector.load %arg1[%c0, %c0_0] : memref<16x44xf32, #tpu.memory_space<vmem>>, vector<16x44xf32>
    %1 = arith.truncf %0 : vector<16x44xf32> to vector<16x44xbf16>
    %c0_1 = arith.constant 0 : index
    %c0_2 = arith.constant 0 : index
    %2 = vector.load %arg2[%c0_1, %c0_2] : memref<44x1024xi8, #tpu.memory_space<vmem>>, vector<44x1024xi8>
    %3 = arith.sitofp %2 : vector<44x1024xi8> to vector<44x1024xf32>
    %4 = arith.truncf %3 : vector<44x1024xf32> to vector<44x1024xbf16>
    %cst = arith.constant dense<0.000000e+00> : vector<16x1024xf32>
    %5 = tpu.matmul %1, %4, %cst {dimension_numbers = #tpu.dot_dimension_numbers<[1], [0], [0], [1], [0, 0, 1, 1], [], []>} : vector<16x44xbf16>, vector<44x1024xbf16>, vector<16x1024xf32> -> vector<16x1024xf32>
    %c0_3 = arith.constant 0 : index
    %c0_4 = arith.constant 0 : index
    %6 = vector.load %arg9[%c0_3, %c0_4] : memref<1x3712xf32, #tpu.memory_space<vmem>>, vector<1x1024xf32>
    %7 = vector.broadcast %6 : vector<1x1024xf32> to vector<16x1024xf32>
    %8 = arith.mulf %5, %7 : vector<16x1024xf32>
    %c0_5 = arith.constant 0 : index
    %c0_6 = arith.constant 0 : index
    %9 = vector.load %arg8[%c0_5, %c0_6] : memref<1x3712xf32, #tpu.memory_space<vmem>>, vector<1x1024xf32>
    %10 = vector.broadcast %9 : vector<1x1024xf32> to vector<16x1024xf32>
    %11 = arith.addf %8, %10 : vector<16x1024xf32>
    %cst_7 = arith.constant 0.000000e+00 : f32
    %12 = vector.broadcast %cst_7 : f32 to vector<16x1024xf32>
    %13 = arith.maximumf %11, %12 : vector<16x1024xf32>
    %14 = arith.truncf %13 : vector<16x1024xf32> to vector<16x1024xbf16>
    %c0_8 = arith.constant 0 : index
    %c0_9 = arith.constant 0 : index
    %15 = vector.load %arg3[%c0_8, %c0_9] : memref<1024x512xi8, #tpu.memory_space<vmem>>, vector<1024x512xi8>
    %16 = arith.sitofp %15 : vector<1024x512xi8> to vector<1024x512xf32>
    %17 = arith.truncf %16 : vector<1024x512xf32> to vector<1024x512xbf16>
    %cst_10 = arith.constant dense<0.000000e+00> : vector<16x512xf32>
    %18 = tpu.matmul %14, %17, %cst_10 {dimension_numbers = #tpu.dot_dimension_numbers<[1], [0], [0], [1], [0, 0, 1, 1], [], []>} : vector<16x1024xbf16>, vector<1024x512xbf16>, vector<16x512xf32> -> vector<16x512xf32>
    %c0_11 = arith.constant 0 : index
    %c1024 = arith.constant 1024 : index
    %19 = vector.load %arg9[%c0_11, %c1024] : memref<1x3712xf32, #tpu.memory_space<vmem>>, vector<1x512xf32>
    %20 = vector.broadcast %19 : vector<1x512xf32> to vector<16x512xf32>
    %21 = arith.mulf %18, %20 : vector<16x512xf32>
    %c0_12 = arith.constant 0 : index
    %c1024_13 = arith.constant 1024 : index
    %22 = vector.load %arg8[%c0_12, %c1024_13] : memref<1x3712xf32, #tpu.memory_space<vmem>>, vector<1x512xf32>
    %23 = vector.broadcast %22 : vector<1x512xf32> to vector<16x512xf32>
    %24 = arith.addf %21, %23 : vector<16x512xf32>
    %cst_14 = arith.constant 0.000000e+00 : f32
    %25 = vector.broadcast %cst_14 : f32 to vector<16x512xf32>
    %26 = arith.maximumf %24, %25 : vector<16x512xf32>
    %27 = arith.truncf %26 : vector<16x512xf32> to vector<16x512xbf16>
    %c0_15 = arith.constant 0 : index
    %c0_16 = arith.constant 0 : index
    %28 = vector.load %arg4[%c0_15, %c0_16] : memref<512x1024xi8, #tpu.memory_space<vmem>>, vector<512x1024xi8>
    %29 = arith.sitofp %28 : vector<512x1024xi8> to vector<512x1024xf32>
    %30 = arith.truncf %29 : vector<512x1024xf32> to vector<512x1024xbf16>
    %cst_17 = arith.constant dense<0.000000e+00> : vector<16x1024xf32>
    %31 = tpu.matmul %27, %30, %cst_17 {dimension_numbers = #tpu.dot_dimension_numbers<[1], [0], [0], [1], [0, 0, 1, 1], [], []>} : vector<16x512xbf16>, vector<512x1024xbf16>, vector<16x1024xf32> -> vector<16x1024xf32>
    %c0_18 = arith.constant 0 : index
    %c1536 = arith.constant 1536 : index
    %32 = vector.load %arg9[%c0_18, %c1536] : memref<1x3712xf32, #tpu.memory_space<vmem>>, vector<1x1024xf32>
    %33 = vector.broadcast %32 : vector<1x1024xf32> to vector<16x1024xf32>
    %34 = arith.mulf %31, %33 : vector<16x1024xf32>
    %c0_19 = arith.constant 0 : index
    %c1536_20 = arith.constant 1536 : index
    %35 = vector.load %arg8[%c0_19, %c1536_20] : memref<1x3712xf32, #tpu.memory_space<vmem>>, vector<1x1024xf32>
    %36 = vector.broadcast %35 : vector<1x1024xf32> to vector<16x1024xf32>
    %37 = arith.addf %34, %36 : vector<16x1024xf32>
    %cst_21 = arith.constant 0.000000e+00 : f32
    %38 = vector.broadcast %cst_21 : f32 to vector<16x1024xf32>
    %39 = arith.maximumf %37, %38 : vector<16x1024xf32>
    %40 = arith.truncf %39 : vector<16x1024xf32> to vector<16x1024xbf16>
    %c0_22 = arith.constant 0 : index
    %c0_23 = arith.constant 0 : index
    %41 = vector.load %arg5[%c0_22, %c0_23] : memref<1024x256xi8, #tpu.memory_space<vmem>>, vector<1024x256xi8>
    %42 = arith.sitofp %41 : vector<1024x256xi8> to vector<1024x256xf32>
    %43 = arith.truncf %42 : vector<1024x256xf32> to vector<1024x256xbf16>
    %cst_24 = arith.constant dense<0.000000e+00> : vector<16x256xf32>
    %44 = tpu.matmul %40, %43, %cst_24 {dimension_numbers = #tpu.dot_dimension_numbers<[1], [0], [0], [1], [0, 0, 1, 1], [], []>} : vector<16x1024xbf16>, vector<1024x256xbf16>, vector<16x256xf32> -> vector<16x256xf32>
    %c0_25 = arith.constant 0 : index
    %c2560 = arith.constant 2560 : index
    %45 = vector.load %arg9[%c0_25, %c2560] : memref<1x3712xf32, #tpu.memory_space<vmem>>, vector<1x256xf32>
    %46 = vector.broadcast %45 : vector<1x256xf32> to vector<16x256xf32>
    %47 = arith.mulf %44, %46 : vector<16x256xf32>
    %c0_26 = arith.constant 0 : index
    %c2560_27 = arith.constant 2560 : index
    %48 = vector.load %arg8[%c0_26, %c2560_27] : memref<1x3712xf32, #tpu.memory_space<vmem>>, vector<1x256xf32>
    %49 = vector.broadcast %48 : vector<1x256xf32> to vector<16x256xf32>
    %50 = arith.addf %47, %49 : vector<16x256xf32>
    %cst_28 = arith.constant 0.000000e+00 : f32
    %51 = vector.broadcast %cst_28 : f32 to vector<16x256xf32>
    %52 = arith.maximumf %50, %51 : vector<16x256xf32>
    %53 = arith.truncf %52 : vector<16x256xf32> to vector<16x256xbf16>
    %c0_29 = arith.constant 0 : index
    %c0_30 = arith.constant 0 : index
    %c0_31 = arith.constant 0 : index
    %54 = vector.load %arg6[%c0_29, %c0_30, %c0_31] : memref<3x256x256xi8, #tpu.memory_space<vmem>>, vector<1x256x256xi8>
    %55 = vector.shape_cast %54 : vector<1x256x256xi8> to vector<256x256xi8>
    %56 = arith.sitofp %55 : vector<256x256xi8> to vector<256x256xf32>
    %57 = arith.truncf %56 : vector<256x256xf32> to vector<256x256xbf16>
    %cst_32 = arith.constant dense<0.000000e+00> : vector<16x256xf32>
    %58 = tpu.matmul %53, %57, %cst_32 {dimension_numbers = #tpu.dot_dimension_numbers<[1], [0], [0], [1], [0, 0, 1, 1], [], []>} : vector<16x256xbf16>, vector<256x256xbf16>, vector<16x256xf32> -> vector<16x256xf32>
    %c0_33 = arith.constant 0 : index
    %c2816 = arith.constant 2816 : index
    %59 = vector.load %arg9[%c0_33, %c2816] : memref<1x3712xf32, #tpu.memory_space<vmem>>, vector<1x256xf32>
    %60 = vector.broadcast %59 : vector<1x256xf32> to vector<16x256xf32>
    %61 = arith.mulf %58, %60 : vector<16x256xf32>
    %c0_34 = arith.constant 0 : index
    %c2816_35 = arith.constant 2816 : index
    %62 = vector.load %arg8[%c0_34, %c2816_35] : memref<1x3712xf32, #tpu.memory_space<vmem>>, vector<1x256xf32>
    %63 = vector.broadcast %62 : vector<1x256xf32> to vector<16x256xf32>
    %64 = arith.addf %61, %63 : vector<16x256xf32>
    %cst_36 = arith.constant 0.000000e+00 : f32
    %65 = vector.broadcast %cst_36 : f32 to vector<16x256xf32>
    %66 = arith.maximumf %64, %65 : vector<16x256xf32>
    %67 = arith.truncf %66 : vector<16x256xf32> to vector<16x256xbf16>
    %c1 = arith.constant 1 : index
    %c0_37 = arith.constant 0 : index
    %c0_38 = arith.constant 0 : index
    %68 = vector.load %arg6[%c1, %c0_37, %c0_38] : memref<3x256x256xi8, #tpu.memory_space<vmem>>, vector<1x256x256xi8>
    %69 = vector.shape_cast %68 : vector<1x256x256xi8> to vector<256x256xi8>
    %70 = arith.sitofp %69 : vector<256x256xi8> to vector<256x256xf32>
    %71 = arith.truncf %70 : vector<256x256xf32> to vector<256x256xbf16>
    %cst_39 = arith.constant dense<0.000000e+00> : vector<16x256xf32>
    %72 = tpu.matmul %67, %71, %cst_39 {dimension_numbers = #tpu.dot_dimension_numbers<[1], [0], [0], [1], [0, 0, 1, 1], [], []>} : vector<16x256xbf16>, vector<256x256xbf16>, vector<16x256xf32> -> vector<16x256xf32>
    %c0_40 = arith.constant 0 : index
    %c3072 = arith.constant 3072 : index
    %73 = vector.load %arg9[%c0_40, %c3072] : memref<1x3712xf32, #tpu.memory_space<vmem>>, vector<1x256xf32>
    %74 = vector.broadcast %73 : vector<1x256xf32> to vector<16x256xf32>
    %75 = arith.mulf %72, %74 : vector<16x256xf32>
    %c0_41 = arith.constant 0 : index
    %c3072_42 = arith.constant 3072 : index
    %76 = vector.load %arg8[%c0_41, %c3072_42] : memref<1x3712xf32, #tpu.memory_space<vmem>>, vector<1x256xf32>
    %77 = vector.broadcast %76 : vector<1x256xf32> to vector<16x256xf32>
    %78 = arith.addf %75, %77 : vector<16x256xf32>
    %cst_43 = arith.constant 0.000000e+00 : f32
    %79 = vector.broadcast %cst_43 : f32 to vector<16x256xf32>
    %80 = arith.maximumf %78, %79 : vector<16x256xf32>
    %81 = arith.truncf %80 : vector<16x256xf32> to vector<16x256xbf16>
    %c2 = arith.constant 2 : index
    %c0_44 = arith.constant 0 : index
    %c0_45 = arith.constant 0 : index
    %82 = vector.load %arg6[%c2, %c0_44, %c0_45] : memref<3x256x256xi8, #tpu.memory_space<vmem>>, vector<1x256x256xi8>
    %83 = vector.shape_cast %82 : vector<1x256x256xi8> to vector<256x256xi8>
    %84 = arith.sitofp %83 : vector<256x256xi8> to vector<256x256xf32>
    %85 = arith.truncf %84 : vector<256x256xf32> to vector<256x256xbf16>
    %cst_46 = arith.constant dense<0.000000e+00> : vector<16x256xf32>
    %86 = tpu.matmul %81, %85, %cst_46 {dimension_numbers = #tpu.dot_dimension_numbers<[1], [0], [0], [1], [0, 0, 1, 1], [], []>} : vector<16x256xbf16>, vector<256x256xbf16>, vector<16x256xf32> -> vector<16x256xf32>
    %c0_47 = arith.constant 0 : index
    %c3328 = arith.constant 3328 : index
    %87 = vector.load %arg9[%c0_47, %c3328] : memref<1x3712xf32, #tpu.memory_space<vmem>>, vector<1x256xf32>
    %88 = vector.broadcast %87 : vector<1x256xf32> to vector<16x256xf32>
    %89 = arith.mulf %86, %88 : vector<16x256xf32>
    %c0_48 = arith.constant 0 : index
    %c3328_49 = arith.constant 3328 : index
    %90 = vector.load %arg8[%c0_48, %c3328_49] : memref<1x3712xf32, #tpu.memory_space<vmem>>, vector<1x256xf32>
    %91 = vector.broadcast %90 : vector<1x256xf32> to vector<16x256xf32>
    %92 = arith.addf %89, %91 : vector<16x256xf32>
    %cst_50 = arith.constant 0.000000e+00 : f32
    %93 = vector.broadcast %cst_50 : f32 to vector<16x256xf32>
    %94 = arith.maximumf %92, %93 : vector<16x256xf32>
    %95 = arith.truncf %94 : vector<16x256xf32> to vector<16x256xbf16>
    %c0_51 = arith.constant 0 : index
    %c0_52 = arith.constant 0 : index
    %96 = vector.load %arg7[%c0_51, %c0_52] : memref<256x128xi8, #tpu.memory_space<vmem>>, vector<256x128xi8>
    %97 = arith.sitofp %96 : vector<256x128xi8> to vector<256x128xf32>
    %98 = arith.truncf %97 : vector<256x128xf32> to vector<256x128xbf16>
    %cst_53 = arith.constant dense<0.000000e+00> : vector<16x128xf32>
    %99 = tpu.matmul %95, %98, %cst_53 {dimension_numbers = #tpu.dot_dimension_numbers<[1], [0], [0], [1], [0, 0, 1, 1], [], []>} : vector<16x256xbf16>, vector<256x128xbf16>, vector<16x128xf32> -> vector<16x128xf32>
    %c0_54 = arith.constant 0 : index
    %c3584 = arith.constant 3584 : index
    %100 = vector.load %arg9[%c0_54, %c3584] : memref<1x3712xf32, #tpu.memory_space<vmem>>, vector<1x128xf32>
    %101 = vector.broadcast %100 : vector<1x128xf32> to vector<16x128xf32>
    %102 = arith.mulf %99, %101 : vector<16x128xf32>
    %c0_55 = arith.constant 0 : index
    %c3584_56 = arith.constant 3584 : index
    %103 = vector.load %arg8[%c0_55, %c3584_56] : memref<1x3712xf32, #tpu.memory_space<vmem>>, vector<1x128xf32>
    %104 = vector.broadcast %103 : vector<1x128xf32> to vector<16x128xf32>
    %105 = arith.addf %102, %104 : vector<16x128xf32>
    %c0_57 = arith.constant 0 : index
    %c0_58 = arith.constant 0 : index
    %106 = vector.load %arg10[%c0_57, %c0_58] : memref<16x128xf32, #tpu.memory_space<vmem>>, vector<16x128xf32>
    tpu.vector_store %arg10[%c0_57, %c0_58], %105 {strides = array<i32>} : memref<16x128xf32, #tpu.memory_space<vmem>>, vector<16x128xf32>,
    return
  }
  func.func @transform_0(%arg0: i32) -> (i32, i32) {
    %c0_i32 = arith.constant 0 : i32
    %c0_i32_0 = arith.constant 0 : i32
    return %arg0, %c0_i32 : i32, i32
  }
  func.func @transform_1(%arg0: i32) -> (i32, i32) {
    %c0_i32 = arith.constant 0 : i32
    %c0_i32_0 = arith.constant 0 : i32
    %c0_i32_1 = arith.constant 0 : i32
    return %c0_i32, %c0_i32_0 : i32, i32
  }
  func.func @transform_2(%arg0: i32) -> (i32, i32) {
    %c0_i32 = arith.constant 0 : i32
    %c0_i32_0 = arith.constant 0 : i32
    %c0_i32_1 = arith.constant 0 : i32
    return %c0_i32, %c0_i32_0 : i32, i32
  }
  func.func @transform_3(%arg0: i32) -> (i32, i32) {
    %c0_i32 = arith.constant 0 : i32
    %c0_i32_0 = arith.constant 0 : i32
    %c0_i32_1 = arith.constant 0 : i32
    return %c0_i32, %c0_i32_0 : i32, i32
  }
  func.func @transform_4(%arg0: i32) -> (i32, i32) {
    %c0_i32 = arith.constant 0 : i32
    %c0_i32_0 = arith.constant 0 : i32
    %c0_i32_1 = arith.constant 0 : i32
    return %c0_i32, %c0_i32_0 : i32, i32
  }
  func.func @transform_5(%arg0: i32) -> (i32, i32, i32) {
    %c0_i32 = arith.constant 0 : i32
    %c0_i32_0 = arith.constant 0 : i32
    %c0_i32_1 = arith.constant 0 : i32
    %c0_i32_2 = arith.constant 0 : i32
    return %c0_i32, %c0_i32_0, %c0_i32_1 : i32, i32, i32
  }
  func.func @transform_6(%arg0: i32) -> (i32, i32) {
    %c0_i32 = arith.constant 0 : i32
    %c0_i32_0 = arith.constant 0 : i32
    %c0_i32_1 = arith.constant 0 : i32
    return %c0_i32, %c0_i32_0 : i32, i32
  }
  func.func @transform_7(%arg0: i32) -> (i32, i32) {
    %c0_i32 = arith.constant 0 : i32
    %c0_i32_0 = arith.constant 0 : i32
    %c0_i32_1 = arith.constant 0 : i32
    return %c0_i32, %c0_i32_0 : i32, i32
  }
  func.func @transform_8(%arg0: i32) -> (i32, i32) {
    %c0_i32 = arith.constant 0 : i32
    %c0_i32_0 = arith.constant 0 : i32
    %c0_i32_1 = arith.constant 0 : i32
    return %c0_i32, %c0_i32_0 : i32, i32
  }
  func.func @transform_9(%arg0: i32) -> (i32, i32) {
    %c0_i32 = arith.constant 0 : i32
    %c0_i32_0 = arith.constant 0 : i32
    return %arg0, %c0_i32 : i32, i32
  }
}

</mosaic_0001>

<bundles_post_ra>
// kernel: tpu_custom_call.1
= control target key start
LH: loop header
LB: loop body
LE: loop exit
PB: predicated region body
PF: predicated region fallthrough
CT: control target
= control target key end

     0   :  { %14 = vsyncpa [#allocation3], 0  ;;  %s3901_s0 = inlined_call_operand.hbm [shape: f32[16,44], index: 0, kind: input, shape index: {}]   ;;  %s3902_s1 = inlined_call_operand.hbm [shape: s8[44,1024], index: 1, kind: input, shape index: {}]   ;;  %s3903_s2 = inlined_call_operand.hbm [shape: s8[1024,512], index: 2, kind: input, shape index: {}]   ;;  %s3904_s3 = inlined_call_operand.hbm [shape: s8[512,1024], index: 3, kind: input, shape index: {}]   ;;  %s3905_s4 = inlined_call_operand.hbm [shape: s8[1024,256], index: 4, kind: input, shape index: {}]   ;;  %s3906_s5 = inlined_call_operand.hbm [shape: s8[3,256,256], index: 5, kind: input, shape index: {}]   ;;  %s3907_s6 = inlined_call_operand.hbm [shape: s8[256,128], index: 6, kind: input, shape index: {}]   ;;  %s3908_s7 = inlined_call_operand.hbm [shape: f32[1,3712], index: 7, kind: input, shape index: {}]   ;;  %s3909_s8 = inlined_call_operand.hbm [shape: f32[1,3712], index: 8, kind: input, shape index: {}]   ;;  %s3910_s9 = inlined_call_operand.hbm [shape: f32[16,128], index: 9, kind: output, shape index: {}]  }
   0x1   :  { %15 = vsyncpa [#allocation6], 0 }
   0x2   :  { %16 = vsyncpa [#allocation9], 0 }
   0x3   :  { %17 = vsyncpa [#allocation12], 0 }
   0x4   :  { %18 = vsyncpa [#allocation15], 0 }
   0x5   :  { %19 = vsyncpa [#allocation4], 0  ;;  %s3496_s30 = smov [#allocation5]  }
   0x6   :  { %s37_s10 = sshll.u32 %s3496_s30, 4  ;;  %s38_s10 = int_to_ptr.vmem [resolvable:$true] %s37_s10 }
   0x7   :  { %s3292_s11 = scalar_lea.vmem %s38_s10, 1536  ;;  %p3297_p1 = scmp.lt.s32.totalorder %s38_s10, %s38_s10 }
   0x8   :  { %p3293_p0 = scmp.ne.s32.totalorder %s38_s10, %s3292_s11  ;;  %p3298_p2 = scmp.lt.s32.totalorder %s3292_s11, %s3292_s11 }
   0xa   :  { %p3299_p3 = por %p3298_p2, %p3297_p1 }
   0xc   :  { %p3300_p4 = pnand %p3299_p3, %p3293_p0 }
   0xe   :  { %3303 = shalt.err (!%p3300_p4)
}
   0xf   :  { %s3497_s12 = smov 256   ;;  %s3498_s13 = smov 16  }
  0x10   :  { %43 = dma.hbm_to_vmem [thread:$0]  %s3902_s1, 1536, %s38_s10, [#allocation6], %s3497_s12, %s3497_s12, %s3498_s13  }
  0x11   :  { %s3499_s16 = smov [#allocation8]  }
  0x12   :  { %s61_s17 = sshll.u32 %s3499_s16, 4  ;;  %s62_s17 = int_to_ptr.vmem [resolvable:$true] %s61_s17 }
  0x13   :  { %s3312_s18 = scalar_lea.vmem %s62_s17, 16384  ;;  %p3317_p6 = scmp.lt.s32.totalorder %s62_s17, %s62_s17 }
  0x14   :  { %p3313_p5 = scmp.ne.s32.totalorder %s62_s17, %s3312_s18  ;;  %p3318_p7 = scmp.lt.s32.totalorder %s3312_s18, %s3312_s18 }
  0x16   :  { %p3319_p8 = por %p3318_p7, %p3317_p6 }
  0x18   :  { %p3320_p9 = pnand %p3319_p8, %p3313_p5 }
  0x1a   :  { %3323 = shalt.err (!%p3320_p9)
}
  0x1b   :  { %s3500_s19 = smov 1024   ;;  %s3501_s20 = smov 64  }
  0x1c   :  { %67 = dma.hbm_to_vmem [thread:$0]  %s3904_s3, 16384, %s62_s17, [#allocation9], %s3500_s19, %s3500_s19, %s3501_s20  }
  0x1d   :  { %s3502_s23 = smov [#allocation11]   ;;  %s3503_s25 = smov [#allocation14]  }
  0x1e   :  { %s85_s24 = sshll.u32 %s3502_s23, 4  ;;  %s110_s1 = sshll.u32 %s3503_s25, 4  ;;  %s86_s24 = int_to_ptr.vmem [resolvable:$true] %s85_s24  ;;  %s111_s1 = int_to_ptr.vmem [resolvable:$true] %s110_s1 }
  0x1f   :  { %s3332_s26 = scalar_lea.vmem %s86_s24, 6144  ;;  %p3337_p11 = scmp.lt.s32.totalorder %s86_s24, %s86_s24 }
  0x20   :  { %p3333_p10 = scmp.ne.s32.totalorder %s86_s24, %s3332_s26  ;;  %p3338_p12 = scmp.lt.s32.totalorder %s3332_s26, %s3332_s26 }
  0x22   :  { %p3339_p13 = por %p3338_p12, %p3337_p11 }
  0x24   :  { %p3340_p0 = pnand %p3339_p13, %p3333_p10 }
  0x26   :  { %3343 = shalt.err (!%p3340_p0)
}
  0x27   :  { %91 = dma.hbm_to_vmem [thread:$0]  %s3906_s5, 6144, %s86_s24, [#allocation12], %s3497_s12, %s3497_s12, %s3498_s13  }
  0x28   :  { %s3352_s3 = scalar_lea.vmem %s111_s1, 464  ;;  %s3356_s29 = scalar_lea.vmem %s111_s1, 480 }
  0x29   :  { %p3353_p1 = scmp.ne.s32.totalorder %s111_s1, %s3352_s3  ;;  %p3357_p2 = scmp.lt.s32.totalorder %s111_s1, %s111_s1 }
  0x2a   :  { %p3358_p3 = scmp.lt.s32.totalorder %s3356_s29, %s3352_s3 }
  0x2c   :  { %p3359_p4 = por %p3358_p3, %p3357_p2 }
  0x2e   :  { %p3360_p5 = pnand %p3359_p4, %p3353_p1 }
  0x30   :  { %3363 = shalt.err (!%p3360_p5)
}
  0x31   :  { %113 = dma.hbm_to_vmem [thread:$0]  %s3908_s7, 464, %s111_s1, [#allocation15]  }
  0x32   :  { %s3504_s11 = smov [#allocation2]  }
  0x33   :  { %s25_s14 = sshll.u32 %s3504_s11, 4  ;;  %s26_s14 = int_to_ptr.vmem [resolvable:$true] %s25_s14 }
  0x34   :  { %s3372_s15 = scalar_lea.vmem %s26_s14, 256  ;;  %p3377_p7 = scmp.lt.s32.totalorder %s26_s14, %s26_s14 }
  0x35   :  { %p3373_p6 = scmp.ne.s32.totalorder %s26_s14, %s3372_s15  ;;  %p3378_p8 = scmp.lt.s32.totalorder %s3372_s15, %s3372_s15 }
  0x37   :  { %p3379_p9 = por %p3378_p8, %p3377_p7 }
  0x39   :  { %p3380_p10 = pnand %p3379_p9, %p3373_p6 }
  0x3b   :  { %3383 = shalt.err (!%p3380_p10)
}
  0x3c   :  { %s3505_s5 = smov 128   ;;  %s3506_s16 = smov 8  }
  0x3d   :  { %31 = dma.hbm_to_vmem [thread:$0]  %s3901_s0, 256, %s26_s14, [#allocation3], %s3505_s5, %s3505_s5, %s3506_s16  }
  0x3e   :  { %s3507_s7 = smov [#allocation7]  }
  0x3f   :  { %s49_s19 = sshll.u32 %s3507_s7, 4  ;;  %s50_s19 = int_to_ptr.vmem [resolvable:$true] %s49_s19 }
  0x40   :  { %s3392_s20 = scalar_lea.vmem %s50_s19, 16384  ;;  %p3397_p12 = scmp.lt.s32.totalorder %s50_s19, %s50_s19 }
  0x41   :  { %p3393_p11 = scmp.ne.s32.totalorder %s50_s19, %s3392_s20  ;;  %p3398_p13 = scmp.lt.s32.totalorder %s3392_s20, %s3392_s20 }
  0x43   :  { %p3399_p0 = por %p3398_p13, %p3397_p12 }
  0x45   :  { %p3400_p1 = pnand %p3399_p0, %p3393_p11 }
  0x47   :  { %3403 = shalt.err (!%p3400_p1)
}
  0x48   :  { %s3508_s21 = smov 512   ;;  %s3509_s22 = smov 32  }
  0x49   :  { %55 = dma.hbm_to_vmem [thread:$0]  %s3903_s2, 16384, %s50_s19, [#allocation6], %s3508_s21, %s3508_s21, %s3509_s22  }
  0x4a   :  { %s3510_s25 = smov [#allocation10]   ;;  %s3511_s26 = smov [#allocation13]  }
  0x4b   :  { %s73_s1 = sshll.u32 %s3510_s25, 4  ;;  %s97_s0 = sshll.u32 %s3511_s26, 4  ;;  %s74_s1 = int_to_ptr.vmem [resolvable:$true] %s73_s1  ;;  %s98_s0 = int_to_ptr.vmem [resolvable:$true] %s97_s0 }
  0x4c   :  { %s3412_s27 = scalar_lea.vmem %s74_s1, 8192  ;;  %p3417_p3 = scmp.lt.s32.totalorder %s74_s1, %s74_s1 }
  0x4d   :  { %p3413_p2 = scmp.ne.s32.totalorder %s74_s1, %s3412_s27  ;;  %p3418_p4 = scmp.lt.s32.totalorder %s3412_s27, %s3412_s27 }
  0x4f   :  { %p3419_p5 = por %p3418_p4, %p3417_p3 }
  0x51   :  { %p3420_p6 = pnand %p3419_p5, %p3413_p2 }
  0x53   :  { %3423 = shalt.err (!%p3420_p6)
}
  0x54   :  { %79 = dma.hbm_to_vmem [thread:$0]  %s3905_s4, 8192, %s74_s1, [#allocation9], %s3497_s12, %s3497_s12, %s3498_s13  }
  0x55   :  { %s3432_s2 = scalar_lea.vmem %s98_s0, 1024  ;;  %p3437_p8 = scmp.lt.s32.totalorder %s98_s0, %s98_s0 }
  0x56   :  { %p3433_p7 = scmp.ne.s32.totalorder %s98_s0, %s3432_s2  ;;  %p3438_p9 = scmp.lt.s32.totalorder %s3432_s2, %s3432_s2 }
  0x58   :  { %p3439_p10 = por %p3438_p9, %p3437_p8 }
  0x5a   :  { %p3440_p11 = pnand %p3439_p10, %p3433_p7 }
  0x5c   :  { %3443 = shalt.err (!%p3440_p11)
}
  0x5d   :  { %103 = dma.hbm_to_vmem [thread:$0]  %s3907_s6, 1024, %s98_s0, [#allocation12], %s3505_s5, %s3505_s5, %s3506_s16  }
  0x5e   :  { %s3512_s10 = smov [#allocation16]  }
  0x5f   :  { %s120_s11 = sshll.u32 %s3512_s10, 4  ;;  %s121_s11 = int_to_ptr.vmem [resolvable:$true] %s120_s11 }
  0x60   :  { %s3452_s14 = scalar_lea.vmem %s121_s11, 464  ;;  %s3456_s4 = scalar_lea.vmem %s121_s11, 480 }
  0x61   :  { %p3453_p12 = scmp.ne.s32.totalorder %s121_s11, %s3452_s14  ;;  %p3457_p13 = scmp.lt.s32.totalorder %s121_s11, %s121_s11 }
  0x62   :  { %p3458_p0 = scmp.lt.s32.totalorder %s3456_s4, %s3452_s14 }
  0x64   :  { %p3459_p1 = por %p3458_p0, %p3457_p13 }
  0x66   :  { %p3460_p2 = pnand %p3459_p1, %p3453_p12 }
  0x68   :  { %3463 = shalt.err (!%p3460_p2)
}
  0x69   :  { %123 = dma.hbm_to_vmem [thread:$0]  %s3909_s8, 464, %s121_s11, [#allocation15]  }
  0x6a   :  { %3484 = dma.done.wait [#allocation3], 256  }
  0x6b   :  { %3485 = vsyncadd [#allocation3], 4294967040 }
  0x6c   :  { %3486 = dma.done.wait [#allocation6], 17920  }
  0x6d   :  { %3487 = vsyncadd [#allocation6], 4294949376 }
  0x6e   :  { %3488 = dma.done.wait [#allocation9], 24576  }
  0x6f   :  { %3489 = vsyncadd [#allocation9], 4294942720 }
  0x70   :  { %3490 = dma.done.wait [#allocation12], 7168  }
  0x71   :  { %3491 = vsyncadd [#allocation12], 4294960128 }
  0x72   :  { %3492 = dma.done.wait [#allocation15], 928  }
  0x73   :  { %3493 = vsyncadd [#allocation15], 4294966368  ;;  %v3513_v0 = vmov 0   ;;  %v163_v1 = vld [vmem:[#allocation5 + $0x40] sm:$0xff]  ;;  %v165_v2 = vld [vmem:[#allocation5 + $0x50] sm:$0x55] }
  0x74   :  { %364 = vmatprep.mubr.bf16.mxu1 %v3513_v0  ;;  %450 = vmatprep.mubr.bf16.mxu0 %v3513_v0  ;;  %v3609_v3 = vld [vmem:[#allocation5 + $0x20] sm:$0xff]  ;;  %v183_v4 = vunpack.c.l.s8.bf16 %v163_v1  ;;  %v187_v5 = vunpack.c.l.s8.bf16 %v165_v2  ;;  %v3611_v6 = vld [vmem:[#allocation5 + $0x30] sm:$0xff]  ;;  %vm307_vm0 = vcmask 1045504   ;;  %v3621_v15 = vld [vmem:[#allocation5 + $0x48] sm:$0xff]  ;;  %v184_v20 = vunpack.c.h.s8.bf16 %v163_v1  ;;  %s3514_s6 = smov [#allocation17]  }
  0x75   :  { %v3613_v7 = vld [vmem:[#allocation5] sm:$0xff]  ;;  %v3615_v8 = vld [vmem:[#allocation5 + $0x10] sm:$0xff]  ;;  %v175_v9 = vunpack.c.l.s8.bf16 %v3609_v3  ;;  %v179_v10 = vunpack.c.l.s8.bf16 %v3611_v6  ;;  %v3623_v17 = vld [vmem:[#allocation5 + $0x58] sm:$0x55]  ;;  %v188_v21 = vunpack.c.h.s8.bf16 %v165_v2  ;;  %v185_v23 = vunpack.c.l.s8.bf16 %v3621_v15  ;;  %s3193_s8 = sshll.u32 %s3514_s6, 4  ;;  %s3194_s8 = int_to_ptr.vmem [resolvable:$true] %s3193_s8 }
  0x76   :  { %v3226_v11 = vcombine.high %v183_v4, %v187_v5  ;;  %v3225_v12 = vcombine.low %v183_v4, %v187_v5  ;;  %v167_v13 = vunpack.c.l.s8.bf16 %v3613_v7  ;;  %v171_v14 = vunpack.c.l.s8.bf16 %v3615_v8  ;;  %v3627_v19 = vld [vmem:[#allocation5 + $0x28] sm:$0xff]  ;;  %v3630_v24 = vld [vmem:[#allocation5 + $0x38] sm:$0xff]  ;;  %v152_v35 = vld [vmem:[#allocation2] sm:$0xff]  ;;  %s3464_s15 = scalar_lea.vmem %s3194_s8, 256  ;;  %p3469_p4 = scmp.lt.s32.totalorder %s3194_s8, %s3194_s8 }
  0x77   :  { %v3218_v16 = vcombine.high %v175_v9, %v179_v10  ;;  %v3217_v22 = vcombine.low %v175_v9, %v179_v10  ;;  %v3632_v25 = vld [vmem:[#allocation5 + $0x8] sm:$0xff]  ;;  %v189_v27 = vunpack.c.l.s8.bf16 %v3623_v17  ;;  %v3635_v28 = vld [vmem:[#allocation5 + $0x18] sm:$0xff]  ;;  %v177_v29 = vunpack.c.l.s8.bf16 %v3627_v19  ;;  %v656_v54 = vld [vmem:[#allocation7 + $0x60] sm:$0xff]  ;;  %p3465_p3 = scmp.ne.s32.totalorder %s3194_s8, %s3464_s15  ;;  %p3470_p5 = scmp.lt.s32.totalorder %s3464_s15, %s3464_s15 }
  0x78   :  { %3233 = vmatprep.subr.msk.bf16.mxu1 %vm307_vm0, %v3226_v11  ;;  %v309_v18 = vsel %vm307_vm0, %v3225_v12, 0  ;;  %v3210_v26 = vcombine.high %v167_v13, %v171_v14  ;;  %v181_v32 = vunpack.c.l.s8.bf16 %v3630_v24  ;;  %v169_v33 = vunpack.c.l.s8.bf16 %v3632_v25  ;;  %v153_v36 = vld [vmem:[#allocation2 + $0x8] sm:$0xff]  ;;  %v657_v47 = vld [vmem:[#allocation7 + $0x68] sm:$0xff] }
  0x79   :  { %343 = vmatpush1.bf16.msra.mxu1 %v309_v18  ;;  %v3230_v30 = vcombine.high %v185_v23, %v189_v27  ;;  %v3229_v31 = vcombine.low %v185_v23, %v189_v27  ;;  %v3209_v34 = vcombine.low %v167_v13, %v171_v14  ;;  %v3228_v37 = vcombine.high %v184_v20, %v188_v21  ;;  %v653_v62 = vld [vmem:[#allocation7 + $0x48] sm:$0xff]  ;;  %p3471_p6 = por %p3470_p5, %p3469_p4 }
  0x7a   :  { %344 = vmatprep.subr.bf16.mxu1 %v3218_v16  ;;  %v3227_v38 = vcombine.low %v184_v20, %v188_v21  ;;  %v173_v39 = vunpack.c.l.s8.bf16 %v3635_v28  ;;  %v176_v40 = vunpack.c.h.s8.bf16 %v3609_v3  ;;  %v180_v41 = vunpack.c.h.s8.bf16 %v3611_v6  ;;  %v652_v6 = vld [vmem:[#allocation7 + $0x40] sm:$0xff]  ;;  %v649_v14 = vld [vmem:[#allocation7 + $0x28] sm:$0xff] }
  0x7b   :  { %3237 = vmatprep.subr.msk.bf16.mxu0 %vm307_vm0, %v3230_v30  ;;  %v321_v42 = vsel %vm307_vm0, %v3229_v31, 0  ;;  %v3222_v43 = vcombine.high %v177_v29, %v181_v32  ;;  %v3221_v44 = vcombine.low %v177_v29, %v181_v32  ;;  %v3645_v45 = vpack.c.bf16 %v153_v36, %v152_v35  ;;  %v689_v16 = vld [vmem:[#allocation7 + $0x168] sm:$0xff]  ;;  %v644_v30 = vld [vmem:[#allocation7] sm:$0xff]  ;;  %p3472_p7 = pnand %p3471_p6, %p3465_p3 }
  0x7c   :  { %429 = vmatpush1.bf16.msra.mxu0 %v321_v42  ;;  %v3214_v46 = vcombine.high %v169_v33, %v173_v39  ;;  %vm303_vm1 = vcmask 359424   ;;  %v315_v48 = vsel %vm307_vm0, %v3227_v38, 0  ;;  %v3220_v49 = vcombine.high %v176_v40, %v180_v41  ;;  %v685_v27 = vld [vmem:[#allocation7 + $0x148] sm:$0xff]  ;;  %v672_v42 = vld [vmem:[#allocation7 + $0xe0] sm:$0xff] }
  0x7d   :  { %345 = vmatpush1.bf16.msra.mxu1 %v3217_v22  ;;  %430 = vmatprep.subr.bf16.mxu0 %v3222_v43  ;;  %v168_v50 = vunpack.c.h.s8.bf16 %v3613_v7  ;;  %v172_v51 = vunpack.c.h.s8.bf16 %v3615_v8  ;;  %v3213_v52 = vcombine.low %v169_v33, %v173_v39  ;;  %v801_v53 = vunpack.c.h.s8.bf16 %v657_v47  ;;  %v688_v22 = vld [vmem:[#allocation7 + $0x160] sm:$0xff]  ;;  %v681_v39 = vld [vmem:[#allocation7 + $0x128] sm:$0xff] }
  0x7e   :  { %346 = vmatprep.subr.bf16.mxu1 %v3210_v26  ;;  %v3219_v55 = vcombine.low %v176_v40, %v180_v41  ;;  %v186_v57 = vunpack.c.h.s8.bf16 %v3621_v15  ;;  %v190_v58 = vunpack.c.h.s8.bf16 %v3623_v17  ;;  %v800_v59 = vunpack.c.h.s8.bf16 %v656_v54  ;;  %v684_v33 = vld [vmem:[#allocation7 + $0x140] sm:$0xff] }
  0x7f   :  { %v3212_v56 = vcombine.high %v168_v50, %v172_v51  ;;  %v797_v60 = vunpack.c.l.s8.bf16 %v657_v47  ;;  %v3211_v61 = vcombine.low %v168_v50, %v172_v51  ;;  %v178_v2 = vunpack.c.h.s8.bf16 %v3627_v19  ;;  %v648_v19 = vld [vmem:[#allocation7 + $0x20] sm:$0xff]  ;;  %v677_v51 = vld [vmem:[#allocation7 + $0x108] sm:$0xff] }
  0x80   :  { %431 = vmatpush1.bf16.msra.mxu0 %v3221_v44  ;;  %v3232_v63 = vcombine.high %v186_v57, %v190_v58  ;;  %v3231_v1 = vcombine.low %v186_v57, %v190_v58  ;;  %v182_v3 = vunpack.c.h.s8.bf16 %v3630_v24  ;;  %v796_v4 = vunpack.c.l.s8.bf16 %v656_v54  ;;  %v668_v54 = vld [vmem:[#allocation7 + $0xc0] sm:$0xff] }
  0x81   :  { %347 = vmatpush1.bf16.msra.mxu1 %v3209_v34  ;;  %432 = vmatprep.subr.bf16.mxu0 %v3214_v46  ;;  %v793_v5 = vunpack.c.h.s8.bf16 %v653_v62  ;;  %v170_v9 = vunpack.c.h.s8.bf16 %v3632_v25  ;;  %v174_v10 = vunpack.c.h.s8.bf16 %v3635_v28  ;;  %v792_v11 = vunpack.c.h.s8.bf16 %v652_v6  ;;  %v645_v25 = vld [vmem:[#allocation7 + $0x8] sm:$0xff]  ;;  %v676_v57 = vld [vmem:[#allocation7 + $0x100] sm:$0xff] }
  0x82   :  { %3235 = vmatprep.subr.msk.bf16.mxu1 %vm307_vm0, %v3228_v37  ;;  %v327_v7 = vsel %vm307_vm0, %v3231_v1, 0  ;;  %v3224_v8 = vcombine.high %v178_v2, %v182_v3  ;;  %v789_v12 = vunpack.c.l.s8.bf16 %v653_v62  ;;  %v3223_v13 = vcombine.low %v178_v2, %v182_v3  ;;  %v673_v37 = vld [vmem:[#allocation7 + $0xe8] sm:$0xff] }
  0x83   :  { %v3216_v15 = vcombine.high %v170_v9, %v174_v10  ;;  %v788_v17 = vunpack.c.l.s8.bf16 %v652_v6  ;;  %v785_v18 = vunpack.c.h.s8.bf16 %v649_v14  ;;  %v3215_v20 = vcombine.low %v170_v9, %v174_v10 }
  0x84   :  { %3234 = vmatmul.mubr.msk.bf16.vlgmr.msra.gmra.mxu1 %vm303_vm1, %v3645_v45  ;;  %433 = vmatpush1.bf16.msra.mxu0 %v3213_v52  ;;  %v865_v21 = vunpack.c.h.s8.bf16 %v689_v16  ;;  %v784_v23 = vunpack.c.h.s8.bf16 %v648_v19  ;;  %v781_v24 = vunpack.c.l.s8.bf16 %v649_v14  ;;  %v861_v26 = vunpack.c.l.s8.bf16 %v689_v16  ;;  %v700_v14 = vld [vmem:[#allocation7 + $0x1c0] sm:$0xff] }
  0x85   :  { %386 = vmatpush1.bf16.msra.mxu1 %v315_v48  ;;  %407 = vmatprep.mubr.bf16.mxu1 %v3513_v0  ;;  %v780_v28 = vunpack.c.l.s8.bf16 %v648_v19  ;;  %v777_v29 = vunpack.c.h.s8.bf16 %v645_v25  ;;  %v860_v31 = vunpack.c.l.s8.bf16 %v688_v22  ;;  %v857_v32 = vunpack.c.h.s8.bf16 %v685_v27 }
  0x86   :  { %387 = vmatprep.subr.bf16.mxu1 %v3220_v49  ;;  %1028 = vmatprep.subr.bf16.mxu0 %v801_v53  ;;  %v776_v34 = vunpack.c.h.s8.bf16 %v644_v30  ;;  %v773_v35 = vunpack.c.l.s8.bf16 %v645_v25  ;;  %v856_v36 = vunpack.c.h.s8.bf16 %v684_v33  ;;  %v853_v38 = vunpack.c.l.s8.bf16 %v685_v27  ;;  %v669_v49 = vld [vmem:[#allocation7 + $0xc8] sm:$0xff]  ;;  %v696_v25 = vld [vmem:[#allocation7 + $0x1a0] sm:$0xff] }
  0x87   :  { %3238 = vmatmul.mubr.msk.bf16.vlgmr.msra.gmra.mxu0 %vm303_vm1, %v3645_v45  ;;  %v772_v40 = vunpack.c.l.s8.bf16 %v644_v30  ;;  %v833_v41 = vunpack.c.h.s8.bf16 %v673_v37  ;;  %v852_v43 = vunpack.c.l.s8.bf16 %v684_v33  ;;  %v849_v44 = vunpack.c.h.s8.bf16 %v681_v39 }
  0x88   :  { %1029 = vmatpush1.bf16.msra.mxu0 %v800_v59  ;;  %v832_v46 = vunpack.c.h.s8.bf16 %v672_v42  ;;  %v829_v47 = vunpack.c.l.s8.bf16 %v673_v37  ;;  %v845_v50 = vunpack.c.l.s8.bf16 %v681_v39  ;;  %v828_v52 = vunpack.c.l.s8.bf16 %v672_v42 }
  0x89   :  { %388 = vmatpush1.bf16.msra.mxu1 %v3219_v55  ;;  %1030 = vmatprep.subr.bf16.mxu0 %v797_v60  ;;  %v825_v53 = vunpack.c.h.s8.bf16 %v669_v49  ;;  %v824_v58 = vunpack.c.h.s8.bf16 %v668_v54  ;;  %v821_v59 = vunpack.c.l.s8.bf16 %v669_v49  ;;  %v840_v60 = vunpack.c.h.s8.bf16 %v676_v57 }
  0x8a   :  { %389 = vmatprep.subr.bf16.mxu1 %v3212_v56  ;;  %v841_v56 = vunpack.c.h.s8.bf16 %v677_v51  ;;  %v837_v62 = vunpack.c.l.s8.bf16 %v677_v51  ;;  %v820_v1 = vunpack.c.l.s8.bf16 %v668_v54  ;;  %v836_v3 = vunpack.c.l.s8.bf16 %v676_v57 }
  0x8b   :  { %v888_v16 = vunpack.c.h.s8.bf16 %v700_v14  ;;  %v880_v27 = vunpack.c.h.s8.bf16 %v696_v25 }
  0x8c   :  { %1031 = vmatpush1.bf16.msra.mxu0 %v796_v4 }
  0x8d   :  { %390 = vmatpush1.bf16.msra.mxu1 %v3211_v61  ;;  %1032 = vmatprep.subr.bf16.mxu0 %v793_v5  ;;  %v665_v61 = vld [vmem:[#allocation7 + $0xa8] sm:$0xff]  ;;  %v704_v5 = vld [vmem:[#allocation7 + $0x1e0] sm:$0xff] }
  0x8e   :  { %3239 = vmatprep.subr.msk.bf16.mxu1 %vm307_vm0, %v3232_v63  ;;  %v705_v63 = vld [vmem:[#allocation7 + $0x1e8] sm:$0xff]  ;;  %v817_v2 = vunpack.c.h.s8.bf16 %v665_v61  ;;  %v896_v6 = vunpack.c.h.s8.bf16 %v704_v5  ;;  %v892_v10 = vunpack.c.l.s8.bf16 %v704_v5 }
  0x8f   :  { %v897_v4 = vunpack.c.h.s8.bf16 %v705_v63 }
  0x90   :  { %3236 = vmatmul.mubr.msk.bf16.vlgmr.msra.gmra.mxu1 %vm303_vm1, %v3645_v45  ;;  %1033 = vmatpush1.bf16.msra.mxu0 %v792_v11  ;;  %v701_v11 = vld [vmem:[#allocation7 + $0x1c8] sm:$0xff] }
  0x91   :  { %472 = vmatpush1.bf16.msra.mxu1 %v327_v7  ;;  %493 = vmatprep.mubr.bf16.mxu1 %v3513_v0  ;;  %v864_v0 = vunpack.c.h.s8.bf16 %v688_v22  ;;  %v893_v7 = vunpack.c.l.s8.bf16 %v705_v63  ;;  %v885_v19 = vunpack.c.l.s8.bf16 %v701_v11  ;;  %v884_v22 = vunpack.c.l.s8.bf16 %v700_v14 }
  0x92   :  { %473 = vmatprep.subr.bf16.mxu1 %v3224_v8  ;;  %1034 = vmatprep.subr.bf16.mxu0 %v789_v12  ;;  %v664_v8 = vld [vmem:[#allocation7 + $0xa0] sm:$0xff]  ;;  %v813_v12 = vunpack.c.l.s8.bf16 %v665_v61 }
  0x93   :  { %v816_v9 = vunpack.c.h.s8.bf16 %v664_v8 }
  0x94   :  { %1035 = vmatpush1.bf16.msra.mxu0 %v788_v17  ;;  %v661_v17 = vld [vmem:[#allocation7 + $0x88] sm:$0xff] }
  0x95   :  { %474 = vmatpush1.bf16.msra.mxu1 %v3223_v13  ;;  %1036 = vmatprep.subr.bf16.mxu0 %v785_v18  ;;  %v889_v13 = vunpack.c.h.s8.bf16 %v701_v11  ;;  %v809_v18 = vunpack.c.h.s8.bf16 %v661_v17 }
  0x96   :  { %475 = vmatprep.subr.bf16.mxu1 %v3216_v15  ;;  %v812_v15 = vunpack.c.l.s8.bf16 %v664_v8  ;;  %v720_v8 = vld [vmem:[#allocation7 + $0x260] sm:$0xff] }
  0x98   :  { %1037 = vmatpush1.bf16.msra.mxu0 %v784_v23  ;;  %v697_v23 = vld [vmem:[#allocation7 + $0x1a8] sm:$0xff] }
  0x99   :  { %476 = vmatpush1.bf16.msra.mxu1 %v3215_v20  ;;  %1038 = vmatprep.subr.bf16.mxu0 %v781_v24  ;;  %v660_v20 = vld [vmem:[#allocation7 + $0x80] sm:$0xff]  ;;  %v805_v24 = vunpack.c.l.s8.bf16 %v661_v17 }
  0x9a   :  { %1071 = vmatprep.subr.bf16.mxu1 %v865_v21  ;;  %v808_v21 = vunpack.c.h.s8.bf16 %v660_v20 }
  0x9c   :  { %3240 = vmatmul.mubr.msk.bf16.vlgmr.msra.gmra.mxu1 %vm303_vm1, %v3645_v45  ;;  %1039 = vmatpush1.bf16.msra.mxu0 %v780_v28  ;;  %v680_v45 = vld [vmem:[#allocation7 + $0x120] sm:$0xff]  ;;  %v3669_v28 = vld [vmem:[#allocation7 + $0x268] sm:$0xff] }
  0x9d   :  { %1072 = vmatpush1.bf16.msra.mxu1 %v864_v0  ;;  %1040 = vmatprep.subr.bf16.mxu0 %v777_v29  ;;  %v848_v48 = vunpack.c.h.s8.bf16 %v680_v45  ;;  %v844_v55 = vunpack.c.l.s8.bf16 %v680_v45  ;;  %v881_v0 = vunpack.c.h.s8.bf16 %v697_v23  ;;  %v877_v29 = vunpack.c.l.s8.bf16 %v697_v23 }
  0x9e   :  { %1073 = vmatprep.subr.bf16.mxu1 %v861_v26  ;;  %v804_v26 = vunpack.c.l.s8.bf16 %v660_v20  ;;  %v929_v30 = vunpack.c.h.s8.bf16 %v3669_v28  ;;  %v925_v23 = vunpack.c.l.s8.bf16 %v3669_v28 }
  0xa0   :  { %1041 = vmatpush1.bf16.msra.mxu0 %v776_v34  ;;  %v692_v34 = vld [vmem:[#allocation7 + $0x180] sm:$0xff] }
  0xa1   :  { %1074 = vmatpush1.bf16.msra.mxu1 %v860_v31  ;;  %1042 = vmatprep.subr.bf16.mxu0 %v773_v35  ;;  %v876_v31 = vunpack.c.l.s8.bf16 %v696_v25  ;;  %v872_v35 = vunpack.c.h.s8.bf16 %v692_v34  ;;  %v868_v37 = vunpack.c.l.s8.bf16 %v692_v34  ;;  %v717_v25 = vld [vmem:[#allocation7 + $0x248] sm:$0xff] }
  0xa2   :  { %1075 = vmatprep.subr.bf16.mxu1 %v857_v32  ;;  %v693_v32 = vld [vmem:[#allocation7 + $0x188] sm:$0xff] }
  0xa3   :  { %v873_v33 = vunpack.c.h.s8.bf16 %v693_v32 }
  0xa4   :  { %1043 = vmatpush1.bf16.msra.mxu0 %v772_v40  ;;  %v506_v40 = vlaneseq }
  0xa5   :  { %1076 = vmatpush1.bf16.msra.mxu1 %v856_v36  ;;  %1044 = vmatprep.subr.bf16.mxu0 %v833_v41  ;;  %v869_v36 = vunpack.c.l.s8.bf16 %v693_v32 }
  0xa6   :  { %1077 = vmatprep.subr.bf16.mxu1 %v853_v38  ;;  %v3672_v38 = vld [vmem:[#allocation7 + $0x368] sm:$0xff]  ;;  %v3675_v41 = vshrl.u32 %v506_v40, 7 }
  0xa7   :  { %v993_v39 = vunpack.c.h.s8.bf16 %v3672_v38 }
  0xa8   :  { %1045 = vmatpush2.bf16.msra.mxu0 %v832_v46  ;;  %v3678_v42 = vsub.s32 1, %v3675_v41  ;;  %v3692_v49 = vsub.s32 5, %v3675_v41 }
  0xa9   :  { %1078 = vmatpush1.bf16.msra.mxu1 %v852_v43  ;;  %1046 = vmatprep.subr.bf16.mxu0 %v829_v47  ;;  %v3680_v43 = vld [vmem:[#allocation16] sm:$0xff] }
  0xaa   :  { %1079 = vmatprep.subr.bf16.mxu1 %v849_v44  ;;  %v3683_v44 = vsub.s32 0, %v3675_v41  ;;  %v513_v45 = vrot.slane %v3680_v43, %v3678_v42  ;;  %v529_v57 = vrot.slane %v3680_v43, %v3692_v49 }
  0xac   :  { %1047 = vmatpush2.bf16.msra.mxu0 %v828_v52  ;;  %v509_v47 = vrot.slane %v3680_v43, %v3683_v44 }
  0xad   :  { %1080 = vmatpush1.bf16.msra.mxu1 %v848_v48  ;;  %1048 = vmatprep.subr.bf16.mxu0 %v825_v53  ;;  %v3689_v48 = vld [vmem:[#allocation14] sm:$0xff] }
  0xae   :  { %1081 = vmatprep.subr.bf16.mxu1 %v845_v50  ;;  %v571_v52 = vrot.slane %v3689_v48, %v3678_v42  ;;  %v567_v54 = vrot.slane %v3689_v48, %v3683_v44 }
  0xb0   :  { %1049 = vmatpush2.bf16.msra.mxu0 %v824_v58 }
  0xb1   :  { %1082 = vmatpush1.bf16.msra.mxu1 %v844_v55  ;;  %1050 = vmatprep.subr.bf16.mxu0 %v821_v59  ;;  %v3701_v59 = vsub.s32 3, %v3675_v41 }
  0xb2   :  { %1083 = vmatprep.subr.bf16.mxu1 %v841_v56 }
  0xb4   :  { %1051 = vmatpush2.bf16.msra.mxu0 %v820_v1  ;;  %v587_v1 = vrot.slane %v3689_v48, %v3692_v49 }
  0xb5   :  { %1084 = vmatpush1.bf16.msra.mxu1 %v840_v60  ;;  %1052 = vmatprep.subr.bf16.mxu0 %v817_v2 }
  0xb6   :  { %1085 = vmatprep.subr.bf16.mxu1 %v837_v62 }
  0xb8   :  { %1053 = vmatpush2.bf16.msra.mxu0 %v816_v9 }
  0xb9   :  { %1086 = vmatpush1.bf16.msra.mxu1 %v836_v3  ;;  %1054 = vmatprep.subr.bf16.mxu0 %v813_v12  ;;  %v3708_v3 = vsub.s32 2, %v3675_v41  ;;  %v521_v12 = vrot.slane %v3680_v43, %v3701_v59 }
  0xba   :  { %1087 = vmatprep.subr.bf16.mxu1 %v897_v4 }
  0xbc   :  { %1055 = vmatpush2.bf16.msra.mxu0 %v812_v15 }
  0xbd   :  { %1088 = vmatpush2.bf16.msra.mxu1 %v896_v6  ;;  %1056 = vmatprep.subr.bf16.mxu0 %v809_v18 }
  0xbe   :  { %1089 = vmatprep.subr.bf16.mxu1 %v893_v7 }
  0xc0   :  { %1057 = vmatpush2.bf16.msra.mxu0 %v808_v21 }
  0xc1   :  { %1090 = vmatpush2.bf16.msra.mxu1 %v892_v10  ;;  %1058 = vmatprep.subr.bf16.mxu0 %v805_v24 }
  0xc2   :  { %1091 = vmatprep.subr.bf16.mxu1 %v889_v13 }
  0xc4   :  { %1059 = vmatpush2.bf16.msra.mxu0 %v804_v26 }
  0xc5   :  { %1092 = vmatpush2.bf16.msra.mxu1 %v888_v16  ;;  %1114 = vmatprep.subr.bf16.mxu0 %v929_v30  ;;  %v517_v16 = vrot.slane %v3680_v43, %v3708_v3  ;;  %v575_v30 = vrot.slane %v3689_v48, %v3708_v3 }
  0xc6   :  { %1093 = vmatprep.subr.bf16.mxu1 %v885_v19  ;;  %v928_v19 = vunpack.c.h.s8.bf16 %v720_v8 }
  0xc9   :  { %1094 = vmatpush2.bf16.msra.mxu1 %v884_v22 }
  0xca   :  { %1095 = vmatprep.subr.bf16.mxu1 %v881_v0  ;;  %v579_v0 = vrot.slane %v3689_v48, %v3701_v59 }
  0xcd   :  { %1096 = vmatpush2.bf16.msra.mxu1 %v880_v27 }
  0xce   :  { %1097 = vmatprep.subr.bf16.mxu1 %v877_v29 }
  0xd1   :  { %1098 = vmatpush2.bf16.msra.mxu1 %v876_v31 }
  0xd2   :  { %1099 = vmatprep.subr.bf16.mxu1 %v873_v33  ;;  %v924_v33 = vunpack.c.l.s8.bf16 %v720_v8  ;;  %v712_v8 = vld [vmem:[#allocation7 + $0x220] sm:$0xff] }
  0xd5   :  { %1100 = vmatpush2.bf16.msra.mxu1 %v872_v35  ;;  %v921_v35 = vunpack.c.h.s8.bf16 %v717_v25 }
  0xd6   :  { %1101 = vmatprep.subr.bf16.mxu1 %v869_v36  ;;  %v716_v36 = vld [vmem:[#allocation7 + $0x240] sm:$0xff] }
  0xd9   :  { %1102 = vmatpush2.bf16.msra.mxu1 %v868_v37  ;;  %v3728_v37 = vsub.s32 7, %v3675_v41 }
  0xda   :  { %1157 = vmatprep.subr.bf16.mxu1 %v993_v39 }
 0x144   :  { %v366_v46 = vpop.f32.mrf.mxu1 }
 0x145   :  { %v546_v53 = vmul.f32 %v509_v47, %v366_v46 }
 0x146   :  { %v368_v50 = vpop.f32.mrf.mxu1 }
 0x147   :  { %v547_v51 = vmul.f32 %v513_v45, %v368_v50  ;;  %v3703_v60 = vpop.f32.mrf.mxu0  ;;  %v604_v2 = vadd.f32 %v567_v54, %v546_v53  ;;  %v917_v53 = vunpack.c.l.s8.bf16 %v717_v25 }
 0x148   :  { %v370_v55 = vpop.f32.mrf.mxu1 }
 0x149   :  { %v554_v56 = vmul.f32 %v509_v47, %v370_v55  ;;  %v605_v61 = vadd.f32 %v571_v52, %v547_v51  ;;  %v454_v4 = vpop.f32.mrf.mxu0  ;;  %v620_v14 = vmax.f32 %v604_v2, 0.0  ;;  %v920_v51 = vunpack.c.h.s8.bf16 %v716_v36 }
 0x14a   :  { %v372_v58 = vpop.f32.mrf.mxu1  ;;  %v551_v6 = vmul.f32 %v529_v57, %v454_v4  ;;  %v595_v4 = vrot.slane %v3689_v48, %v3728_v37 }
 0x14b   :  { %v612_v62 = vadd.f32 %v567_v54, %v554_v56  ;;  %v555_v63 = vmul.f32 %v513_v45, %v372_v58  ;;  %v3710_v9 = vpop.f32.mrf.mxu0  ;;  %v621_v10 = vmax.f32 %v605_v61, 0.0  ;;  %v752_v54 = vld [vmem:[#allocation7 + $0x360] sm:$0xff]  ;;  %v537_v58 = vrot.slane %v3680_v43, %v3728_v37 }
 0x14c   :  { %v609_v13 = vadd.f32 %v587_v1, %v551_v6  ;;  %v992_v2 = vunpack.c.h.s8.bf16 %v752_v54 }
 0x14d   :  { %v613_v5 = vadd.f32 %v571_v52, %v555_v63  ;;  %v628_v7 = vmax.f32 %v612_v62, 0.0  ;;  %v458_v17 = vpop.f32.mrf.mxu0 }
 0x14e   :  { %v559_v20 = vmul.f32 %v529_v57, %v458_v17  ;;  %v625_v26 = vmax.f32 %v609_v13, 0.0  ;;  %v713_v57 = vld [vmem:[#allocation7 + $0x228] sm:$0xff] }
 0x14f   :  { %v629_v11 = vmax.f32 %v613_v5, 0.0  ;;  %v3718_v21 = vpack.c.bf16 %v628_v7, %v620_v14  ;;  %v913_v6 = vunpack.c.h.s8.bf16 %v713_v57  ;;  %v989_v7 = vunpack.c.l.s8.bf16 %v3672_v38  ;;  %v748_v38 = vld [vmem:[#allocation7 + $0x340] sm:$0xff] }
 0x150   :  { %v409_v15 = vpop.f32.mrf.mxu1  ;;  %v617_v27 = vadd.f32 %v587_v1, %v559_v20  ;;  %v916_v1 = vunpack.c.l.s8.bf16 %v716_v36  ;;  %v912_v14 = vunpack.c.h.s8.bf16 %v712_v8  ;;  %v909_v17 = vunpack.c.l.s8.bf16 %v713_v57 }
 0x151   :  { %v3716_v18 = vpack.c.bf16 %v629_v11, %v621_v10  ;;  %v548_v29 = vmul.f32 %v517_v16, %v409_v15  ;;  %v749_v11 = vld [vmem:[#allocation7 + $0x348] sm:$0xff]  ;;  %v988_v15 = vunpack.c.l.s8.bf16 %v752_v54 }
 0x152   :  { %v411_v22 = vpop.f32.mrf.mxu1  ;;  %v633_v28 = vmax.f32 %v617_v27, 0.0 }
 0x153   :  { %v549_v24 = vmul.f32 %v521_v12, %v411_v22  ;;  %1060 = vmatprep.mubr.bf16.mxu0 %v3716_v18  ;;  %v606_v47 = vadd.f32 %v575_v30, %v548_v29  ;;  %v709_v22 = vld [vmem:[#allocation7 + $0x208] sm:$0xff]  ;;  %v981_v29 = vunpack.c.l.s8.bf16 %v749_v11 }
 0x154   :  { %v413_v31 = vpop.f32.mrf.mxu1  ;;  %1061 = vmatmul.mubr.bf16.vlgmr.msra.gmra.mxu0 %v3718_v21  ;;  %v3730_v46 = vpack.c.bf16 %v633_v28, %v625_v26  ;;  %v905_v27 = vunpack.c.h.s8.bf16 %v709_v22  ;;  %v980_v28 = vunpack.c.l.s8.bf16 %v748_v38 }
 0x155   :  { %v556_v32 = vmul.f32 %v517_v16, %v413_v31  ;;  %1115 = vmatpush1.bf16.msra.mxu0 %v928_v19  ;;  %v607_v39 = vadd.f32 %v579_v0, %v549_v24  ;;  %v622_v61 = vmax.f32 %v606_v47, 0.0  ;;  %v985_v19 = vunpack.c.h.s8.bf16 %v749_v11  ;;  %v745_v31 = vld [vmem:[#allocation7 + $0x328] sm:$0xff] }
 0x156   :  { %v415_v34 = vpop.f32.mrf.mxu1  ;;  %1116 = vmatprep.subr.bf16.mxu0 %v925_v23  ;;  %1146 = vmatprep.mubr.bf16.mxu0 %v3730_v46  ;;  %v908_v24 = vunpack.c.l.s8.bf16 %v712_v8  ;;  %v977_v36 = vunpack.c.h.s8.bf16 %v745_v31  ;;  %v769_v8 = vld [vmem:[#allocation7 + $0x3e8] sm:$0xff] }
 0x157   :  { %v614_v40 = vadd.f32 %v575_v30, %v556_v32  ;;  %v557_v45 = vmul.f32 %v521_v12, %v415_v34  ;;  %v623_v55 = vmax.f32 %v607_v39, 0.0  ;;  %v708_v30 = vld [vmem:[#allocation7 + $0x200] sm:$0xff] }
 0x158   :  { %v744_v39 = vld [vmem:[#allocation7 + $0x320] sm:$0xff] }
 0x159   :  { %v615_v50 = vadd.f32 %v579_v0, %v557_v45  ;;  %1117 = vmatpush1.bf16.msra.mxu0 %v924_v33  ;;  %v630_v52 = vmax.f32 %v614_v40, 0.0  ;;  %v984_v0 = vunpack.c.h.s8.bf16 %v748_v38  ;;  %v904_v33 = vunpack.c.h.s8.bf16 %v708_v30  ;;  %v737_v40 = vld [vmem:[#allocation7 + $0x2e8] sm:$0xff] }
 0x15a   :  { %1118 = vmatprep.subr.bf16.mxu0 %v921_v35  ;;  %v901_v35 = vunpack.c.l.s8.bf16 %v709_v22  ;;  %v900_v45 = vunpack.c.l.s8.bf16 %v708_v30  ;;  %v976_v47 = vunpack.c.h.s8.bf16 %v744_v39  ;;  %v1021_v22 = vunpack.c.l.s8.bf16 %v769_v8  ;;  %v764_v30 = vld [vmem:[#allocation7 + $0x3c0] sm:$0xff] }
 0x15b   :  { %v631_v56 = vmax.f32 %v615_v50, 0.0  ;;  %v3741_v5 = vpack.c.bf16 %v630_v52, %v622_v61  ;;  %v961_v50 = vunpack.c.h.s8.bf16 %v737_v40  ;;  %v736_v52 = vld [vmem:[#allocation7 + $0x2e0] sm:$0xff]  ;;  %v733_v61 = vld [vmem:[#allocation7 + $0x2c8] sm:$0xff] }
 0x15c   :  { %v3735_v62 = vpop.f32.mrf.mxu1  ;;  %v960_v54 = vunpack.c.h.s8.bf16 %v736_v52 }
 0x15d   :  { %1119 = vmatpush1.bf16.msra.mxu0 %v920_v51  ;;  %v3737_v63 = vpack.c.bf16 %v631_v56, %v623_v55  ;;  %v973_v51 = vunpack.c.l.s8.bf16 %v745_v31  ;;  %v972_v55 = vunpack.c.l.s8.bf16 %v744_v39  ;;  %v957_v56 = vunpack.c.l.s8.bf16 %v737_v40  ;;  %v725_v31 = vld [vmem:[#allocation7 + $0x288] sm:$0xff] }
 0x15e   :  { %1120 = vmatprep.subr.bf16.mxu0 %v917_v53  ;;  %v497_v10 = vpop.f32.mrf.mxu1  ;;  %v741_v53 = vld [vmem:[#allocation7 + $0x308] sm:$0xff]  ;;  %v937_v39 = vunpack.c.h.s8.bf16 %v725_v31 }
 0x15f   :  { %1103 = vmatprep.mubr.bf16.mxu1 %v3737_v63  ;;  %v553_v12 = vmul.f32 %v537_v58, %v497_v10  ;;  %v969_v57 = vunpack.c.h.s8.bf16 %v741_v53 }
 0x160   :  { %1104 = vmatmul.mubr.bf16.vlgmr.msra.gmra.mxu1 %v3741_v5  ;;  %v3746_v13 = vpop.f32.mrf.mxu1 }
 0x161   :  { %1121 = vmatpush1.bf16.msra.mxu0 %v916_v1  ;;  %1158 = vmatpush1.bf16.msra.mxu1 %v992_v2  ;;  %v611_v16 = vadd.f32 %v595_v4, %v553_v12  ;;  %v956_v1 = vunpack.c.l.s8.bf16 %v736_v52  ;;  %v949_v12 = vunpack.c.l.s8.bf16 %v733_v61  ;;  %v1012_v52 = vunpack.c.l.s8.bf16 %v764_v30 }
 0x162   :  { %1122 = vmatprep.subr.bf16.mxu0 %v913_v6  ;;  %1159 = vmatprep.subr.bf16.mxu1 %v989_v7  ;;  %v501_v20 = vpop.f32.mrf.mxu1  ;;  %v965_v6 = vunpack.c.l.s8.bf16 %v741_v53  ;;  %v732_v7 = vld [vmem:[#allocation7 + $0x2c0] sm:$0xff]  ;;  %v3761_v53 = vsub.s32 6, %v3675_v41 }
 0x163   :  { %v561_v23 = vmul.f32 %v537_v58, %v501_v20  ;;  %v627_v25 = vmax.f32 %v611_v16, 0.0  ;;  %v740_v58 = vld [vmem:[#allocation7 + $0x300] sm:$0xff]  ;;  %v952_v10 = vunpack.c.h.s8.bf16 %v732_v7  ;;  %v729_v16 = vld [vmem:[#allocation7 + $0x2a8] sm:$0xff] }
 0x164   :  { %v968_v2 = vunpack.c.h.s8.bf16 %v740_v58  ;;  %v964_v11 = vunpack.c.l.s8.bf16 %v740_v58  ;;  %v945_v20 = vunpack.c.h.s8.bf16 %v729_v16 }
 0x165   :  { %1123 = vmatpush1.bf16.msra.mxu0 %v912_v14  ;;  %1160 = vmatpush1.bf16.msra.mxu1 %v988_v15  ;;  %v619_v26 = vadd.f32 %v595_v4, %v561_v23  ;;  %v953_v4 = vunpack.c.h.s8.bf16 %v733_v61  ;;  %v1025_v14 = vunpack.c.h.s8.bf16 %v769_v8  ;;  %v768_v15 = vld [vmem:[#allocation7 + $0x3e0] sm:$0xff] }
 0x166   :  { %1124 = vmatprep.subr.bf16.mxu0 %v909_v17  ;;  %1161 = vmatprep.subr.bf16.mxu1 %v985_v19  ;;  %v3752_v17 = vsub.s32 4, %v3675_v41  ;;  %v948_v19 = vunpack.c.l.s8.bf16 %v732_v7  ;;  %v1024_v38 = vunpack.c.h.s8.bf16 %v768_v15  ;;  %v728_v23 = vld [vmem:[#allocation7 + $0x2a0] sm:$0xff]  ;;  %v757_v7 = vld [vmem:[#allocation7 + $0x388] sm:$0xff] }
 0x167   :  { %v635_v32 = vmax.f32 %v619_v26, 0.0  ;;  %v1020_v26 = vunpack.c.l.s8.bf16 %v768_v15 }
 0x169   :  { %1125 = vmatpush1.bf16.msra.mxu0 %v908_v24  ;;  %1162 = vmatpush1.bf16.msra.mxu1 %v984_v0  ;;  %v3748_v34 = vpack.c.bf16 %v635_v32, %v627_v25  ;;  %v765_v24 = vld [vmem:[#allocation7 + $0x3c8] sm:$0xff]  ;;  %v525_v0 = vrot.slane %v3680_v43, %v3752_v17  ;;  %v944_v25 = vunpack.c.h.s8.bf16 %v728_v23 }
 0x16a   :  { %1126 = vmatprep.subr.bf16.mxu0 %v905_v27  ;;  %1163 = vmatprep.subr.bf16.mxu1 %v981_v29  ;;  %v941_v27 = vunpack.c.l.s8.bf16 %v729_v16  ;;  %v1017_v29 = vunpack.c.h.s8.bf16 %v765_v24  ;;  %v1013_v40 = vunpack.c.l.s8.bf16 %v765_v24  ;;  %v756_v16 = vld [vmem:[#allocation7 + $0x380] sm:$0xff] }
 0x16b   :  { %1189 = vmatprep.mubr.bf16.mxu1 %v3748_v34  ;;  %v550_v32 = vmul.f32 %v525_v0, %v3703_v60 }
 0x16d   :  { %1127 = vmatpush1.bf16.msra.mxu0 %v904_v33  ;;  %1164 = vmatpush1.bf16.msra.mxu1 %v980_v28  ;;  %v583_v33 = vrot.slane %v3689_v48, %v3752_v17  ;;  %v558_v28 = vmul.f32 %v525_v0, %v3710_v9  ;;  %v933_v9 = vunpack.c.l.s8.bf16 %v725_v31  ;;  %v691_v0 = vld [vmem:[#allocation7 + $0x178] sm:$0xff] }
 0x16e   :  { %1128 = vmatprep.subr.bf16.mxu0 %v901_v35  ;;  %1165 = vmatprep.subr.bf16.mxu1 %v977_v36  ;;  %v940_v35 = vunpack.c.l.s8.bf16 %v728_v23  ;;  %v1016_v36 = vunpack.c.h.s8.bf16 %v764_v30  ;;  %v867_v31 = vunpack.c.h.s8.bf16 %v691_v0 }
 0x171   :  { %1129 = vmatpush1.bf16.msra.mxu0 %v900_v45  ;;  %1166 = vmatpush1.bf16.msra.mxu1 %v976_v47  ;;  %v724_v45 = vld [vmem:[#allocation7 + $0x280] sm:$0xff]  ;;  %v761_v47 = vld [vmem:[#allocation7 + $0x3a8] sm:$0xff] }
 0x172   :  { %1130 = vmatprep.subr.bf16.mxu0 %v961_v50  ;;  %1167 = vmatprep.subr.bf16.mxu1 %v973_v51  ;;  %v608_v50 = vadd.f32 %v583_v33, %v550_v32  ;;  %v616_v51 = vadd.f32 %v583_v33, %v558_v28  ;;  %v936_v60 = vunpack.c.h.s8.bf16 %v724_v45  ;;  %v932_v61 = vunpack.c.l.s8.bf16 %v724_v45  ;;  %v690_v32 = vld [vmem:[#allocation7 + $0x170] sm:$0xff]  ;;  %v651_v33 = vld [vmem:[#allocation7 + $0x38] sm:$0xff] }
 0x173   :  { %v866_v28 = vunpack.c.h.s8.bf16 %v690_v32  ;;  %v687_v45 = vld [vmem:[#allocation7 + $0x158] sm:$0xff] }
 0x174   :  { %v632_v58 = vmax.f32 %v616_v51, 0.0  ;;  %v783_v51 = vunpack.c.l.s8.bf16 %v651_v33 }
 0x175   :  { %1131 = vmatpush2.bf16.msra.mxu0 %v960_v54  ;;  %1168 = vmatpush1.bf16.msra.mxu1 %v972_v55  ;;  %v1009_v54 = vunpack.c.h.s8.bf16 %v761_v47  ;;  %v760_v55 = vld [vmem:[#allocation7 + $0x3a0] sm:$0xff] }
 0x176   :  { %1132 = vmatprep.subr.bf16.mxu0 %v957_v56  ;;  %1169 = vmatprep.subr.bf16.mxu1 %v969_v57  ;;  %v659_v56 = vld [vmem:[#allocation7 + $0x78] sm:$0xff]  ;;  %v624_v57 = vmax.f32 %v608_v50, 0.0  ;;  %v862_v50 = vunpack.c.l.s8.bf16 %v690_v32 }
 0x177   :  { %v803_v41 = vunpack.c.h.s8.bf16 %v659_v56 }
 0x178   :  { %v3765_v8 = vpack.c.bf16 %v632_v58, %v624_v57  ;;  %v855_v57 = vunpack.c.l.s8.bf16 %v687_v45  ;;  %v646_v58 = vld [vmem:[#allocation7 + $0x10] sm:$0xff] }
 0x179   :  { %1133 = vmatpush2.bf16.msra.mxu0 %v956_v1  ;;  %1170 = vmatpush1.bf16.msra.mxu1 %v968_v2  ;;  %v1008_v1 = vunpack.c.h.s8.bf16 %v760_v55  ;;  %v533_v2 = vrot.slane %v3680_v43, %v3761_v53  ;;  %v1001_v43 = vunpack.c.h.s8.bf16 %v757_v7 }
 0x17a   :  { %1134 = vmatprep.subr.bf16.mxu0 %v953_v4  ;;  %1171 = vmatprep.subr.bf16.mxu1 %v965_v6  ;;  %v1005_v4 = vunpack.c.l.s8.bf16 %v761_v47  ;;  %v658_v6 = vld [vmem:[#allocation7 + $0x70] sm:$0xff] }
 0x17b   :  { %v560_v15 = vmul.f32 %v533_v2, %v3746_v13  ;;  %v654_v13 = vld [vmem:[#allocation7 + $0x50] sm:$0xff] }
 0x17d   :  { %1135 = vmatpush2.bf16.msra.mxu0 %v952_v10  ;;  %1172 = vmatpush1.bf16.msra.mxu1 %v964_v11  ;;  %v1004_v10 = vunpack.c.l.s8.bf16 %v760_v55  ;;  %v802_v11 = vunpack.c.h.s8.bf16 %v658_v6 }
 0x17e   :  { %1136 = vmatprep.subr.bf16.mxu0 %v949_v12  ;;  %1173 = vmatprep.subr.bf16.mxu1 %v1025_v14  ;;  %v552_v12 = vmul.f32 %v533_v2, %v3735_v62  ;;  %v591_v14 = vrot.slane %v3689_v48, %v3761_v53  ;;  %v997_v48 = vunpack.c.l.s8.bf16 %v757_v7  ;;  %v774_v7 = vunpack.c.l.s8.bf16 %v646_v58 }
 0x180   :  { %v610_v23 = vadd.f32 %v591_v14, %v552_v12  ;;  %v618_v24 = vadd.f32 %v591_v14, %v560_v15  ;;  %v674_v14 = vld [vmem:[#allocation7 + $0xf0] sm:$0xff]  ;;  %v679_v15 = vld [vmem:[#allocation7 + $0x118] sm:$0xff] }
 0x181   :  { %1137 = vmatpush2.bf16.msra.mxu0 %v948_v19  ;;  %1174 = vmatpush2.bf16.msra.mxu1 %v1024_v38  ;;  %v799_v19 = vunpack.c.l.s8.bf16 %v659_v56  ;;  %v655_v38 = vld [vmem:[#allocation7 + $0x58] sm:$0xff] }
 0x182   :  { %1138 = vmatprep.subr.bf16.mxu0 %v945_v20  ;;  %1175 = vmatprep.subr.bf16.mxu1 %v1021_v22  ;;  %v1000_v20 = vunpack.c.h.s8.bf16 %v756_v16  ;;  %v798_v22 = vunpack.c.l.s8.bf16 %v658_v6  ;;  %v795_v62 = vunpack.c.h.s8.bf16 %v655_v38  ;;  %v791_v30 = vunpack.c.l.s8.bf16 %v655_v38  ;;  %v675_v6 = vld [vmem:[#allocation7 + $0xf8] sm:$0xff] }
 0x183   :  { %v843_v38 = vunpack.c.h.s8.bf16 %v679_v15 }
 0x185   :  { %1139 = vmatpush2.bf16.msra.mxu0 %v944_v25  ;;  %1176 = vmatpush2.bf16.msra.mxu1 %v1020_v26  ;;  %v996_v25 = vunpack.c.l.s8.bf16 %v756_v16  ;;  %v794_v26 = vunpack.c.h.s8.bf16 %v654_v13 }
 0x186   :  { %1140 = vmatprep.subr.bf16.mxu0 %v941_v27  ;;  %1177 = vmatprep.subr.bf16.mxu1 %v1017_v29  ;;  %v626_v27 = vmax.f32 %v610_v23, 0.0  ;;  %v634_v29 = vmax.f32 %v618_v24, 0.0  ;;  %v830_v23 = vunpack.c.l.s8.bf16 %v674_v14 }
 0x189   :  { %1141 = vmatpush2.bf16.msra.mxu0 %v940_v35  ;;  %1178 = vmatpush2.bf16.msra.mxu1 %v1016_v36  ;;  %v3773_v35 = vpack.c.bf16 %v634_v29, %v626_v27  ;;  %v787_v36 = vunpack.c.h.s8.bf16 %v651_v33 }
 0x18a   :  { %1142 = vmatprep.subr.bf16.mxu0 %v937_v39  ;;  %1179 = vmatprep.subr.bf16.mxu1 %v1013_v40  ;;  %v650_v39 = vld [vmem:[#allocation7 + $0x30] sm:$0xff]  ;;  %v863_v40 = vunpack.c.l.s8.bf16 %v691_v0  ;;  %v707_v0 = vld [vmem:[#allocation7 + $0x1f8] sm:$0xff] }
 0x18b   :  { %v786_v47 = vunpack.c.h.s8.bf16 %v650_v39  ;;  %v899_v29 = vunpack.c.h.s8.bf16 %v707_v0 }
 0x18d   :  { %1143 = vmatpush2.bf16.msra.mxu0 %v936_v60  ;;  %1180 = vmatpush2.bf16.msra.mxu1 %v1012_v52  ;;  %v859_v60 = vunpack.c.h.s8.bf16 %v687_v45  ;;  %v686_v52 = vld [vmem:[#allocation7 + $0x150] sm:$0xff] }
 0x18e   :  { %1144 = vmatprep.subr.bf16.mxu0 %v933_v9  ;;  %1181 = vmatprep.subr.bf16.mxu1 %v1009_v54  ;;  %v647_v9 = vld [vmem:[#allocation7 + $0x18] sm:$0xff]  ;;  %v782_v54 = vunpack.c.l.s8.bf16 %v650_v39  ;;  %v858_v55 = vunpack.c.h.s8.bf16 %v686_v52 }
 0x18f   :  { %v779_v56 = vunpack.c.h.s8.bf16 %v647_v9  ;;  %v775_v2 = vunpack.c.l.s8.bf16 %v647_v9  ;;  %v703_v39 = vld [vmem:[#allocation7 + $0x1d8] sm:$0xff] }
 0x191   :  { %1145 = vmatpush2.bf16.msra.mxu0 %v932_v61  ;;  %1182 = vmatpush2.bf16.msra.mxu1 %v1008_v1  ;;  %v683_v61 = vld [vmem:[#allocation7 + $0x138] sm:$0xff]  ;;  %v778_v1 = vunpack.c.h.s8.bf16 %v646_v58 }
 0x192   :  { %1183 = vmatprep.subr.bf16.mxu1 %v1005_v4  ;;  %1200 = vmatprep.subr.bf16.mxu0 %v803_v41  ;;  %v851_v4 = vunpack.c.h.s8.bf16 %v683_v61  ;;  %v682_v41 = vld [vmem:[#allocation7 + $0x130] sm:$0xff]  ;;  %v847_v12 = vunpack.c.l.s8.bf16 %v683_v61 }
 0x193   :  { %v846_v16 = vunpack.c.l.s8.bf16 %v682_v41 }
 0x194   :  { %1147 = vmatmul.mubr.bf16.vlgmr.msra.gmra.mxu0 %v3765_v8 }
 0x195   :  { %1184 = vmatpush2.bf16.msra.mxu1 %v1004_v10  ;;  %1201 = vmatpush1.bf16.msra.mxu0 %v802_v11  ;;  %v850_v10 = vunpack.c.h.s8.bf16 %v682_v41  ;;  %v835_v11 = vunpack.c.h.s8.bf16 %v675_v6 }
 0x196   :  { %1232 = vmatprep.mubr.bf16.mxu0 %v3716_v18  ;;  %1185 = vmatprep.subr.bf16.mxu1 %v1001_v43  ;;  %v790_v18 = vunpack.c.l.s8.bf16 %v654_v13  ;;  %v834_v43 = vunpack.c.h.s8.bf16 %v674_v14  ;;  %v670_v13 = vld [vmem:[#allocation7 + $0xd0] sm:$0xff] }
 0x197   :  { %1202 = vmatprep.subr.bf16.mxu0 %v799_v19  ;;  %v831_v19 = vunpack.c.l.s8.bf16 %v675_v6  ;;  %v822_v32 = vunpack.c.l.s8.bf16 %v670_v13 }
 0x199   :  { %1186 = vmatpush2.bf16.msra.mxu1 %v1000_v20  ;;  %1203 = vmatpush1.bf16.msra.mxu0 %v798_v22  ;;  %v678_v20 = vld [vmem:[#allocation7 + $0x110] sm:$0xff]  ;;  %v671_v22 = vld [vmem:[#allocation7 + $0xd8] sm:$0xff] }
 0x19a   :  { %1187 = vmatprep.subr.bf16.mxu1 %v997_v48  ;;  %1204 = vmatprep.subr.bf16.mxu0 %v795_v62  ;;  %v842_v24 = vunpack.c.h.s8.bf16 %v678_v20  ;;  %v827_v48 = vunpack.c.h.s8.bf16 %v671_v22  ;;  %v839_v62 = vunpack.c.l.s8.bf16 %v679_v15  ;;  %v823_v27 = vunpack.c.l.s8.bf16 %v671_v22 }
 0x19d   :  { %1188 = vmatpush2.bf16.msra.mxu1 %v996_v25  ;;  %1205 = vmatpush1.bf16.msra.mxu0 %v794_v26  ;;  %v826_v25 = vunpack.c.h.s8.bf16 %v670_v13  ;;  %v838_v26 = vunpack.c.l.s8.bf16 %v678_v20 }
 0x19e   :  { %1206 = vmatprep.subr.bf16.mxu0 %v791_v30  ;;  %1243 = vmatprep.subr.bf16.mxu1 %v867_v31  ;;  %v706_v30 = vld [vmem:[#allocation7 + $0x1f0] sm:$0xff]  ;;  %v667_v31 = vld [vmem:[#allocation7 + $0xb8] sm:$0xff] }
 0x19f   :  { %v898_v33 = vunpack.c.h.s8.bf16 %v706_v30  ;;  %v894_v45 = vunpack.c.l.s8.bf16 %v706_v30 }
 0x1a0   :  { %1190 = vmatmul.mubr.bf16.vlgmr.msra.gmra.mxu1 %v3773_v35 }
 0x1a1   :  { %1207 = vmatpush1.bf16.msra.mxu0 %v790_v18  ;;  %1244 = vmatpush1.bf16.msra.mxu1 %v866_v28  ;;  %v819_v18 = vunpack.c.h.s8.bf16 %v667_v31  ;;  %v895_v28 = vunpack.c.l.s8.bf16 %v707_v0 }
 0x1a2   :  { %1275 = vmatprep.mubr.bf16.mxu1 %v3737_v63  ;;  %1208 = vmatprep.subr.bf16.mxu0 %v787_v36  ;;  %v854_v63 = vunpack.c.l.s8.bf16 %v686_v52  ;;  %v666_v36 = vld [vmem:[#allocation7 + $0xb0] sm:$0xff] }
 0x1a3   :  { %1245 = vmatprep.subr.bf16.mxu1 %v863_v40  ;;  %v818_v40 = vunpack.c.h.s8.bf16 %v666_v36  ;;  %v814_v52 = vunpack.c.l.s8.bf16 %v666_v36 }
 0x1a5   :  { %1209 = vmatpush1.bf16.msra.mxu0 %v786_v47  ;;  %1246 = vmatpush1.bf16.msra.mxu1 %v862_v50  ;;  %v815_v47 = vunpack.c.l.s8.bf16 %v667_v31  ;;  %v891_v50 = vunpack.c.h.s8.bf16 %v703_v39  ;;  %v714_v31 = vld [vmem:[#allocation7 + $0x230] sm:$0xff] }
 0x1a6   :  { %1210 = vmatprep.subr.bf16.mxu0 %v783_v51  ;;  %1247 = vmatprep.subr.bf16.mxu1 %v859_v60  ;;  %v702_v51 = vld [vmem:[#allocation7 + $0x1d0] sm:$0xff]  ;;  %v663_v60 = vld [vmem:[#allocation7 + $0x98] sm:$0xff] }
 0x1a7   :  { %v890_v9 = vunpack.c.h.s8.bf16 %v702_v51  ;;  %v886_v61 = vunpack.c.l.s8.bf16 %v702_v51 }
 0x1a9   :  { %1211 = vmatpush1.bf16.msra.mxu0 %v782_v54  ;;  %1248 = vmatpush1.bf16.msra.mxu1 %v858_v55  ;;  %v811_v54 = vunpack.c.h.s8.bf16 %v663_v60  ;;  %v887_v55 = vunpack.c.l.s8.bf16 %v703_v39 }
 0x1aa   :  { %1212 = vmatprep.subr.bf16.mxu0 %v779_v56  ;;  %1249 = vmatprep.subr.bf16.mxu1 %v855_v57  ;;  %v662_v56 = vld [vmem:[#allocation7 + $0x90] sm:$0xff]  ;;  %v699_v57 = vld [vmem:[#allocation7 + $0x1b8] sm:$0xff] }
 0x1ab   :  { %v810_v58 = vunpack.c.h.s8.bf16 %v662_v56  ;;  %v806_v41 = vunpack.c.l.s8.bf16 %v662_v56  ;;  %v746_v56 = vld [vmem:[#allocation7 + $0x330] sm:$0xff] }
 0x1ad   :  { %1213 = vmatpush1.bf16.msra.mxu0 %v778_v1  ;;  %1250 = vmatpush1.bf16.msra.mxu1 %v854_v63  ;;  %v807_v1 = vunpack.c.l.s8.bf16 %v663_v60  ;;  %v883_v63 = vunpack.c.h.s8.bf16 %v699_v57  ;;  %v710_v60 = vld [vmem:[#allocation7 + $0x210] sm:$0xff] }
 0x1ae   :  { %1214 = vmatprep.subr.bf16.mxu0 %v775_v2  ;;  %1251 = vmatprep.subr.bf16.mxu1 %v851_v4  ;;  %v698_v2 = vld [vmem:[#allocation7 + $0x1b0] sm:$0xff]  ;;  %v723_v4 = vld [vmem:[#allocation7 + $0x278] sm:$0xff] }
 0x1af   :  { %v882_v6 = vunpack.c.h.s8.bf16 %v698_v2  ;;  %v878_v14 = vunpack.c.l.s8.bf16 %v698_v2  ;;  %v738_v2 = vld [vmem:[#allocation7 + $0x2f0] sm:$0xff] }
 0x1b1   :  { %1215 = vmatpush1.bf16.msra.mxu0 %v774_v7  ;;  %1252 = vmatpush1.bf16.msra.mxu1 %v850_v10  ;;  %v879_v7 = vunpack.c.l.s8.bf16 %v699_v57  ;;  %v931_v10 = vunpack.c.h.s8.bf16 %v723_v4  ;;  %v739_v57 = vld [vmem:[#allocation7 + $0x2f8] sm:$0xff] }
 0x1b2   :  { %1216 = vmatprep.subr.bf16.mxu0 %v835_v11  ;;  %1253 = vmatprep.subr.bf16.mxu1 %v847_v12  ;;  %v722_v11 = vld [vmem:[#allocation7 + $0x270] sm:$0xff]  ;;  %v695_v12 = vld [vmem:[#allocation7 + $0x198] sm:$0xff] }
 0x1b3   :  { %v930_v15 = vunpack.c.h.s8.bf16 %v722_v11  ;;  %v926_v22 = vunpack.c.l.s8.bf16 %v722_v11  ;;  %v742_v11 = vld [vmem:[#allocation7 + $0x310] sm:$0xff] }
 0x1b5   :  { %1217 = vmatpush2.bf16.msra.mxu0 %v834_v43  ;;  %1254 = vmatpush1.bf16.msra.mxu1 %v846_v16  ;;  %v875_v43 = vunpack.c.h.s8.bf16 %v695_v12  ;;  %v694_v16 = vld [vmem:[#allocation7 + $0x190] sm:$0xff] }
 0x1b6   :  { %1218 = vmatprep.subr.bf16.mxu0 %v831_v19  ;;  %1255 = vmatprep.subr.bf16.mxu1 %v843_v38  ;;  %v927_v19 = vunpack.c.l.s8.bf16 %v723_v4  ;;  %v719_v38 = vld [vmem:[#allocation7 + $0x258] sm:$0xff]  ;;  %v874_v20 = vunpack.c.h.s8.bf16 %v694_v16  ;;  %v870_v13 = vunpack.c.l.s8.bf16 %v694_v16 }
 0x1b7   :  { %v743_v4 = vld [vmem:[#allocation7 + $0x318] sm:$0xff] }
 0x1b8   :  { %v967_v16 = vunpack.c.l.s8.bf16 %v743_v4 }
 0x1b9   :  { %1219 = vmatpush2.bf16.msra.mxu0 %v830_v23  ;;  %1256 = vmatpush1.bf16.msra.mxu1 %v842_v24  ;;  %v871_v23 = vunpack.c.l.s8.bf16 %v695_v12  ;;  %v923_v24 = vunpack.c.h.s8.bf16 %v719_v38  ;;  %v735_v12 = vld [vmem:[#allocation7 + $0x2d8] sm:$0xff] }
 0x1ba   :  { %1220 = vmatprep.subr.bf16.mxu0 %v827_v48  ;;  %1257 = vmatprep.subr.bf16.mxu1 %v839_v62  ;;  %v718_v48 = vld [vmem:[#allocation7 + $0x250] sm:$0xff]  ;;  %v755_v62 = vld [vmem:[#allocation7 + $0x378] sm:$0xff] }
 0x1bb   :  { %v922_v0 = vunpack.c.h.s8.bf16 %v718_v48 }
 0x1bd   :  { %1221 = vmatpush2.bf16.msra.mxu0 %v826_v25  ;;  %1258 = vmatpush1.bf16.msra.mxu1 %v838_v26  ;;  %v919_v25 = vunpack.c.l.s8.bf16 %v719_v38  ;;  %v754_v26 = vld [vmem:[#allocation7 + $0x370] sm:$0xff]  ;;  %v771_v38 = vld [vmem:[#allocation7 + $0x3f8] sm:$0xff] }
 0x1be   :  { %1222 = vmatprep.subr.bf16.mxu0 %v823_v27  ;;  %1259 = vmatprep.subr.bf16.mxu1 %v899_v29  ;;  %v715_v27 = vld [vmem:[#allocation7 + $0x238] sm:$0xff]  ;;  %v918_v29 = vunpack.c.l.s8.bf16 %v718_v48  ;;  %v770_v48 = vld [vmem:[#allocation7 + $0x3f0] sm:$0xff] }
 0x1bf   :  { %v915_v30 = vunpack.c.h.s8.bf16 %v715_v27  ;;  %v911_v36 = vunpack.c.l.s8.bf16 %v715_v27  ;;  %v767_v27 = vld [vmem:[#allocation7 + $0x3d8] sm:$0xff] }
 0x1c1   :  { %1223 = vmatpush2.bf16.msra.mxu0 %v822_v32  ;;  %1260 = vmatpush2.bf16.msra.mxu1 %v898_v33  ;;  %v991_v32 = vunpack.c.l.s8.bf16 %v755_v62  ;;  %v751_v33 = vld [vmem:[#allocation7 + $0x358] sm:$0xff] }
 0x1c2   :  { %1224 = vmatprep.subr.bf16.mxu0 %v819_v18  ;;  %1261 = vmatprep.subr.bf16.mxu1 %v895_v28  ;;  %v914_v18 = vunpack.c.h.s8.bf16 %v714_v31  ;;  %v990_v28 = vunpack.c.l.s8.bf16 %v754_v26  ;;  %v987_v39 = vunpack.c.h.s8.bf16 %v751_v33 }
 0x1c5   :  { %1225 = vmatpush2.bf16.msra.mxu0 %v818_v40  ;;  %1262 = vmatpush2.bf16.msra.mxu1 %v894_v45  ;;  %v750_v40 = vld [vmem:[#allocation7 + $0x350] sm:$0xff]  ;;  %v711_v45 = vld [vmem:[#allocation7 + $0x218] sm:$0xff] }
 0x1c6   :  { %1226 = vmatprep.subr.bf16.mxu0 %v815_v47  ;;  %1263 = vmatprep.subr.bf16.mxu1 %v891_v50  ;;  %v910_v47 = vunpack.c.l.s8.bf16 %v714_v31  ;;  %v986_v50 = vunpack.c.h.s8.bf16 %v750_v40  ;;  %v907_v51 = vunpack.c.h.s8.bf16 %v711_v45  ;;  %v1019_v31 = vunpack.c.h.s8.bf16 %v767_v27 }
 0x1c9   :  { %1227 = vmatpush2.bf16.msra.mxu0 %v814_v52  ;;  %1264 = vmatpush2.bf16.msra.mxu1 %v890_v9  ;;  %v747_v52 = vld [vmem:[#allocation7 + $0x338] sm:$0xff]  ;;  %v906_v9 = vunpack.c.h.s8.bf16 %v710_v60 }
 0x1ca   :  { %1228 = vmatprep.subr.bf16.mxu0 %v811_v54  ;;  %1265 = vmatprep.subr.bf16.mxu1 %v887_v55  ;;  %v903_v54 = vunpack.c.l.s8.bf16 %v711_v45  ;;  %v979_v55 = vunpack.c.h.s8.bf16 %v747_v52  ;;  %v763_v45 = vld [vmem:[#allocation7 + $0x3b8] sm:$0xff] }
 0x1cd   :  { %1229 = vmatpush2.bf16.msra.mxu0 %v810_v58  ;;  %1266 = vmatpush2.bf16.msra.mxu1 %v886_v61  ;;  %v902_v58 = vunpack.c.l.s8.bf16 %v710_v60  ;;  %v978_v61 = vunpack.c.h.s8.bf16 %v746_v56  ;;  %v762_v60 = vld [vmem:[#allocation7 + $0x3b0] sm:$0xff] }
 0x1ce   :  { %1230 = vmatprep.subr.bf16.mxu0 %v807_v1  ;;  %1267 = vmatprep.subr.bf16.mxu1 %v883_v63  ;;  %v963_v1 = vunpack.c.h.s8.bf16 %v739_v57  ;;  %v975_v63 = vunpack.c.l.s8.bf16 %v747_v52  ;;  %v1469_v52 = vld [vmem:[#allocation8 + $0xc8] sm:$0xff] }
 0x1d1   :  { %1231 = vmatpush2.bf16.msra.mxu0 %v806_v41  ;;  %1268 = vmatpush2.bf16.msra.mxu1 %v882_v6  ;;  %v962_v41 = vunpack.c.h.s8.bf16 %v738_v2  ;;  %v974_v6 = vunpack.c.l.s8.bf16 %v746_v56  ;;  %v1468_v56 = vld [vmem:[#allocation8 + $0xc0] sm:$0xff] }
 0x1d2   :  { %1269 = vmatprep.subr.bf16.mxu1 %v879_v7  ;;  %1286 = vmatprep.subr.bf16.mxu0 %v931_v10  ;;  %v959_v7 = vunpack.c.l.s8.bf16 %v739_v57  ;;  %v971_v10 = vunpack.c.h.s8.bf16 %v743_v4  ;;  %v759_v57 = vld [vmem:[#allocation7 + $0x398] sm:$0xff]  ;;  %v1461_v4 = vld [vmem:[#allocation8 + $0x88] sm:$0xff] }
 0x1d4   :  { %1233 = vmatmul.mubr.bf16.vlgmr.msra.gmra.mxu0 %v3718_v21  ;;  %v995_v21 = vunpack.c.h.s8.bf16 %v755_v62  ;;  %v731_v62 = vld [vmem:[#allocation7 + $0x2b8] sm:$0xff] }
 0x1d5   :  { %1270 = vmatpush2.bf16.msra.mxu1 %v878_v14  ;;  %1287 = vmatpush1.bf16.msra.mxu0 %v930_v15  ;;  %v958_v14 = vunpack.c.l.s8.bf16 %v738_v2  ;;  %v970_v15 = vunpack.c.h.s8.bf16 %v742_v11  ;;  %v1621_v2 = vunpack.c.l.s8.bf16 %v1469_v52 }
 0x1d6   :  { %1318 = vmatprep.mubr.bf16.mxu0 %v3730_v46  ;;  %1271 = vmatprep.subr.bf16.mxu1 %v875_v43  ;;  %v994_v46 = vunpack.c.h.s8.bf16 %v754_v26  ;;  %v955_v43 = vunpack.c.h.s8.bf16 %v735_v12  ;;  %v730_v26 = vld [vmem:[#allocation7 + $0x2b0] sm:$0xff] }
 0x1d7   :  { %1288 = vmatprep.subr.bf16.mxu0 %v927_v19  ;;  %v734_v19 = vld [vmem:[#allocation7 + $0x2d0] sm:$0xff] }
 0x1d9   :  { %1272 = vmatpush2.bf16.msra.mxu1 %v874_v20  ;;  %1289 = vmatpush1.bf16.msra.mxu0 %v926_v22  ;;  %v954_v20 = vunpack.c.h.s8.bf16 %v734_v19  ;;  %v966_v22 = vunpack.c.l.s8.bf16 %v742_v11  ;;  %v1460_v11 = vld [vmem:[#allocation8 + $0x80] sm:$0xff] }
 0x1da   :  { %1273 = vmatprep.subr.bf16.mxu1 %v871_v23  ;;  %1290 = vmatprep.subr.bf16.mxu0 %v923_v24  ;;  %v951_v23 = vunpack.c.l.s8.bf16 %v735_v12  ;;  %v1027_v24 = vunpack.c.h.s8.bf16 %v771_v38 }
 0x1dd   :  { %1274 = vmatpush2.bf16.msra.mxu1 %v870_v13  ;;  %1291 = vmatpush1.bf16.msra.mxu0 %v922_v0  ;;  %v950_v13 = vunpack.c.l.s8.bf16 %v734_v19  ;;  %v1026_v0 = vunpack.c.h.s8.bf16 %v770_v48  ;;  %v1452_v19 = vld [vmem:[#allocation8 + $0x40] sm:$0xff] }
 0x1de   :  { %1292 = vmatprep.subr.bf16.mxu0 %v919_v25  ;;  %1329 = vmatprep.subr.bf16.mxu1 %v995_v21  ;;  %v947_v25 = vunpack.c.h.s8.bf16 %v731_v62  ;;  %v1023_v21 = vunpack.c.l.s8.bf16 %v771_v38  ;;  %v1596_v38 = vunpack.c.h.s8.bf16 %v1452_v19 }
 0x1e0   :  { %1276 = vmatmul.mubr.bf16.vlgmr.msra.gmra.mxu1 %v3741_v5  ;;  %v983_v5 = vunpack.c.l.s8.bf16 %v751_v33  ;;  %v727_v33 = vld [vmem:[#allocation7 + $0x298] sm:$0xff] }
 0x1e1   :  { %1293 = vmatpush1.bf16.msra.mxu0 %v918_v29  ;;  %1330 = vmatpush1.bf16.msra.mxu1 %v994_v46  ;;  %v946_v29 = vunpack.c.h.s8.bf16 %v730_v26  ;;  %v1022_v46 = vunpack.c.l.s8.bf16 %v770_v48  ;;  %v1444_v48 = vld [vmem:[#allocation8] sm:$0xff] }
 0x1e2   :  { %1361 = vmatprep.mubr.bf16.mxu1 %v3748_v34  ;;  %1294 = vmatprep.subr.bf16.mxu0 %v915_v30  ;;  %v982_v34 = vunpack.c.l.s8.bf16 %v750_v40  ;;  %v943_v30 = vunpack.c.l.s8.bf16 %v731_v62  ;;  %v726_v40 = vld [vmem:[#allocation7 + $0x290] sm:$0xff]  ;;  %v1580_v62 = vunpack.c.h.s8.bf16 %v1444_v48 }
 0x1e3   :  { %1331 = vmatprep.subr.bf16.mxu1 %v991_v32  ;;  %v766_v32 = vld [vmem:[#allocation7 + $0x3d0] sm:$0xff] }
 0x1e5   :  { %1295 = vmatpush1.bf16.msra.mxu0 %v914_v18  ;;  %1332 = vmatpush1.bf16.msra.mxu1 %v990_v28  ;;  %v942_v18 = vunpack.c.l.s8.bf16 %v730_v26  ;;  %v1018_v28 = vunpack.c.h.s8.bf16 %v766_v32  ;;  %v1533_v26 = vld [vmem:[#allocation8 + $0x2c8] sm:$0xff] }
 0x1e6   :  { %1296 = vmatprep.subr.bf16.mxu0 %v911_v36  ;;  %1333 = vmatprep.subr.bf16.mxu1 %v987_v39  ;;  %v939_v36 = vunpack.c.h.s8.bf16 %v727_v33  ;;  %v1015_v39 = vunpack.c.l.s8.bf16 %v767_v27  ;;  %v1757_v27 = vunpack.c.h.s8.bf16 %v1533_v26 }
 0x1e9   :  { %1297 = vmatpush1.bf16.msra.mxu0 %v910_v47  ;;  %1334 = vmatpush1.bf16.msra.mxu1 %v986_v50  ;;  %v938_v47 = vunpack.c.h.s8.bf16 %v726_v40  ;;  %v1014_v50 = vunpack.c.l.s8.bf16 %v766_v32  ;;  %v1493_v32 = vld [vmem:[#allocation8 + $0x188] sm:$0xff] }
 0x1ea   :  { %1298 = vmatprep.subr.bf16.mxu0 %v907_v51  ;;  %1335 = vmatprep.subr.bf16.mxu1 %v983_v5  ;;  %v935_v51 = vunpack.c.l.s8.bf16 %v727_v33  ;;  %v1011_v5 = vunpack.c.h.s8.bf16 %v763_v45  ;;  %v1749_v33 = vunpack.c.l.s8.bf16 %v1533_v26 }
 0x1ed   :  { %1299 = vmatpush1.bf16.msra.mxu0 %v906_v9  ;;  %1336 = vmatpush1.bf16.msra.mxu1 %v982_v34  ;;  %v934_v9 = vunpack.c.l.s8.bf16 %v726_v40  ;;  %v1010_v34 = vunpack.c.h.s8.bf16 %v762_v60  ;;  %v1525_v40 = vld [vmem:[#allocation8 + $0x288] sm:$0xff] }
 0x1ee   :  { %1300 = vmatprep.subr.bf16.mxu0 %v903_v54  ;;  %1337 = vmatprep.subr.bf16.mxu1 %v979_v55  ;;  %v1007_v54 = vunpack.c.l.s8.bf16 %v763_v45  ;;  %v1629_v55 = vunpack.c.h.s8.bf16 %v1469_v52  ;;  %v1741_v45 = vunpack.c.h.s8.bf16 %v1525_v40  ;;  %v1733_v52 = vunpack.c.l.s8.bf16 %v1525_v40 }
 0x1f1   :  { %1301 = vmatpush1.bf16.msra.mxu0 %v902_v58  ;;  %1338 = vmatpush1.bf16.msra.mxu1 %v978_v61  ;;  %v1006_v58 = vunpack.c.l.s8.bf16 %v762_v60  ;;  %v1628_v61 = vunpack.c.h.s8.bf16 %v1468_v56  ;;  %v1485_v60 = vld [vmem:[#allocation8 + $0x148] sm:$0xff] }
 0x1f2   :  { %1302 = vmatprep.subr.bf16.mxu0 %v963_v1  ;;  %1339 = vmatprep.subr.bf16.mxu1 %v975_v63  ;;  %v1003_v1 = vunpack.c.h.s8.bf16 %v759_v57  ;;  %v758_v63 = vld [vmem:[#allocation7 + $0x390] sm:$0xff] }
 0x1f3   :  { %v998_v12 = vunpack.c.l.s8.bf16 %v758_v63 }
 0x1f5   :  { %1303 = vmatpush2.bf16.msra.mxu0 %v962_v41  ;;  %1340 = vmatpush1.bf16.msra.mxu1 %v974_v6  ;;  %v1002_v41 = vunpack.c.h.s8.bf16 %v758_v63  ;;  %v1620_v6 = vunpack.c.l.s8.bf16 %v1468_v56  ;;  %v1517_v56 = vld [vmem:[#allocation8 + $0x248] sm:$0xff]  ;;  %v1653_v63 = vunpack.c.l.s8.bf16 %v1485_v60 }
 0x1f6   :  { %1304 = vmatprep.subr.bf16.mxu0 %v959_v7  ;;  %1341 = vmatprep.subr.bf16.mxu1 %v971_v10  ;;  %v999_v7 = vunpack.c.l.s8.bf16 %v759_v57  ;;  %v1613_v10 = vunpack.c.h.s8.bf16 %v1461_v4  ;;  %v1725_v57 = vunpack.c.h.s8.bf16 %v1517_v56 }
 0x1f9   :  { %1305 = vmatpush2.bf16.msra.mxu0 %v958_v14  ;;  %1342 = vmatpush1.bf16.msra.mxu1 %v970_v15  ;;  %v1612_v14 = vunpack.c.h.s8.bf16 %v1460_v11  ;;  %v1605_v15 = vunpack.c.l.s8.bf16 %v1461_v4  ;;  %v1717_v4 = vunpack.c.l.s8.bf16 %v1517_v56 }
 0x1fa   :  { %1306 = vmatprep.subr.bf16.mxu0 %v955_v43  ;;  %1343 = vmatprep.subr.bf16.mxu1 %v967_v16  ;;  %v1453_v43 = vld [vmem:[#allocation8 + $0x48] sm:$0xff] }
 0x1fb   :  { %v1597_v16 = vunpack.c.h.s8.bf16 %v1453_v43 }
 0x1fd   :  { %1307 = vmatpush2.bf16.msra.mxu0 %v954_v20  ;;  %1344 = vmatpush1.bf16.msra.mxu1 %v966_v22  ;;  %v1589_v20 = vunpack.c.l.s8.bf16 %v1453_v43  ;;  %v1445_v22 = vld [vmem:[#allocation8 + $0x8] sm:$0xff] }
 0x1fe   :  { %1308 = vmatprep.subr.bf16.mxu0 %v951_v23  ;;  %1345 = vmatprep.subr.bf16.mxu1 %v1027_v24  ;;  %v1588_v23 = vunpack.c.l.s8.bf16 %v1452_v19  ;;  %v1581_v24 = vunpack.c.h.s8.bf16 %v1445_v22  ;;  %v3783_v19 = vld [vmem:[#allocation8 + $0xd8] sm:$0xff] }
 0x201   :  { %1309 = vmatpush2.bf16.msra.mxu0 %v950_v13  ;;  %1346 = vmatpush2.bf16.msra.mxu1 %v1026_v0  ;;  %v1573_v13 = vunpack.c.l.s8.bf16 %v1445_v22  ;;  %v1501_v0 = vld [vmem:[#allocation8 + $0x1c8] sm:$0xff] }
 0x202   :  { %1310 = vmatprep.subr.bf16.mxu0 %v947_v25  ;;  %1347 = vmatprep.subr.bf16.mxu1 %v1023_v21  ;;  %v1572_v25 = vunpack.c.l.s8.bf16 %v1444_v48  ;;  %v1693_v21 = vunpack.c.h.s8.bf16 %v1501_v0  ;;  %v1565_v48 = vld [vmem:[#allocation8 + $0x3c8] sm:$0xff] }
 0x203   :  { %v1813_v26 = vunpack.c.l.s8.bf16 %v1565_v48 }
 0x205   :  { %1311 = vmatpush2.bf16.msra.mxu0 %v946_v29  ;;  %1348 = vmatpush2.bf16.msra.mxu1 %v1022_v46  ;;  %v1532_v29 = vld [vmem:[#allocation8 + $0x2c0] sm:$0xff] }
 0x206   :  { %1312 = vmatprep.subr.bf16.mxu0 %v943_v30  ;;  %1349 = vmatprep.subr.bf16.mxu1 %v1019_v31  ;;  %v1756_v30 = vunpack.c.h.s8.bf16 %v1532_v29  ;;  %v1685_v31 = vunpack.c.l.s8.bf16 %v1501_v0  ;;  %v1564_v0 = vld [vmem:[#allocation8 + $0x3c0] sm:$0xff] }
 0x209   :  { %1313 = vmatpush2.bf16.msra.mxu0 %v942_v18  ;;  %1350 = vmatpush2.bf16.msra.mxu1 %v1018_v28  ;;  %v1748_v18 = vunpack.c.l.s8.bf16 %v1532_v29 }
 0x20a   :  { %1314 = vmatprep.subr.bf16.mxu0 %v939_v36  ;;  %1351 = vmatprep.subr.bf16.mxu1 %v1015_v39  ;;  %v1677_v36 = vunpack.c.h.s8.bf16 %v1493_v32  ;;  %v1492_v39 = vld [vmem:[#allocation8 + $0x180] sm:$0xff] }
 0x20d   :  { %1315 = vmatpush2.bf16.msra.mxu0 %v938_v47  ;;  %1352 = vmatpush2.bf16.msra.mxu1 %v1014_v50  ;;  %v1524_v47 = vld [vmem:[#allocation8 + $0x280] sm:$0xff]  ;;  %v1676_v50 = vunpack.c.h.s8.bf16 %v1492_v39 }
 0x20e   :  { %1316 = vmatprep.subr.bf16.mxu0 %v935_v51  ;;  %1353 = vmatprep.subr.bf16.mxu1 %v1011_v5  ;;  %v1740_v51 = vunpack.c.h.s8.bf16 %v1524_v47  ;;  %v1669_v5 = vunpack.c.l.s8.bf16 %v1493_v32  ;;  %v1556_v32 = vld [vmem:[#allocation8 + $0x380] sm:$0xff] }
 0x211   :  { %1317 = vmatpush2.bf16.msra.mxu0 %v934_v9  ;;  %1354 = vmatpush2.bf16.msra.mxu1 %v1010_v34  ;;  %v1732_v9 = vunpack.c.l.s8.bf16 %v1524_v47  ;;  %v1668_v34 = vunpack.c.l.s8.bf16 %v1492_v39  ;;  %v1796_v39 = vunpack.c.l.s8.bf16 %v1556_v32 }
 0x212   :  { %1355 = vmatprep.subr.bf16.mxu1 %v1007_v54  ;;  %1828 = vmatprep.subr.bf16.mxu0 %v1629_v55  ;;  %v1661_v54 = vunpack.c.h.s8.bf16 %v1485_v60  ;;  %v1484_v55 = vld [vmem:[#allocation8 + $0x140] sm:$0xff] }
 0x214   :  { %1319 = vmatmul.mubr.bf16.vlgmr.msra.gmra.mxu0 %v3765_v8  ;;  %v1604_v8 = vunpack.c.l.s8.bf16 %v1460_v11  ;;  %v1509_v11 = vld [vmem:[#allocation8 + $0x208] sm:$0xff] }
 0x215   :  { %1356 = vmatpush2.bf16.msra.mxu1 %v1006_v58  ;;  %1829 = vmatpush1.bf16.msra.mxu0 %v1628_v61  ;;  %v1516_v58 = vld [vmem:[#allocation8 + $0x240] sm:$0xff]  ;;  %v1660_v61 = vunpack.c.h.s8.bf16 %v1484_v55 }
 0x216   :  { %1357 = vmatprep.subr.bf16.mxu1 %v1003_v1  ;;  %1830 = vmatprep.subr.bf16.mxu0 %v1621_v2  ;;  %v1724_v1 = vunpack.c.h.s8.bf16 %v1516_v58  ;;  %v1477_v2 = vld [vmem:[#allocation8 + $0x108] sm:$0xff] }
 0x219   :  { %1358 = vmatpush2.bf16.msra.mxu1 %v1002_v41  ;;  %1831 = vmatpush1.bf16.msra.mxu0 %v1620_v6  ;;  %v1716_v41 = vunpack.c.l.s8.bf16 %v1516_v58  ;;  %v1652_v6 = vunpack.c.l.s8.bf16 %v1484_v55 }
 0x21a   :  { %1359 = vmatprep.subr.bf16.mxu1 %v999_v7  ;;  %1832 = vmatprep.subr.bf16.mxu0 %v1613_v10  ;;  %v1645_v7 = vunpack.c.h.s8.bf16 %v1477_v2  ;;  %v1476_v10 = vld [vmem:[#allocation8 + $0x100] sm:$0xff] }
 0x21b   :  { %v1644_v43 = vunpack.c.h.s8.bf16 %v1476_v10 }
 0x21d   :  { %1360 = vmatpush2.bf16.msra.mxu1 %v998_v12  ;;  %1833 = vmatpush1.bf16.msra.mxu0 %v1612_v14  ;;  %v1062_v12 = vpop.f32.mrf.mxu0  ;;  %v1709_v14 = vunpack.c.h.s8.bf16 %v1509_v11 }
 0x21e   :  { %1834 = vmatprep.subr.bf16.mxu0 %v1605_v15  ;;  %1871 = vmatprep.subr.bf16.mxu1 %v1757_v27  ;;  %v1508_v15 = vld [vmem:[#allocation8 + $0x200] sm:$0xff]  ;;  %v1812_v27 = vunpack.c.l.s8.bf16 %v1564_v0 }
 0x21f   :  { %v1700_v22 = vunpack.c.l.s8.bf16 %v1508_v15 }
 0x220   :  { %1362 = vmatmul.mubr.bf16.vlgmr.msra.gmra.mxu1 %v3773_v35  ;;  %v1500_v35 = vld [vmem:[#allocation8 + $0x1c0] sm:$0xff] }
 0x221   :  { %1835 = vmatpush1.bf16.msra.mxu0 %v1604_v8  ;;  %v1692_v46 = vunpack.c.h.s8.bf16 %v1500_v35  ;;  %1872 = vmatpush1.bf16.msra.mxu1 %v1756_v30  ;;  %v1684_v28 = vunpack.c.l.s8.bf16 %v1500_v35  ;;  %v1708_v8 = vunpack.c.h.s8.bf16 %v1508_v15  ;;  %v1557_v30 = vld [vmem:[#allocation8 + $0x388] sm:$0xff] }
 0x222   :  { %1836 = vmatprep.subr.bf16.mxu0 %v1597_v16  ;;  %1873 = vmatprep.subr.bf16.mxu1 %v1749_v33  ;;  %v1637_v16 = vunpack.c.l.s8.bf16 %v1477_v2  ;;  %v1804_v33 = vunpack.c.h.s8.bf16 %v1556_v32 }
 0x225   :  { %1837 = vmatpush1.bf16.msra.mxu0 %v1596_v38  ;;  %1874 = vmatpush1.bf16.msra.mxu1 %v1748_v18  ;;  %v1701_v38 = vunpack.c.l.s8.bf16 %v1509_v11 }
 0x226   :  { %1838 = vmatprep.subr.bf16.mxu0 %v1589_v20  ;;  %1875 = vmatprep.subr.bf16.mxu1 %v1741_v45  ;;  %v1064_v20 = vpop.f32.mrf.mxu0 }
 0x229   :  { %1839 = vmatpush1.bf16.msra.mxu0 %v1588_v23  ;;  %1876 = vmatpush1.bf16.msra.mxu1 %v1740_v51  ;;  %v1636_v23 = vunpack.c.l.s8.bf16 %v1476_v10  ;;  %v3786_v51 = vld [vmem:[#allocation16 + $0x8] sm:$0xf] }
 0x22a   :  { %1840 = vmatprep.subr.bf16.mxu0 %v1581_v24  ;;  %1877 = vmatprep.subr.bf16.mxu1 %v1733_v52  ;;  %v1631_v24 = vunpack.c.h.s8.bf16 %v3783_v19  ;;  %v1381_v56 = vrot.slane %v3786_v51, %v3678_v42 }
 0x22d   :  { %1841 = vmatpush1.bf16.msra.mxu0 %v1580_v62  ;;  %1878 = vmatpush1.bf16.msra.mxu1 %v1732_v9  ;;  %v1066_v62 = vpop.f32.mrf.mxu0 }
 0x22e   :  { %1842 = vmatprep.subr.bf16.mxu0 %v1573_v13  ;;  %1879 = vmatprep.subr.bf16.mxu1 %v1725_v57  ;;  %v1821_v13 = vunpack.c.h.s8.bf16 %v1565_v48  ;;  %v1540_v48 = vld [vmem:[#allocation8 + $0x300] sm:$0xff] }
 0x22f   :  { %v1068_v35 = vpop.f32.mrf.mxu0 }
 0x231   :  { %1843 = vmatpush1.bf16.msra.mxu0 %v1572_v25  ;;  %1880 = vmatpush1.bf16.msra.mxu1 %v1724_v1  ;;  %v1820_v25 = vunpack.c.h.s8.bf16 %v1564_v0  ;;  %v1377_v1 = vrot.slane %v3786_v51, %v3683_v44 }
 0x232   :  { %1844 = vmatprep.subr.bf16.mxu0 %v1693_v21  ;;  %1881 = vmatprep.subr.bf16.mxu1 %v1717_v4  ;;  %v1105_v21 = vpop.f32.mrf.mxu1 }
 0x233   :  { %v1106_v40 = vadd.f32 %v1105_v21, %v1062_v12 }
 0x234   :  { %v1107_v29 = vpop.f32.mrf.mxu1 }
 0x235   :  { %1845 = vmatpush2.bf16.msra.mxu0 %v1692_v46  ;;  %1882 = vmatpush1.bf16.msra.mxu1 %v1716_v41  ;;  %v3792_v41 = vld [vmem:[#allocation14 + $0x8] sm:$0xf] }
 0x236   :  { %1846 = vmatprep.subr.bf16.mxu0 %v1685_v31  ;;  %1883 = vmatprep.subr.bf16.mxu1 %v1709_v14  ;;  %v1805_v31 = vunpack.c.h.s8.bf16 %v1557_v30  ;;  %v1109_v18 = vpop.f32.mrf.mxu1 }
 0x238   :  { %v1111_v45 = vpop.f32.mrf.mxu1 }
 0x239   :  { %1847 = vmatpush2.bf16.msra.mxu0 %v1684_v28  ;;  %1884 = vmatpush1.bf16.msra.mxu1 %v1708_v8  ;;  %v1112_v2 = vadd.f32 %v1111_v45, %v1068_v35  ;;  %v1463_v45 = vld [vmem:[#allocation8 + $0x98] sm:$0xff] }
 0x23a   :  { %1848 = vmatprep.subr.bf16.mxu0 %v1677_v36  ;;  %1885 = vmatprep.subr.bf16.mxu1 %v1701_v38  ;;  %v1797_v36 = vunpack.c.l.s8.bf16 %v1557_v30 }
 0x23d   :  { %1849 = vmatpush2.bf16.msra.mxu0 %v1676_v50  ;;  %1886 = vmatpush1.bf16.msra.mxu1 %v1700_v22  ;;  %v1108_v50 = vadd.f32 %v1107_v29, %v1064_v20 }
 0x23e   :  { %1850 = vmatprep.subr.bf16.mxu0 %v1669_v5  ;;  %1887 = vmatprep.subr.bf16.mxu1 %v1821_v13  ;;  %v1549_v5 = vld [vmem:[#allocation8 + $0x348] sm:$0xff] }
 0x23f   :  { %v1789_v9 = vunpack.c.h.s8.bf16 %v1549_v5  ;;  %v1781_v11 = vunpack.c.l.s8.bf16 %v1549_v5  ;;  %v1462_v5 = vld [vmem:[#allocation8 + $0x90] sm:$0xff] }
 0x241   :  { %1851 = vmatpush2.bf16.msra.mxu0 %v1668_v34  ;;  %1888 = vmatpush2.bf16.msra.mxu1 %v1820_v25  ;;  %v1548_v34 = vld [vmem:[#allocation8 + $0x340] sm:$0xff]  ;;  %v1772_v25 = vunpack.c.h.s8.bf16 %v1540_v48 }
 0x242   :  { %1852 = vmatprep.subr.bf16.mxu0 %v1661_v54  ;;  %1889 = vmatprep.subr.bf16.mxu1 %v1813_v26  ;;  %v1110_v54 = vadd.f32 %v1109_v18, %v1066_v62  ;;  %v1788_v57 = vunpack.c.h.s8.bf16 %v1548_v34 }
 0x245   :  { %1853 = vmatpush2.bf16.msra.mxu0 %v1660_v61  ;;  %1890 = vmatpush2.bf16.msra.mxu1 %v1812_v27  ;;  %v1470_v27 = vld [vmem:[#allocation8 + $0xd0] sm:$0xff] }
 0x246   :  { %1854 = vmatprep.subr.bf16.mxu0 %v1653_v63  ;;  %1891 = vmatprep.subr.bf16.mxu1 %v1805_v31  ;;  %v1764_v31 = vunpack.c.l.s8.bf16 %v1540_v48  ;;  %v1630_v18 = vunpack.c.h.s8.bf16 %v1470_v27 }
 0x249   :  { %1855 = vmatpush2.bf16.msra.mxu0 %v1652_v6  ;;  %1892 = vmatpush2.bf16.msra.mxu1 %v1804_v33 }
 0x24a   :  { %1856 = vmatprep.subr.bf16.mxu0 %v1645_v7  ;;  %1893 = vmatprep.subr.bf16.mxu1 %v1797_v36  ;;  %v1411_v7 = vrot.slane %v3792_v41, %v3678_v42 }
 0x24d   :  { %1857 = vmatpush2.bf16.msra.mxu0 %v1644_v43  ;;  %1894 = vmatpush2.bf16.msra.mxu1 %v1796_v39  ;;  %v1780_v43 = vunpack.c.l.s8.bf16 %v1548_v34  ;;  %v1623_v39 = vunpack.c.l.s8.bf16 %v3783_v19  ;;  %v1455_v19 = vld [vmem:[#allocation8 + $0x58] sm:$0xff] }
 0x24e   :  { %1858 = vmatprep.subr.bf16.mxu0 %v1637_v16  ;;  %1895 = vmatprep.subr.bf16.mxu1 %v1789_v9  ;;  %v1407_v16 = vrot.slane %v3792_v41, %v3683_v44  ;;  %v1606_v9 = vunpack.c.l.s8.bf16 %v1462_v5  ;;  %v1599_v34 = vunpack.c.h.s8.bf16 %v1455_v19 }
 0x251   :  { %1859 = vmatpush2.bf16.msra.mxu0 %v1636_v23  ;;  %1896 = vmatpush2.bf16.msra.mxu1 %v1788_v57  ;;  %v1541_v23 = vld [vmem:[#allocation8 + $0x308] sm:$0xff]  ;;  %v1447_v57 = vld [vmem:[#allocation8 + $0x18] sm:$0xff] }
 0x252   :  { %1914 = vmatprep.subr.bf16.mxu0 %v1631_v24  ;;  %1897 = vmatprep.subr.bf16.mxu1 %v1781_v11  ;;  %v1773_v24 = vunpack.c.h.s8.bf16 %v1541_v23  ;;  %v1765_v29 = vunpack.c.l.s8.bf16 %v1541_v23 }
 0x254   :  { %v1148_v46 = vpop.f32.mrf.mxu0 }
 0x255   :  { %v1149_v60 = vadd.f32 %v1148_v46, %v1106_v40  ;;  %1898 = vmatpush2.bf16.msra.mxu1 %v1780_v43 }
 0x256   :  { %v1150_v28 = vpop.f32.mrf.mxu0  ;;  %1899 = vmatprep.subr.bf16.mxu1 %v1773_v24  ;;  %v1486_v24 = vld [vmem:[#allocation8 + $0x150] sm:$0xff] }
 0x257   :  { %v1151_v55 = vadd.f32 %v1150_v28, %v1108_v50  ;;  %v3800_v28 = vld [vmem:[#allocation8 + $0x2d8] sm:$0xff]  ;;  %v1615_v50 = vunpack.c.h.s8.bf16 %v1463_v45  ;;  %v1662_v48 = vunpack.c.h.s8.bf16 %v1486_v24 }
 0x258   :  { %v1152_v47 = vpop.f32.mrf.mxu0  ;;  %v1759_v40 = vunpack.c.h.s8.bf16 %v3800_v28 }
 0x259   :  { %v1153_v4 = vadd.f32 %v1152_v47, %v1110_v54  ;;  %1900 = vmatpush2.bf16.msra.mxu1 %v1772_v25  ;;  %v1622_v47 = vunpack.c.l.s8.bf16 %v1470_v27  ;;  %v1454_v54 = vld [vmem:[#allocation8 + $0x50] sm:$0xff]  ;;  %v1473_v27 = vld [vmem:[#allocation8 + $0xe8] sm:$0xff] }
 0x25a   :  { %v1154_v58 = vpop.f32.mrf.mxu0  ;;  %1901 = vmatprep.subr.bf16.mxu1 %v1765_v29 }
 0x25b   :  { %v1155_v12 = vadd.f32 %v1154_v58, %v1112_v2  ;;  %v1590_v58 = vunpack.c.l.s8.bf16 %v1454_v54  ;;  %v1575_v2 = vunpack.c.l.s8.bf16 %v1447_v57 }
 0x25d   :  { %1902 = vmatpush2.bf16.msra.mxu1 %v1764_v31 }
 0x25e   :  { %1957 = vmatprep.subr.bf16.mxu1 %v1759_v40 }
 0x260   :  { %v1191_v52 = vpop.f32.mrf.mxu1 }
 0x261   :  { %v1192_v61 = vadd.f32 %v1191_v52, %v1149_v60  ;;  %v1614_v60 = vunpack.c.h.s8.bf16 %v1462_v5  ;;  %v1607_v52 = vunpack.c.l.s8.bf16 %v1463_v45  ;;  %v1464_v45 = vld [vmem:[#allocation8 + $0xa0] sm:$0xff]  ;;  %v1457_v5 = vld [vmem:[#allocation8 + $0x68] sm:$0xff] }
 0x262   :  { %v1193_v63 = vpop.f32.mrf.mxu1 }
 0x263   :  { %v1194_v6 = vadd.f32 %v1193_v63, %v1151_v55  ;;  %v1394_v8 = vmul.f32 %v1377_v1, %v1192_v61  ;;  %v1598_v55 = vunpack.c.h.s8.bf16 %v1454_v54  ;;  %v1583_v61 = vunpack.c.h.s8.bf16 %v1447_v57  ;;  %v1449_v54 = vld [vmem:[#allocation8 + $0x28] sm:$0xff]  ;;  %v1448_v57 = vld [vmem:[#allocation8 + $0x20] sm:$0xff] }
 0x264   :  { %v1195_v10 = vpop.f32.mrf.mxu1 }
 0x265   :  { %v1395_v14 = vmul.f32 %v1381_v56, %v1194_v6  ;;  %v1196_v15 = vadd.f32 %v1195_v10, %v1153_v4  ;;  %v1424_v21 = vadd.f32 %v1407_v16, %v1394_v8  ;;  %v1503_v4 = vld [vmem:[#allocation8 + $0x1d8] sm:$0xff]  ;;  %v1502_v10 = vld [vmem:[#allocation8 + $0x1d0] sm:$0xff] }
 0x266   :  { %v1197_v38 = vpop.f32.mrf.mxu1  ;;  %v1694_v11 = vunpack.c.h.s8.bf16 %v1502_v10  ;;  %v1494_v8 = vld [vmem:[#allocation8 + $0x190] sm:$0xff] }
 0x267   :  { %v1398_v20 = vmul.f32 %v1377_v1, %v1196_v15  ;;  %v1198_v22 = vadd.f32 %v1197_v38, %v1155_v12  ;;  %v1425_v62 = vadd.f32 %v1411_v7, %v1395_v14  ;;  %v1432_v32 = vmax.f32 %v1424_v21, 0.0  ;;  %v1446_v1 = vld [vmem:[#allocation8 + $0x10] sm:$0xff]  ;;  %v1495_v14 = vld [vmem:[#allocation8 + $0x198] sm:$0xff] }
 0x268   :  { %v1582_v63 = vunpack.c.h.s8.bf16 %v1446_v1  ;;  %v1574_v6 = vunpack.c.l.s8.bf16 %v1446_v1  ;;  %v1687_v12 = vunpack.c.l.s8.bf16 %v1503_v4  ;;  %v1686_v15 = vunpack.c.l.s8.bf16 %v1502_v10  ;;  %v1478_v21 = vld [vmem:[#allocation8 + $0x110] sm:$0xff] }
 0x269   :  { %v1428_v13 = vadd.f32 %v1407_v16, %v1398_v20  ;;  %v1399_v0 = vmul.f32 %v1381_v56, %v1198_v22  ;;  %v1433_v46 = vmax.f32 %v1425_v62, 0.0  ;;  %v1591_v56 = vunpack.c.l.s8.bf16 %v1455_v19  ;;  %v1487_v20 = vld [vmem:[#allocation8 + $0x158] sm:$0xff]  ;;  %v1456_v19 = vld [vmem:[#allocation8 + $0x60] sm:$0xff] }
 0x26a   :  { %v1679_v43 = vunpack.c.h.s8.bf16 %v1495_v14  ;;  %v1678_v16 = vunpack.c.h.s8.bf16 %v1494_v8  ;;  %v1671_v38 = vunpack.c.l.s8.bf16 %v1495_v14  ;;  %v1670_v22 = vunpack.c.l.s8.bf16 %v1494_v8  ;;  %v1497_v14 = vld [vmem:[#allocation8 + $0x1a8] sm:$0xff] }
 0x26b   :  { %v1429_v35 = vadd.f32 %v1411_v7, %v1399_v0  ;;  %v1436_v26 = vmax.f32 %v1428_v13, 0.0  ;;  %v1695_v7 = vunpack.c.h.s8.bf16 %v1503_v4  ;;  %v1663_v23 = vunpack.c.h.s8.bf16 %v1487_v20  ;;  %v1479_v13 = vld [vmem:[#allocation8 + $0x118] sm:$0xff] }
 0x26c   :  { %v1655_v62 = vunpack.c.l.s8.bf16 %v1487_v20  ;;  %v1654_v0 = vunpack.c.l.s8.bf16 %v1486_v24  ;;  %v1647_v25 = vunpack.c.h.s8.bf16 %v1479_v13  ;;  %v1638_v29 = vunpack.c.l.s8.bf16 %v1478_v21 }
 0x26d   :  { %v1437_v30 = vmax.f32 %v1429_v35, 0.0  ;;  %v3802_v36 = vpack.c.bf16 %v1436_v26, %v1432_v32  ;;  %v1646_v35 = vunpack.c.h.s8.bf16 %v1478_v21  ;;  %v1639_v26 = vunpack.c.l.s8.bf16 %v1479_v13  ;;  %v1488_v21 = vld [vmem:[#allocation8 + $0x160] sm:$0xff] }
 0x26e   :  { %v1625_v32 = vunpack.c.l.s8.bf16 %v1473_v27  ;;  %v1577_v1 = vunpack.c.l.s8.bf16 %v1449_v54  ;;  %v1673_v24 = vunpack.c.l.s8.bf16 %v1497_v14 }
 0x26f   :  { %v3798_v33 = vpack.c.bf16 %v1437_v30, %v1433_v46  ;;  %v1633_v46 = vunpack.c.h.s8.bf16 %v1473_v27  ;;  %v1472_v30 = vld [vmem:[#allocation8 + $0xe0] sm:$0xff] }
 0x270   :  { %v1632_v31 = vunpack.c.h.s8.bf16 %v1472_v30 }
 0x271   :  { %1860 = vmatprep.mubr.bf16.mxu0 %v3798_v33 }
 0x272   :  { %1861 = vmatmul.mubr.bf16.vlgmr.msra.gmra.mxu0 %v3802_v36 }
 0x273   :  { %1915 = vmatpush1.bf16.msra.mxu0 %v1630_v18  ;;  %1946 = vmatprep.mubr.bf16.mxu0 %v3798_v33  ;;  %v1465_v18 = vld [vmem:[#allocation8 + $0xa8] sm:$0xff] }
 0x274   :  { %1916 = vmatprep.subr.bf16.mxu0 %v1623_v39  ;;  %v1624_v39 = vunpack.c.l.s8.bf16 %v1472_v30  ;;  %v1617_v40 = vunpack.c.h.s8.bf16 %v1465_v18 }
 0x277   :  { %1917 = vmatpush1.bf16.msra.mxu0 %v1622_v47  ;;  %v1616_v47 = vunpack.c.h.s8.bf16 %v1464_v45 }
 0x278   :  { %1918 = vmatprep.subr.bf16.mxu0 %v1615_v50  ;;  %v1609_v50 = vunpack.c.l.s8.bf16 %v1465_v18 }
 0x27b   :  { %1919 = vmatpush1.bf16.msra.mxu0 %v1614_v60  ;;  %v1608_v60 = vunpack.c.l.s8.bf16 %v1464_v45  ;;  %v1481_v45 = vld [vmem:[#allocation8 + $0x128] sm:$0xff] }
 0x27c   :  { %1920 = vmatprep.subr.bf16.mxu0 %v1607_v52  ;;  %v1601_v52 = vunpack.c.h.s8.bf16 %v1457_v5 }
 0x27f   :  { %1921 = vmatpush1.bf16.msra.mxu0 %v1606_v9  ;;  %v1600_v9 = vunpack.c.h.s8.bf16 %v1456_v19 }
 0x280   :  { %1922 = vmatprep.subr.bf16.mxu0 %v1599_v34  ;;  %v1593_v34 = vunpack.c.l.s8.bf16 %v1457_v5  ;;  %v1385_v5 = vrot.slane %v3786_v51, %v3708_v3 }
 0x283   :  { %1923 = vmatpush1.bf16.msra.mxu0 %v1598_v55  ;;  %v1592_v55 = vunpack.c.l.s8.bf16 %v1456_v19 }
 0x284   :  { %1924 = vmatprep.subr.bf16.mxu0 %v1591_v56  ;;  %v1585_v56 = vunpack.c.h.s8.bf16 %v1449_v54 }
 0x287   :  { %1925 = vmatpush1.bf16.msra.mxu0 %v1590_v58  ;;  %v1584_v58 = vunpack.c.h.s8.bf16 %v1448_v57 }
 0x288   :  { %1926 = vmatprep.subr.bf16.mxu0 %v1583_v61 }
 0x28b   :  { %1927 = vmatpush1.bf16.msra.mxu0 %v1582_v63  ;;  %v1505_v63 = vld [vmem:[#allocation8 + $0x1e8] sm:$0xff] }
 0x28c   :  { %1928 = vmatprep.subr.bf16.mxu0 %v1575_v2  ;;  %v1576_v2 = vunpack.c.l.s8.bf16 %v1448_v57 }
 0x28f   :  { %1929 = vmatpush1.bf16.msra.mxu0 %v1574_v6  ;;  %v1697_v6 = vunpack.c.h.s8.bf16 %v1505_v63 }
 0x290   :  { %1930 = vmatprep.subr.bf16.mxu0 %v1695_v7  ;;  %v1504_v7 = vld [vmem:[#allocation8 + $0x1e0] sm:$0xff] }
 0x291   :  { %v1696_v10 = vunpack.c.h.s8.bf16 %v1504_v7 }
 0x293   :  { %1931 = vmatpush2.bf16.msra.mxu0 %v1694_v11 }
 0x294   :  { %1932 = vmatprep.subr.bf16.mxu0 %v1687_v12  ;;  %v1234_v61 = vpop.f32.mrf.mxu0  ;;  %v1689_v12 = vunpack.c.l.s8.bf16 %v1505_v63 }
 0x296   :  { %v1236_v4 = vpop.f32.mrf.mxu0 }
 0x297   :  { %1933 = vmatpush2.bf16.msra.mxu0 %v1686_v15 }
 0x298   :  { %1934 = vmatprep.subr.bf16.mxu0 %v1679_v43  ;;  %v1238_v11 = vpop.f32.mrf.mxu0  ;;  %v1688_v43 = vunpack.c.l.s8.bf16 %v1504_v7 }
 0x29a   :  { %v1240_v8 = vpop.f32.mrf.mxu0 }
 0x29b   :  { %1935 = vmatpush2.bf16.msra.mxu0 %v1678_v16  ;;  %v1681_v16 = vunpack.c.h.s8.bf16 %v1497_v14 }
 0x29c   :  { %1936 = vmatprep.subr.bf16.mxu0 %v1671_v38  ;;  %v1496_v38 = vld [vmem:[#allocation8 + $0x1a0] sm:$0xff] }
 0x29f   :  { %1937 = vmatpush2.bf16.msra.mxu0 %v1670_v22 }
 0x2a0   :  { %1938 = vmatprep.subr.bf16.mxu0 %v1663_v23  ;;  %v1277_v15 = vpop.f32.mrf.mxu1  ;;  %v1680_v23 = vunpack.c.h.s8.bf16 %v1496_v38 }
 0x2a2   :  { %v1279_v20 = vpop.f32.mrf.mxu1 }
 0x2a3   :  { %1939 = vmatpush2.bf16.msra.mxu0 %v1662_v48  ;;  %v1489_v48 = vld [vmem:[#allocation8 + $0x168] sm:$0xff] }
 0x2a4   :  { %1940 = vmatprep.subr.bf16.mxu0 %v1655_v62  ;;  %v1281_v62 = vpop.f32.mrf.mxu1 }
 0x2a5   :  { %v1282_v18 = vadd.f32 %v1281_v62, %v1238_v11 }
 0x2a7   :  { %1941 = vmatpush2.bf16.msra.mxu0 %v1654_v0  ;;  %v1672_v0 = vunpack.c.l.s8.bf16 %v1496_v38 }
 0x2a8   :  { %1942 = vmatprep.subr.bf16.mxu0 %v1647_v25  ;;  %v1665_v25 = vunpack.c.h.s8.bf16 %v1489_v48 }
 0x2ab   :  { %1943 = vmatpush2.bf16.msra.mxu0 %v1646_v35  ;;  %v1278_v35 = vadd.f32 %v1277_v15, %v1234_v61  ;;  %v1419_v61 = vrot.slane %v3792_v41, %v3701_v59  ;;  %v1475_v15 = vld [vmem:[#allocation8 + $0xf8] sm:$0xff] }
 0x2ac   :  { %1944 = vmatprep.subr.bf16.mxu0 %v1639_v26  ;;  %v1283_v26 = vpop.f32.mrf.mxu1 }
 0x2af   :  { %1945 = vmatpush2.bf16.msra.mxu0 %v1638_v29  ;;  %v1280_v29 = vadd.f32 %v1279_v20, %v1236_v4  ;;  %v1635_v20 = vunpack.c.h.s8.bf16 %v1475_v15 }
 0x2b0   :  { %2000 = vmatprep.subr.bf16.mxu0 %v1633_v46  ;;  %v1664_v46 = vunpack.c.h.s8.bf16 %v1488_v21 }
 0x2b2   :  { %1947 = vmatmul.mubr.bf16.vlgmr.msra.gmra.mxu0 %v3802_v36 }
 0x2b3   :  { %2001 = vmatpush1.bf16.msra.mxu0 %v1632_v31  ;;  %2032 = vmatprep.mubr.bf16.mxu0 %v3798_v33 }
 0x2b4   :  { %2002 = vmatprep.subr.bf16.mxu0 %v1625_v32  ;;  %v1657_v32 = vunpack.c.l.s8.bf16 %v1489_v48 }
 0x2b7   :  { %2003 = vmatpush1.bf16.msra.mxu0 %v1624_v39 }
 0x2b8   :  { %2004 = vmatprep.subr.bf16.mxu0 %v1617_v40  ;;  %v1389_v40 = vrot.slane %v3786_v51, %v3701_v59  ;;  %v1415_v51 = vrot.slane %v3792_v41, %v3708_v3  ;;  %v1474_v41 = vld [vmem:[#allocation8 + $0xf0] sm:$0xff] }
 0x2bb   :  { %2005 = vmatpush1.bf16.msra.mxu0 %v1616_v47 }
 0x2bc   :  { %2006 = vmatprep.subr.bf16.mxu0 %v1609_v50 }
 0x2bf   :  { %2007 = vmatpush1.bf16.msra.mxu0 %v1608_v60 }
 0x2c0   :  { %2008 = vmatprep.subr.bf16.mxu0 %v1601_v52  ;;  %v1284_v52 = vadd.f32 %v1283_v26, %v1240_v8  ;;  %v1527_v26 = vld [vmem:[#allocation8 + $0x298] sm:$0xff] }
 0x2c3   :  { %2009 = vmatpush1.bf16.msra.mxu0 %v1600_v9 }
 0x2c4   :  { %2010 = vmatprep.subr.bf16.mxu0 %v1593_v34  ;;  %v1656_v34 = vunpack.c.l.s8.bf16 %v1488_v21  ;;  %v1751_v21 = vunpack.c.l.s8.bf16 %v3800_v28 }
 0x2c7   :  { %2011 = vmatpush1.bf16.msra.mxu0 %v1592_v55  ;;  %v1649_v55 = vunpack.c.h.s8.bf16 %v1481_v45 }
 0x2c8   :  { %2012 = vmatprep.subr.bf16.mxu0 %v1585_v56  ;;  %v1480_v56 = vld [vmem:[#allocation8 + $0x120] sm:$0xff] }
 0x2c9   :  { %v1648_v7 = vunpack.c.h.s8.bf16 %v1480_v56 }
 0x2cb   :  { %2013 = vmatpush1.bf16.msra.mxu0 %v1584_v58 }
 0x2cc   :  { %2014 = vmatprep.subr.bf16.mxu0 %v1577_v1 }
 0x2cf   :  { %2015 = vmatpush1.bf16.msra.mxu0 %v1576_v2 }
 0x2d0   :  { %2016 = vmatprep.subr.bf16.mxu0 %v1697_v6 }
 0x2d3   :  { %2017 = vmatpush2.bf16.msra.mxu0 %v1696_v10  ;;  %v1641_v10 = vunpack.c.l.s8.bf16 %v1481_v45 }
 0x2d4   :  { %2018 = vmatprep.subr.bf16.mxu0 %v1689_v12  ;;  %v1320_v22 = vpop.f32.mrf.mxu0 }
 0x2d5   :  { %v1321_v30 = vadd.f32 %v1320_v22, %v1278_v35  ;;  %v1534_v22 = vld [vmem:[#allocation8 + $0x2d0] sm:$0xff]  ;;  %v1627_v35 = vunpack.c.l.s8.bf16 %v1475_v15 }
 0x2d6   :  { %v1322_v13 = vpop.f32.mrf.mxu0 }
 0x2d7   :  { %2019 = vmatpush2.bf16.msra.mxu0 %v1688_v43  ;;  %v1323_v39 = vadd.f32 %v1322_v13, %v1280_v29  ;;  %v1758_v13 = vunpack.c.h.s8.bf16 %v1534_v22  ;;  %v1750_v29 = vunpack.c.l.s8.bf16 %v1534_v22 }
 0x2d8   :  { %2020 = vmatprep.subr.bf16.mxu0 %v1681_v16  ;;  %v1324_v27 = vpop.f32.mrf.mxu0  ;;  %v1640_v16 = vunpack.c.l.s8.bf16 %v1480_v56 }
 0x2d9   :  { %v1325_v19 = vadd.f32 %v1324_v27, %v1282_v18  ;;  %v1467_v27 = vld [vmem:[#allocation8 + $0xb8] sm:$0xff]  ;;  %v1466_v18 = vld [vmem:[#allocation8 + $0xb0] sm:$0xff] }
 0x2da   :  { %v1326_v47 = vpop.f32.mrf.mxu0  ;;  %v1611_v45 = vunpack.c.l.s8.bf16 %v1467_v27 }
 0x2db   :  { %2021 = vmatpush2.bf16.msra.mxu0 %v1680_v23  ;;  %v1327_v57 = vadd.f32 %v1326_v47, %v1284_v52  ;;  %v1519_v47 = vld [vmem:[#allocation8 + $0x258] sm:$0xff] }
 0x2dc   :  { %2022 = vmatprep.subr.bf16.mxu0 %v1673_v24 }
 0x2df   :  { %2023 = vmatpush2.bf16.msra.mxu0 %v1672_v0  ;;  %v1634_v0 = vunpack.c.h.s8.bf16 %v1474_v41 }
 0x2e0   :  { %v1363_v31 = vpop.f32.mrf.mxu1  ;;  %2024 = vmatprep.subr.bf16.mxu0 %v1665_v25 }
 0x2e1   :  { %v1364_v50 = vadd.f32 %v1363_v31, %v1321_v30  ;;  %v1743_v30 = vunpack.c.h.s8.bf16 %v1527_v26  ;;  %v1619_v31 = vunpack.c.h.s8.bf16 %v1467_v27  ;;  %v1558_v27 = vld [vmem:[#allocation8 + $0x390] sm:$0xff] }
 0x2e2   :  { %v1365_v60 = vpop.f32.mrf.mxu1 }
 0x2e3   :  { %v1366_v9 = vadd.f32 %v1365_v60, %v1323_v39  ;;  %2025 = vmatpush2.bf16.msra.mxu0 %v1664_v46  ;;  %v1396_v63 = vmul.f32 %v1385_v5, %v1364_v50  ;;  %v1626_v46 = vunpack.c.l.s8.bf16 %v1474_v41  ;;  %v1618_v39 = vunpack.c.h.s8.bf16 %v1466_v18  ;;  %v1459_v50 = vld [vmem:[#allocation8 + $0x78] sm:$0xff] }
 0x2e4   :  { %v1367_v54 = vpop.f32.mrf.mxu1  ;;  %2026 = vmatprep.subr.bf16.mxu0 %v1657_v32  ;;  %v1526_v32 = vld [vmem:[#allocation8 + $0x290] sm:$0xff]  ;;  %v1727_v60 = vunpack.c.h.s8.bf16 %v1519_v47  ;;  %v1603_v52 = vunpack.c.h.s8.bf16 %v1459_v50  ;;  %v1595_v56 = vunpack.c.l.s8.bf16 %v1459_v50 }
 0x2e5   :  { %v1397_v58 = vmul.f32 %v1389_v40, %v1366_v9  ;;  %v1368_v1 = vadd.f32 %v1367_v54, %v1325_v19  ;;  %v1426_v43 = vadd.f32 %v1415_v51, %v1396_v63  ;;  %v1742_v28 = vunpack.c.h.s8.bf16 %v1526_v32  ;;  %v1518_v19 = vld [vmem:[#allocation8 + $0x250] sm:$0xff] }
 0x2e6   :  { %v1369_v2 = vpop.f32.mrf.mxu1  ;;  %v1458_v9 = vld [vmem:[#allocation8 + $0x70] sm:$0xff] }
 0x2e7   :  { %v1400_v4 = vmul.f32 %v1385_v5, %v1368_v1  ;;  %v1370_v6 = vadd.f32 %v1369_v2, %v1327_v57  ;;  %2027 = vmatpush2.bf16.msra.mxu0 %v1656_v34  ;;  %v1427_v11 = vadd.f32 %v1419_v61, %v1397_v58  ;;  %v1434_v48 = vmax.f32 %v1426_v43, 0.0  ;;  %v1511_v57 = vld [vmem:[#allocation8 + $0x218] sm:$0xff]  ;;  %v1510_v2 = vld [vmem:[#allocation8 + $0x210] sm:$0xff] }
 0x2e8   :  { %2028 = vmatprep.subr.bf16.mxu0 %v1649_v55  ;;  %v1610_v5 = vunpack.c.l.s8.bf16 %v1466_v18  ;;  %v1726_v34 = vunpack.c.h.s8.bf16 %v1518_v19  ;;  %v1602_v54 = vunpack.c.h.s8.bf16 %v1458_v9  ;;  %v1719_v55 = vunpack.c.l.s8.bf16 %v1519_v47  ;;  %v1451_v58 = vld [vmem:[#allocation8 + $0x38] sm:$0xff]  ;;  %v1550_v50 = vld [vmem:[#allocation8 + $0x350] sm:$0xff] }
 0x2e9   :  { %v1430_v12 = vadd.f32 %v1415_v51, %v1400_v4  ;;  %v1401_v14 = vmul.f32 %v1389_v40, %v1370_v6  ;;  %v1435_v23 = vmax.f32 %v1427_v11, 0.0  ;;  %v1735_v40 = vunpack.c.l.s8.bf16 %v1527_v26  ;;  %v1450_v4 = vld [vmem:[#allocation8 + $0x30] sm:$0xff]  ;;  %v1551_v18 = vld [vmem:[#allocation8 + $0x358] sm:$0xff] }
 0x2ea   :  { %v1594_v1 = vunpack.c.l.s8.bf16 %v1458_v9  ;;  %v1711_v63 = vunpack.c.h.s8.bf16 %v1511_v57  ;;  %v1587_v51 = vunpack.c.h.s8.bf16 %v1451_v58  ;;  %v1710_v6 = vunpack.c.h.s8.bf16 %v1510_v2  ;;  %v1543_v9 = vld [vmem:[#allocation8 + $0x318] sm:$0xff] }
 0x2eb   :  { %v1431_v8 = vadd.f32 %v1419_v61, %v1401_v14  ;;  %2029 = vmatpush2.bf16.msra.mxu0 %v1648_v7  ;;  %v1438_v38 = vmax.f32 %v1430_v12, 0.0  ;;  %v1718_v61 = vunpack.c.l.s8.bf16 %v1518_v19  ;;  %v1586_v7 = vunpack.c.h.s8.bf16 %v1450_v4  ;;  %v1567_v12 = vld [vmem:[#allocation8 + $0x3d8] sm:$0xff] }
 0x2ec   :  { %2030 = vmatprep.subr.bf16.mxu0 %v1641_v10  ;;  %v1703_v10 = vunpack.c.l.s8.bf16 %v1511_v57  ;;  %v1579_v11 = vunpack.c.l.s8.bf16 %v1451_v58  ;;  %v1507_v14 = vld [vmem:[#allocation8 + $0x1f8] sm:$0xff]  ;;  %v1702_v15 = vunpack.c.l.s8.bf16 %v1510_v2  ;;  %v1578_v43 = vunpack.c.l.s8.bf16 %v1450_v4  ;;  %v1542_v58 = vld [vmem:[#allocation8 + $0x310] sm:$0xff]  ;;  %v1537_v4 = vld [vmem:[#allocation8 + $0x2e8] sm:$0xff] }
 0x2ed   :  { %v1439_v24 = vmax.f32 %v1431_v8, 0.0  ;;  %v3821_v25 = vpack.c.bf16 %v1438_v38, %v1434_v48  ;;  %v1823_v8 = vunpack.c.h.s8.bf16 %v1567_v12  ;;  %v1566_v38 = vld [vmem:[#allocation8 + $0x3d0] sm:$0xff]  ;;  %v1559_v48 = vld [vmem:[#allocation8 + $0x398] sm:$0xff] }
 0x2ee   :  { %v1822_v22 = vunpack.c.h.s8.bf16 %v1566_v38 }
 0x2ef   :  { %v3819_v62 = vpack.c.bf16 %v1439_v24, %v1435_v23  ;;  %2031 = vmatpush2.bf16.msra.mxu0 %v1640_v16  ;;  %v1699_v16 = vunpack.c.h.s8.bf16 %v1507_v14  ;;  %v1815_v23 = vunpack.c.l.s8.bf16 %v1567_v12  ;;  %v1691_v24 = vunpack.c.l.s8.bf16 %v1507_v14  ;;  %v1536_v12 = vld [vmem:[#allocation8 + $0x2e0] sm:$0xff] }
 0x2f0   :  { %2086 = vmatprep.subr.bf16.mxu0 %v1635_v20  ;;  %v1506_v20 = vld [vmem:[#allocation8 + $0x1f0] sm:$0xff] }
 0x2f1   :  { %1903 = vmatprep.mubr.bf16.mxu1 %v3819_v62  ;;  %v1698_v41 = vunpack.c.h.s8.bf16 %v1506_v20 }
 0x2f2   :  { %2033 = vmatmul.mubr.bf16.vlgmr.msra.gmra.mxu0 %v3802_v36  ;;  %1904 = vmatmul.mubr.bf16.vlgmr.msra.gmra.mxu1 %v3821_v25 }
 0x2f3   :  { %1958 = vmatpush1.bf16.msra.mxu1 %v1758_v13  ;;  %2087 = vmatpush1.bf16.msra.mxu0 %v1634_v0  ;;  %v1499_v13 = vld [vmem:[#allocation8 + $0x1b8] sm:$0xff]  ;;  %v1814_v0 = vunpack.c.l.s8.bf16 %v1566_v38  ;;  %v1529_v38 = vld [vmem:[#allocation8 + $0x2a8] sm:$0xff] }
 0x2f4   :  { %2118 = vmatprep.mubr.bf16.mxu0 %v3798_v33  ;;  %1989 = vmatprep.mubr.bf16.mxu1 %v3819_v62  ;;  %v1734_v33 = vunpack.c.l.s8.bf16 %v1526_v32  ;;  %v1683_v26 = vunpack.c.h.s8.bf16 %v1499_v13  ;;  %v1675_v32 = vunpack.c.l.s8.bf16 %v1499_v13 }
 0x2f5   :  { %1959 = vmatprep.subr.bf16.mxu1 %v1751_v21  ;;  %2088 = vmatprep.subr.bf16.mxu0 %v1627_v35  ;;  %v1690_v21 = vunpack.c.l.s8.bf16 %v1506_v20  ;;  %v1807_v35 = vunpack.c.h.s8.bf16 %v1559_v48 }
 0x2f7   :  { %1960 = vmatpush1.bf16.msra.mxu1 %v1750_v29  ;;  %2089 = vmatpush1.bf16.msra.mxu0 %v1626_v46  ;;  %v1498_v29 = vld [vmem:[#allocation8 + $0x1b0] sm:$0xff]  ;;  %v1806_v46 = vunpack.c.h.s8.bf16 %v1558_v27 }
 0x2f8   :  { %1961 = vmatprep.subr.bf16.mxu1 %v1743_v30  ;;  %2090 = vmatprep.subr.bf16.mxu0 %v1619_v31  ;;  %v1682_v30 = vunpack.c.h.s8.bf16 %v1498_v29  ;;  %v1799_v31 = vunpack.c.l.s8.bf16 %v1559_v48 }
 0x2fb   :  { %1962 = vmatpush1.bf16.msra.mxu1 %v1742_v28  ;;  %2091 = vmatpush1.bf16.msra.mxu0 %v1618_v39  ;;  %v1491_v28 = vld [vmem:[#allocation8 + $0x178] sm:$0xff]  ;;  %v1798_v39 = vunpack.c.l.s8.bf16 %v1558_v27 }
 0x2fc   :  { %1963 = vmatprep.subr.bf16.mxu1 %v1735_v40  ;;  %2092 = vmatprep.subr.bf16.mxu0 %v1611_v45  ;;  %v1674_v40 = vunpack.c.l.s8.bf16 %v1498_v29  ;;  %v1791_v45 = vunpack.c.h.s8.bf16 %v1551_v18  ;;  %v1667_v47 = vunpack.c.h.s8.bf16 %v1491_v28  ;;  %v1659_v19 = vunpack.c.l.s8.bf16 %v1491_v28  ;;  %v2315_v29 = vld [vmem:[#allocation10 + $0x18] sm:$0xff]  ;;  %v2314_v28 = vld [vmem:[#allocation10 + $0x10] sm:$0xff] }
 0x2ff   :  { %1964 = vmatpush1.bf16.msra.mxu1 %v1734_v33  ;;  %2093 = vmatpush1.bf16.msra.mxu0 %v1610_v5  ;;  %v1490_v33 = vld [vmem:[#allocation8 + $0x170] sm:$0xff]  ;;  %v1790_v5 = vunpack.c.h.s8.bf16 %v1550_v50 }
 0x300   :  { %1965 = vmatprep.subr.bf16.mxu1 %v1727_v60  ;;  %2094 = vmatprep.subr.bf16.mxu0 %v1603_v52  ;;  %v1666_v60 = vunpack.c.h.s8.bf16 %v1490_v33  ;;  %v1783_v52 = vunpack.c.l.s8.bf16 %v1551_v18  ;;  %v2383_v18 = vunpack.c.h.s8.bf16 %v2315_v29 }
 0x303   :  { %1966 = vmatpush1.bf16.msra.mxu1 %v1726_v34  ;;  %2095 = vmatpush1.bf16.msra.mxu0 %v1602_v54  ;;  %v1483_v34 = vld [vmem:[#allocation8 + $0x138] sm:$0xff]  ;;  %v1782_v54 = vunpack.c.l.s8.bf16 %v1550_v50  ;;  %v2381_v50 = vunpack.c.l.s8.bf16 %v2315_v29  ;;  %v2322_v29 = vld [vmem:[#allocation10 + $0x50] sm:$0xff] }
 0x304   :  { %1967 = vmatprep.subr.bf16.mxu1 %v1719_v55  ;;  %2096 = vmatprep.subr.bf16.mxu0 %v1595_v56  ;;  %v1658_v55 = vunpack.c.l.s8.bf16 %v1490_v33  ;;  %v1775_v56 = vunpack.c.h.s8.bf16 %v1543_v9  ;;  %v1651_v57 = vunpack.c.h.s8.bf16 %v1483_v34  ;;  %v1643_v2 = vunpack.c.l.s8.bf16 %v1483_v34  ;;  %v2313_v33 = vld [vmem:[#allocation10 + $0x8] sm:$0xff]  ;;  %v2312_v34 = vld [vmem:[#allocation10] sm:$0xff] }
 0x307   :  { %1968 = vmatpush1.bf16.msra.mxu1 %v1718_v61  ;;  %2097 = vmatpush1.bf16.msra.mxu0 %v1594_v1  ;;  %v1482_v61 = vld [vmem:[#allocation8 + $0x130] sm:$0xff]  ;;  %v1774_v1 = vunpack.c.h.s8.bf16 %v1542_v58 }
 0x308   :  { %1969 = vmatprep.subr.bf16.mxu1 %v1711_v63  ;;  %2098 = vmatprep.subr.bf16.mxu0 %v1587_v51  ;;  %v1650_v63 = vunpack.c.h.s8.bf16 %v1482_v61  ;;  %v1767_v51 = vunpack.c.l.s8.bf16 %v1543_v9  ;;  %v2379_v9 = vunpack.c.h.s8.bf16 %v2313_v33 }
 0x30b   :  { %1970 = vmatpush1.bf16.msra.mxu1 %v1710_v6  ;;  %2099 = vmatpush1.bf16.msra.mxu0 %v1586_v7  ;;  %v2319_v6 = vld [vmem:[#allocation10 + $0x38] sm:$0xff]  ;;  %v1766_v7 = vunpack.c.l.s8.bf16 %v1542_v58  ;;  %v2377_v58 = vunpack.c.l.s8.bf16 %v2313_v33  ;;  %v2320_v33 = vld [vmem:[#allocation10 + $0x40] sm:$0xff] }
 0x30c   :  { %1971 = vmatprep.subr.bf16.mxu1 %v1703_v10  ;;  %2100 = vmatprep.subr.bf16.mxu0 %v1579_v11  ;;  %v1642_v10 = vunpack.c.l.s8.bf16 %v1482_v61  ;;  %v1761_v11 = vunpack.c.h.s8.bf16 %v1537_v4  ;;  %v2391_v14 = vunpack.c.h.s8.bf16 %v2319_v6  ;;  %v2389_v20 = vunpack.c.l.s8.bf16 %v2319_v6  ;;  %v2327_v61 = vld [vmem:[#allocation10 + $0x78] sm:$0xff]  ;;  %v2326_v6 = vld [vmem:[#allocation10 + $0x70] sm:$0xff] }
 0x30f   :  { %1972 = vmatpush1.bf16.msra.mxu1 %v1702_v15  ;;  %2101 = vmatpush1.bf16.msra.mxu0 %v1578_v43  ;;  %v2318_v15 = vld [vmem:[#allocation10 + $0x30] sm:$0xff]  ;;  %v1760_v43 = vunpack.c.h.s8.bf16 %v1536_v12 }
 0x310   :  { %1973 = vmatprep.subr.bf16.mxu1 %v1823_v8  ;;  %2102 = vmatprep.subr.bf16.mxu0 %v1699_v16  ;;  %v1753_v8 = vunpack.c.l.s8.bf16 %v1537_v4  ;;  %v2390_v16 = vunpack.c.h.s8.bf16 %v2318_v15  ;;  %v2388_v48 = vunpack.c.l.s8.bf16 %v2318_v15  ;;  %v2407_v4 = vunpack.c.h.s8.bf16 %v2327_v61  ;;  %v2325_v15 = vld [vmem:[#allocation10 + $0x68] sm:$0xff] }
 0x313   :  { %1974 = vmatpush2.bf16.msra.mxu1 %v1822_v22  ;;  %2103 = vmatpush2.bf16.msra.mxu0 %v1698_v41  ;;  %v2317_v22 = vld [vmem:[#allocation10 + $0x28] sm:$0xff]  ;;  %v1752_v41 = vunpack.c.l.s8.bf16 %v1536_v12 }
 0x314   :  { %1975 = vmatprep.subr.bf16.mxu1 %v1815_v23  ;;  %2104 = vmatprep.subr.bf16.mxu0 %v1691_v24  ;;  %v1745_v23 = vunpack.c.h.s8.bf16 %v1529_v38  ;;  %v1528_v24 = vld [vmem:[#allocation8 + $0x2a0] sm:$0xff]  ;;  %v2387_v13 = vunpack.c.h.s8.bf16 %v2317_v22  ;;  %v2385_v27 = vunpack.c.l.s8.bf16 %v2317_v22  ;;  %v1561_v12 = vld [vmem:[#allocation8 + $0x3a8] sm:$0xff] }
 0x315   :  { %v2324_v22 = vld [vmem:[#allocation10 + $0x60] sm:$0xff] }
 0x317   :  { %1976 = vmatpush2.bf16.msra.mxu1 %v1814_v0  ;;  %2105 = vmatpush2.bf16.msra.mxu0 %v1690_v21  ;;  %v2316_v0 = vld [vmem:[#allocation10 + $0x20] sm:$0xff]  ;;  %v1744_v21 = vunpack.c.h.s8.bf16 %v1528_v24 }
 0x318   :  { %1977 = vmatprep.subr.bf16.mxu1 %v1807_v35  ;;  %2106 = vmatprep.subr.bf16.mxu0 %v1683_v26  ;;  %v1737_v35 = vunpack.c.l.s8.bf16 %v1529_v38  ;;  %v2386_v26 = vunpack.c.h.s8.bf16 %v2316_v0  ;;  %v2404_v38 = vunpack.c.l.s8.bf16 %v2326_v6 }
 0x31b   :  { %1978 = vmatpush2.bf16.msra.mxu1 %v1806_v46  ;;  %2107 = vmatpush2.bf16.msra.mxu0 %v1682_v30  ;;  %v1736_v46 = vunpack.c.l.s8.bf16 %v1528_v24  ;;  %v2402_v24 = vunpack.c.h.s8.bf16 %v2324_v22 }
 0x31c   :  { %1979 = vmatprep.subr.bf16.mxu1 %v1799_v31  ;;  %2108 = vmatprep.subr.bf16.mxu0 %v1675_v32  ;;  %v1520_v31 = vld [vmem:[#allocation8 + $0x260] sm:$0xff]  ;;  %v2384_v32 = vunpack.c.l.s8.bf16 %v2316_v0  ;;  %v2323_v0 = vld [vmem:[#allocation10 + $0x58] sm:$0xff] }
 0x31f   :  { %1980 = vmatpush2.bf16.msra.mxu1 %v1798_v39  ;;  %2109 = vmatpush2.bf16.msra.mxu0 %v1674_v40  ;;  %v1728_v39 = vunpack.c.h.s8.bf16 %v1520_v31 }
 0x320   :  { %1981 = vmatprep.subr.bf16.mxu1 %v1791_v45  ;;  %2110 = vmatprep.subr.bf16.mxu0 %v1667_v47  ;;  %v2382_v45 = vunpack.c.h.s8.bf16 %v2314_v28  ;;  %v1513_v47 = vld [vmem:[#allocation8 + $0x228] sm:$0xff] }
 0x323   :  { %1982 = vmatpush2.bf16.msra.mxu1 %v1790_v5  ;;  %2111 = vmatpush2.bf16.msra.mxu0 %v1666_v60  ;;  %v1720_v5 = vunpack.c.l.s8.bf16 %v1520_v31  ;;  %v1713_v60 = vunpack.c.h.s8.bf16 %v1513_v47  ;;  %v2398_v31 = vunpack.c.h.s8.bf16 %v2322_v29 }
 0x324   :  { %1983 = vmatprep.subr.bf16.mxu1 %v1783_v52  ;;  %2112 = vmatprep.subr.bf16.mxu0 %v1659_v19  ;;  %v1512_v52 = vld [vmem:[#allocation8 + $0x220] sm:$0xff]  ;;  %v2380_v19 = vunpack.c.l.s8.bf16 %v2314_v28  ;;  %v2321_v28 = vld [vmem:[#allocation10 + $0x48] sm:$0xff] }
 0x327   :  { %1984 = vmatpush2.bf16.msra.mxu1 %v1782_v54  ;;  %2113 = vmatpush2.bf16.msra.mxu0 %v1658_v55  ;;  %v1712_v54 = vunpack.c.h.s8.bf16 %v1512_v52  ;;  %v1705_v55 = vunpack.c.l.s8.bf16 %v1513_v47  ;;  %v2396_v47 = vunpack.c.l.s8.bf16 %v2322_v29 }
 0x328   :  { %1985 = vmatprep.subr.bf16.mxu1 %v1775_v56  ;;  %2114 = vmatprep.subr.bf16.mxu0 %v1651_v57  ;;  %v2378_v56 = vunpack.c.h.s8.bf16 %v2312_v34  ;;  %v1569_v57 = vld [vmem:[#allocation8 + $0x3e8] sm:$0xff] }
 0x32b   :  { %1986 = vmatpush2.bf16.msra.mxu1 %v1774_v1  ;;  %2115 = vmatpush2.bf16.msra.mxu0 %v1650_v63  ;;  %v1704_v1 = vunpack.c.l.s8.bf16 %v1512_v52  ;;  %v1825_v63 = vunpack.c.h.s8.bf16 %v1569_v57  ;;  %v2394_v52 = vunpack.c.h.s8.bf16 %v2320_v33 }
 0x32c   :  { %1987 = vmatprep.subr.bf16.mxu1 %v1767_v51  ;;  %2116 = vmatprep.subr.bf16.mxu0 %v1643_v2  ;;  %v1568_v51 = vld [vmem:[#allocation8 + $0x3e0] sm:$0xff]  ;;  %v2376_v2 = vunpack.c.l.s8.bf16 %v2312_v34 }
 0x32f   :  { %1988 = vmatpush2.bf16.msra.mxu1 %v1766_v7  ;;  %2117 = vmatpush2.bf16.msra.mxu0 %v1642_v10  ;;  %v1824_v7 = vunpack.c.h.s8.bf16 %v1568_v51  ;;  %v1817_v10 = vunpack.c.l.s8.bf16 %v1569_v57 }
 0x330   :  { %2043 = vmatprep.subr.bf16.mxu1 %v1761_v11  ;;  %2504 = vmatprep.subr.bf16.mxu0 %v2391_v14  ;;  %v2406_v11 = vunpack.c.h.s8.bf16 %v2326_v6  ;;  %v2405_v14 = vunpack.c.l.s8.bf16 %v2327_v61  ;;  %v1531_v61 = vld [vmem:[#allocation8 + $0x2b8] sm:$0xff] }
 0x331   :  { %v1523_v6 = vld [vmem:[#allocation8 + $0x278] sm:$0xff] }
 0x332   :  { %1990 = vmatmul.mubr.bf16.vlgmr.msra.gmra.mxu1 %v3821_v25  ;;  %2119 = vmatmul.mubr.bf16.vlgmr.msra.gmra.mxu0 %v3802_v36  ;;  %v1521_v36 = vld [vmem:[#allocation8 + $0x268] sm:$0xff] }
 0x333   :  { %2044 = vmatpush1.bf16.msra.mxu1 %v1760_v43  ;;  %2075 = vmatprep.mubr.bf16.mxu1 %v3819_v62  ;;  %v1729_v30 = vunpack.c.h.s8.bf16 %v1521_v36  ;;  %v1721_v40 = vunpack.c.l.s8.bf16 %v1521_v36  ;;  %v1816_v43 = vunpack.c.l.s8.bf16 %v1568_v51  ;;  %v2400_v36 = vunpack.c.l.s8.bf16 %v2324_v22  ;;  %v1530_v51 = vld [vmem:[#allocation8 + $0x2b0] sm:$0xff] }
 0x334   :  { %2045 = vmatprep.subr.bf16.mxu1 %v1753_v8  ;;  %2505 = vmatpush1.bf16.msra.mxu0 %v2390_v16  ;;  %v1809_v8 = vunpack.c.h.s8.bf16 %v1561_v12  ;;  %v1560_v16 = vld [vmem:[#allocation8 + $0x3a0] sm:$0xff] }
 0x335   :  { %2506 = vmatprep.subr.bf16.mxu0 %v2389_v20  ;;  %v2403_v20 = vunpack.c.h.s8.bf16 %v2325_v15 }
 0x337   :  { %2046 = vmatpush1.bf16.msra.mxu1 %v1752_v41  ;;  %v1808_v41 = vunpack.c.h.s8.bf16 %v1560_v16 }
 0x338   :  { %2047 = vmatprep.subr.bf16.mxu1 %v1745_v23  ;;  %2507 = vmatpush1.bf16.msra.mxu0 %v2388_v48  ;;  %v1801_v23 = vunpack.c.l.s8.bf16 %v1561_v12  ;;  %v1553_v48 = vld [vmem:[#allocation8 + $0x368] sm:$0xff] }
 0x339   :  { %2508 = vmatprep.subr.bf16.mxu0 %v2387_v13  ;;  %v2401_v13 = vunpack.c.l.s8.bf16 %v2325_v15  ;;  %v1515_v15 = vld [vmem:[#allocation8 + $0x238] sm:$0xff] }
 0x33a   :  { %v1707_v22 = vunpack.c.l.s8.bf16 %v1515_v15 }
 0x33b   :  { %2048 = vmatpush1.bf16.msra.mxu1 %v1744_v21  ;;  %v1800_v21 = vunpack.c.l.s8.bf16 %v1560_v16  ;;  %v1715_v16 = vunpack.c.h.s8.bf16 %v1515_v15 }
 0x33c   :  { %2049 = vmatprep.subr.bf16.mxu1 %v1737_v35  ;;  %2509 = vmatpush1.bf16.msra.mxu0 %v2386_v26  ;;  %v1793_v35 = vunpack.c.h.s8.bf16 %v1553_v48  ;;  %v1552_v26 = vld [vmem:[#allocation8 + $0x360] sm:$0xff] }
 0x33d   :  { %2510 = vmatprep.subr.bf16.mxu0 %v2385_v27  ;;  %v2399_v27 = vunpack.c.h.s8.bf16 %v2323_v0 }
 0x33f   :  { %2050 = vmatpush1.bf16.msra.mxu1 %v1736_v46  ;;  %v1792_v46 = vunpack.c.h.s8.bf16 %v1552_v26 }
 0x340   :  { %2051 = vmatprep.subr.bf16.mxu1 %v1729_v30  ;;  %2511 = vmatpush1.bf16.msra.mxu0 %v2384_v32  ;;  %v1785_v30 = vunpack.c.l.s8.bf16 %v1553_v48  ;;  %v1545_v32 = vld [vmem:[#allocation8 + $0x328] sm:$0xff]  ;;  %v1570_v48 = vld [vmem:[#allocation8 + $0x3f0] sm:$0xff] }
 0x341   :  { %2512 = vmatprep.subr.bf16.mxu0 %v2383_v18  ;;  %v2397_v18 = vunpack.c.l.s8.bf16 %v2323_v0 }
 0x343   :  { %2052 = vmatpush1.bf16.msra.mxu1 %v1728_v39  ;;  %v1784_v39 = vunpack.c.l.s8.bf16 %v1552_v26 }
 0x344   :  { %2053 = vmatprep.subr.bf16.mxu1 %v1721_v40  ;;  %2513 = vmatpush1.bf16.msra.mxu0 %v2382_v45  ;;  %v1777_v40 = vunpack.c.h.s8.bf16 %v1545_v32  ;;  %v1544_v45 = vld [vmem:[#allocation8 + $0x320] sm:$0xff] }
 0x345   :  { %2514 = vmatprep.subr.bf16.mxu0 %v2381_v50  ;;  %v2395_v50 = vunpack.c.h.s8.bf16 %v2321_v28  ;;  %v1768_v34 = vunpack.c.l.s8.bf16 %v1544_v45 }
 0x347   :  { %2054 = vmatpush1.bf16.msra.mxu1 %v1720_v5  ;;  %v1776_v5 = vunpack.c.h.s8.bf16 %v1544_v45 }
 0x348   :  { %2055 = vmatprep.subr.bf16.mxu1 %v1713_v60  ;;  %2515 = vmatpush1.bf16.msra.mxu0 %v2380_v19  ;;  %v1769_v60 = vunpack.c.l.s8.bf16 %v1545_v32  ;;  %v1539_v19 = vld [vmem:[#allocation8 + $0x2f8] sm:$0xff]  ;;  %v1554_v32 = vld [vmem:[#allocation8 + $0x370] sm:$0xff] }
 0x349   :  { %2516 = vmatprep.subr.bf16.mxu0 %v2379_v9  ;;  %v2393_v9 = vunpack.c.l.s8.bf16 %v2321_v28 }
 0x34b   :  { %2056 = vmatpush1.bf16.msra.mxu1 %v1712_v54  ;;  %v1763_v54 = vunpack.c.h.s8.bf16 %v1539_v19 }
 0x34c   :  { %2057 = vmatprep.subr.bf16.mxu1 %v1705_v55  ;;  %2517 = vmatpush1.bf16.msra.mxu0 %v2378_v56  ;;  %v1538_v55 = vld [vmem:[#allocation8 + $0x2f0] sm:$0xff]  ;;  %v2392_v56 = vunpack.c.l.s8.bf16 %v2320_v33 }
 0x34d   :  { %2518 = vmatprep.subr.bf16.mxu0 %v2377_v58  ;;  %v1762_v57 = vunpack.c.h.s8.bf16 %v1538_v55  ;;  %v1755_v58 = vunpack.c.l.s8.bf16 %v1539_v19 }
 0x34f   :  { %2058 = vmatpush1.bf16.msra.mxu1 %v1704_v1  ;;  %v1754_v1 = vunpack.c.l.s8.bf16 %v1538_v55 }
 0x350   :  { %2059 = vmatprep.subr.bf16.mxu1 %v1825_v63  ;;  %2519 = vmatpush1.bf16.msra.mxu0 %v2376_v2  ;;  %v1747_v63 = vunpack.c.h.s8.bf16 %v1531_v61  ;;  %v1746_v2 = vunpack.c.h.s8.bf16 %v1530_v51 }
 0x351   :  { %2520 = vmatprep.subr.bf16.mxu0 %v2407_v4  ;;  %v1739_v4 = vunpack.c.l.s8.bf16 %v1531_v61 }
 0x353   :  { %2060 = vmatpush2.bf16.msra.mxu1 %v1824_v7  ;;  %v1738_v7 = vunpack.c.l.s8.bf16 %v1530_v51 }
 0x354   :  { %2061 = vmatprep.subr.bf16.mxu1 %v1817_v10  ;;  %2521 = vmatpush2.bf16.msra.mxu0 %v2406_v11  ;;  %v1731_v10 = vunpack.c.h.s8.bf16 %v1523_v6  ;;  %v1522_v11 = vld [vmem:[#allocation8 + $0x270] sm:$0xff] }
 0x355   :  { %2522 = vmatprep.subr.bf16.mxu0 %v2405_v14  ;;  %v1730_v12 = vunpack.c.h.s8.bf16 %v1522_v11  ;;  %v1723_v14 = vunpack.c.l.s8.bf16 %v1523_v6 }
 0x357   :  { %2062 = vmatpush2.bf16.msra.mxu1 %v1816_v43  ;;  %v1722_v43 = vunpack.c.l.s8.bf16 %v1522_v11 }
 0x358   :  { %2063 = vmatprep.subr.bf16.mxu1 %v1809_v8  ;;  %2523 = vmatpush2.bf16.msra.mxu0 %v2404_v38  ;;  %v1514_v38 = vld [vmem:[#allocation8 + $0x230] sm:$0xff] }
 0x359   :  { %2524 = vmatprep.subr.bf16.mxu0 %v2403_v20  ;;  %v1714_v20 = vunpack.c.h.s8.bf16 %v1514_v38 }
 0x35b   :  { %2064 = vmatpush2.bf16.msra.mxu1 %v1808_v41  ;;  %v1571_v41 = vld [vmem:[#allocation8 + $0x3f8] sm:$0xff] }
 0x35c   :  { %2065 = vmatprep.subr.bf16.mxu1 %v1801_v23  ;;  %2525 = vmatpush2.bf16.msra.mxu0 %v2402_v24  ;;  %v1706_v23 = vunpack.c.l.s8.bf16 %v1514_v38  ;;  %v1827_v24 = vunpack.c.h.s8.bf16 %v1571_v41  ;;  %v1819_v0 = vunpack.c.l.s8.bf16 %v1571_v41 }
 0x35d   :  { %2526 = vmatprep.subr.bf16.mxu0 %v2401_v13  ;;  %v1826_v13 = vunpack.c.h.s8.bf16 %v1570_v48 }
 0x35f   :  { %2066 = vmatpush2.bf16.msra.mxu1 %v1800_v21  ;;  %v1563_v21 = vld [vmem:[#allocation8 + $0x3b8] sm:$0xff] }
 0x360   :  { %2067 = vmatprep.subr.bf16.mxu1 %v1793_v35  ;;  %2527 = vmatpush2.bf16.msra.mxu0 %v2400_v36  ;;  %v1818_v35 = vunpack.c.l.s8.bf16 %v1570_v48  ;;  %v1811_v26 = vunpack.c.h.s8.bf16 %v1563_v21  ;;  %v1562_v36 = vld [vmem:[#allocation8 + $0x3b0] sm:$0xff]  ;;  %v1803_v29 = vunpack.c.l.s8.bf16 %v1563_v21 }
 0x361   :  { %2528 = vmatprep.subr.bf16.mxu0 %v2399_v27  ;;  %v1810_v27 = vunpack.c.h.s8.bf16 %v1562_v36 }
 0x363   :  { %2068 = vmatpush2.bf16.msra.mxu1 %v1792_v46  ;;  %v1555_v46 = vld [vmem:[#allocation8 + $0x378] sm:$0xff] }
 0x364   :  { %2069 = vmatprep.subr.bf16.mxu1 %v1785_v30  ;;  %2529 = vmatpush2.bf16.msra.mxu0 %v2398_v31  ;;  %v1802_v30 = vunpack.c.l.s8.bf16 %v1562_v36  ;;  %v1795_v31 = vunpack.c.h.s8.bf16 %v1555_v46  ;;  %v1787_v28 = vunpack.c.l.s8.bf16 %v1555_v46  ;;  %v2330_v36 = vld [vmem:[#allocation10 + $0x90] sm:$0xff] }
 0x365   :  { %2530 = vmatprep.subr.bf16.mxu0 %v2397_v18  ;;  %v1794_v18 = vunpack.c.h.s8.bf16 %v1554_v32  ;;  %v2350_v46 = vld [vmem:[#allocation10 + $0x130] sm:$0xff] }
 0x367   :  { %2070 = vmatpush2.bf16.msra.mxu1 %v1784_v39  ;;  %v1547_v39 = vld [vmem:[#allocation8 + $0x338] sm:$0xff] }
 0x368   :  { %2071 = vmatprep.subr.bf16.mxu1 %v1777_v40  ;;  %2531 = vmatpush2.bf16.msra.mxu0 %v2396_v47  ;;  %v1786_v40 = vunpack.c.l.s8.bf16 %v1554_v32  ;;  %v1779_v45 = vunpack.c.h.s8.bf16 %v1547_v39  ;;  %v1546_v47 = vld [vmem:[#allocation8 + $0x330] sm:$0xff]  ;;  %v1771_v33 = vunpack.c.l.s8.bf16 %v1547_v39  ;;  %v2414_v32 = vunpack.c.h.s8.bf16 %v2330_v36 }
 0x369   :  { %2532 = vmatprep.subr.bf16.mxu0 %v2395_v50  ;;  %v1778_v50 = vunpack.c.h.s8.bf16 %v1546_v47 }
 0x36b   :  { %2072 = vmatpush2.bf16.msra.mxu1 %v1776_v5  ;;  %v2335_v5 = vld [vmem:[#allocation10 + $0xb8] sm:$0xff] }
 0x36c   :  { %2073 = vmatprep.subr.bf16.mxu1 %v1769_v60  ;;  %2533 = vmatpush2.bf16.msra.mxu0 %v2394_v52  ;;  %v1770_v60 = vunpack.c.l.s8.bf16 %v1546_v47  ;;  %v1862_v52 = vpop.f32.mrf.mxu0  ;;  %v2423_v19 = vunpack.c.h.s8.bf16 %v2335_v5  ;;  %v2421_v55 = vunpack.c.l.s8.bf16 %v2335_v5  ;;  %v2349_v5 = vld [vmem:[#allocation10 + $0x128] sm:$0xff] }
 0x36d   :  { %2534 = vmatprep.subr.bf16.mxu0 %v2393_v9  ;;  %v2334_v9 = vld [vmem:[#allocation10 + $0xb0] sm:$0xff] }
 0x36f   :  { %2074 = vmatpush2.bf16.msra.mxu1 %v1768_v34  ;;  %v2422_v34 = vunpack.c.h.s8.bf16 %v2334_v9 }
 0x370   :  { %2129 = vmatprep.subr.bf16.mxu1 %v1763_v54  ;;  %2535 = vmatpush2.bf16.msra.mxu0 %v2392_v56  ;;  %v1864_v54 = vpop.f32.mrf.mxu0  ;;  %v3837_v56 = vld [vmem:[#allocation16 + $0xc] sm:$0xff] }
 0x371   :  { %v2181_v61 = vrot.slane %v3837_v56, %v3678_v42 }
 0x372   :  { %2076 = vmatmul.mubr.bf16.vlgmr.msra.gmra.mxu1 %v3821_v25 }
 0x373   :  { %2130 = vmatpush1.bf16.msra.mxu1 %v1762_v57  ;;  %2161 = vmatprep.mubr.bf16.mxu1 %v3819_v62  ;;  %v3834_v62 = vld [vmem:[#allocation10 + $0x138] sm:$0xff]  ;;  %v2333_v57 = vld [vmem:[#allocation10 + $0xa8] sm:$0xff] }
 0x374   :  { %2131 = vmatprep.subr.bf16.mxu1 %v1755_v58  ;;  %v2455_v8 = vunpack.c.h.s8.bf16 %v3834_v62  ;;  %v2419_v6 = vunpack.c.h.s8.bf16 %v2333_v57 }
 0x376   :  { %2590 = vmatprep.subr.bf16.mxu0 %v2455_v8 }
 0x377   :  { %2132 = vmatpush1.bf16.msra.mxu1 %v1754_v1  ;;  %v2420_v1 = vunpack.c.l.s8.bf16 %v2334_v9  ;;  %v2451_v9 = vunpack.c.h.s8.bf16 %v2349_v5 }
 0x378   :  { %2133 = vmatprep.subr.bf16.mxu1 %v1747_v63  ;;  %v1866_v63 = vpop.f32.mrf.mxu0 }
 0x37a   :  { %v1868_v8 = vpop.f32.mrf.mxu0 }
 0x37b   :  { %2134 = vmatpush1.bf16.msra.mxu1 %v1746_v2  ;;  %v2177_v2 = vrot.slane %v3837_v56, %v3683_v44 }
 0x37c   :  { %2135 = vmatprep.subr.bf16.mxu1 %v1739_v4 }
 0x37f   :  { %2136 = vmatpush1.bf16.msra.mxu1 %v1738_v7  ;;  %v2332_v7 = vld [vmem:[#allocation10 + $0xa0] sm:$0xff] }
 0x380   :  { %2137 = vmatprep.subr.bf16.mxu1 %v1731_v10  ;;  %v3844_v10 = vld [vmem:[#allocation14 + $0xc] sm:$0xff]  ;;  %v2416_v21 = vunpack.c.l.s8.bf16 %v2332_v7 }
 0x381   :  { %v2235_v38 = vrot.slane %v3844_v10, %v3683_v44 }
 0x383   :  { %2138 = vmatpush1.bf16.msra.mxu1 %v1730_v12 }
 0x384   :  { %2139 = vmatprep.subr.bf16.mxu1 %v1723_v14  ;;  %v2239_v14 = vrot.slane %v3844_v10, %v3678_v42 }
 0x387   :  { %2140 = vmatpush1.bf16.msra.mxu1 %v1722_v43  ;;  %v2418_v43 = vunpack.c.h.s8.bf16 %v2332_v7 }
 0x388   :  { %2141 = vmatprep.subr.bf16.mxu1 %v1715_v16 }
 0x38b   :  { %2142 = vmatpush1.bf16.msra.mxu1 %v1714_v20 }
 0x38c   :  { %2143 = vmatprep.subr.bf16.mxu1 %v1707_v22  ;;  %v2417_v22 = vunpack.c.l.s8.bf16 %v2333_v57  ;;  %v2343_v57 = vld [vmem:[#allocation10 + $0xf8] sm:$0xff] }
 0x38f   :  { %2144 = vmatpush1.bf16.msra.mxu1 %v1706_v23 }
 0x390   :  { %2145 = vmatprep.subr.bf16.mxu1 %v1827_v24  ;;  %v2331_v24 = vld [vmem:[#allocation10 + $0x98] sm:$0xff] }
 0x393   :  { %2146 = vmatpush2.bf16.msra.mxu1 %v1826_v13 }
 0x394   :  { %2147 = vmatprep.subr.bf16.mxu1 %v1819_v0 }
 0x397   :  { %2148 = vmatpush2.bf16.msra.mxu1 %v1818_v35 }
 0x398   :  { %2149 = vmatprep.subr.bf16.mxu1 %v1811_v26  ;;  %v2415_v26 = vunpack.c.h.s8.bf16 %v2331_v24 }
 0x39b   :  { %2150 = vmatpush2.bf16.msra.mxu1 %v1810_v27 }
 0x39c   :  { %2151 = vmatprep.subr.bf16.mxu1 %v1803_v29 }
 0x39f   :  { %2152 = vmatpush2.bf16.msra.mxu1 %v1802_v30 }
 0x3a0   :  { %2153 = vmatprep.subr.bf16.mxu1 %v1795_v31 }
 0x3a3   :  { %2154 = vmatpush2.bf16.msra.mxu1 %v1794_v18 }
 0x3a4   :  { %2155 = vmatprep.subr.bf16.mxu1 %v1787_v28  ;;  %v2413_v28 = vunpack.c.l.s8.bf16 %v2331_v24  ;;  %v2339_v24 = vld [vmem:[#allocation10 + $0xd8] sm:$0xff] }
 0x3a7   :  { %2156 = vmatpush2.bf16.msra.mxu1 %v1786_v40  ;;  %v2329_v40 = vld [vmem:[#allocation10 + $0x88] sm:$0xff] }
 0x3a8   :  { %2157 = vmatprep.subr.bf16.mxu1 %v1779_v45  ;;  %v2454_v45 = vunpack.c.h.s8.bf16 %v2350_v46 }
 0x3ab   :  { %2158 = vmatpush2.bf16.msra.mxu1 %v1778_v50  ;;  %v2453_v50 = vunpack.c.l.s8.bf16 %v3834_v62 }
 0x3ac   :  { %2159 = vmatprep.subr.bf16.mxu1 %v1771_v33  ;;  %v2412_v33 = vunpack.c.l.s8.bf16 %v2330_v36 }
 0x3af   :  { %2160 = vmatpush2.bf16.msra.mxu1 %v1770_v60  ;;  %v2411_v60 = vunpack.c.h.s8.bf16 %v2329_v40 }
 0x3b0   :  { %2547 = vmatprep.subr.bf16.mxu1 %v2423_v19  ;;  %v2452_v19 = vunpack.c.l.s8.bf16 %v2350_v46 }
 0x3b2   :  { %2162 = vmatmul.mubr.bf16.vlgmr.msra.gmra.mxu1 %v3821_v25  ;;  %v1905_v58 = vpop.f32.mrf.mxu1 }
 0x3b3   :  { %2548 = vmatpush1.bf16.msra.mxu1 %v2422_v34  ;;  %v1906_v51 = vadd.f32 %v1905_v58, %v1862_v52  ;;  %v2328_v52 = vld [vmem:[#allocation10 + $0x80] sm:$0xff]  ;;  %v2449_v58 = vunpack.c.l.s8.bf16 %v2349_v5 }
 0x3b4   :  { %v1907_v4 = vpop.f32.mrf.mxu1  ;;  %2549 = vmatprep.subr.bf16.mxu1 %v2421_v55  ;;  %v2348_v34 = vld [vmem:[#allocation10 + $0x120] sm:$0xff]  ;;  %v2409_v55 = vunpack.c.l.s8.bf16 %v2329_v40 }
 0x3b5   :  { %v1908_v11 = vadd.f32 %v1907_v4, %v1864_v54  ;;  %v2214_v16 = vmul.f32 %v2177_v2, %v1906_v51  ;;  %v2410_v54 = vunpack.c.h.s8.bf16 %v2328_v52  ;;  %v2450_v62 = vunpack.c.h.s8.bf16 %v2348_v34  ;;  %v2342_v51 = vld [vmem:[#allocation10 + $0xf0] sm:$0xff] }
 0x3b6   :  { %v1909_v12 = vpop.f32.mrf.mxu1  ;;  %v2438_v7 = vunpack.c.h.s8.bf16 %v2342_v51 }
 0x3b7   :  { %v2215_v25 = vmul.f32 %v2181_v61, %v1908_v11  ;;  %v1910_v15 = vadd.f32 %v1909_v12, %v1866_v63  ;;  %2550 = vmatpush1.bf16.msra.mxu1 %v2420_v1  ;;  %v2272_v35 = vadd.f32 %v2235_v38, %v2214_v16  ;;  %v2347_v1 = vld [vmem:[#allocation10 + $0x118] sm:$0xff]  ;;  %v2439_v63 = vunpack.c.h.s8.bf16 %v2343_v57  ;;  %v2341_v12 = vld [vmem:[#allocation10 + $0xe8] sm:$0xff]  ;;  %v2340_v16 = vld [vmem:[#allocation10 + $0xe0] sm:$0xff] }
 0x3b8   :  { %v1911_v20 = vpop.f32.mrf.mxu1  ;;  %2551 = vmatprep.subr.bf16.mxu1 %v2419_v6  ;;  %v2447_v4 = vunpack.c.h.s8.bf16 %v2347_v1  ;;  %v2346_v6 = vld [vmem:[#allocation10 + $0x110] sm:$0xff]  ;;  %v2437_v11 = vunpack.c.l.s8.bf16 %v2343_v57 }
 0x3b9   :  { %v2222_v41 = vmul.f32 %v2177_v2, %v1910_v15  ;;  %v1912_v23 = vadd.f32 %v1911_v20, %v1868_v8  ;;  %v2273_v48 = vadd.f32 %v2239_v14, %v2215_v25  ;;  %v2288_v18 = vmax.f32 %v2272_v35, 0.0 }
 0x3ba   :  { %v2448_v2 = vunpack.c.l.s8.bf16 %v2348_v34  ;;  %v2446_v25 = vunpack.c.h.s8.bf16 %v2346_v6  ;;  %v2436_v15 = vunpack.c.l.s8.bf16 %v2342_v51  ;;  %v2435_v8 = vunpack.c.h.s8.bf16 %v2341_v12 }
 0x3bb   :  { %v2280_v13 = vadd.f32 %v2235_v38, %v2222_v41  ;;  %v2223_v0 = vmul.f32 %v2181_v61, %v1912_v23  ;;  %2552 = vmatpush1.bf16.msra.mxu1 %v2418_v43  ;;  %v2289_v30 = vmax.f32 %v2273_v48, 0.0  ;;  %v2408_v61 = vunpack.c.l.s8.bf16 %v2328_v52  ;;  %v2345_v43 = vld [vmem:[#allocation10 + $0x108] sm:$0xff] }
 0x3bc   :  { %2553 = vmatprep.subr.bf16.mxu1 %v2417_v22  ;;  %v2444_v38 = vunpack.c.l.s8.bf16 %v2346_v6  ;;  %v2443_v20 = vunpack.c.h.s8.bf16 %v2345_v43  ;;  %v2344_v22 = vld [vmem:[#allocation10 + $0x100] sm:$0xff]  ;;  %v2434_v41 = vunpack.c.h.s8.bf16 %v2340_v16  ;;  %v2433_v23 = vunpack.c.l.s8.bf16 %v2341_v12  ;;  %v2353_v6 = vld [vmem:[#allocation10 + $0x148] sm:$0xff] }
 0x3bd   :  { %v2281_v27 = vadd.f32 %v2239_v14, %v2223_v0  ;;  %v2296_v29 = vmax.f32 %v2280_v13, 0.0  ;;  %v2445_v14 = vunpack.c.l.s8.bf16 %v2347_v1  ;;  %v2442_v48 = vunpack.c.h.s8.bf16 %v2344_v22 }
 0x3be   :  { %v2441_v13 = vunpack.c.l.s8.bf16 %v2345_v43  ;;  %v2432_v0 = vunpack.c.l.s8.bf16 %v2340_v16  ;;  %v2431_v35 = vunpack.c.h.s8.bf16 %v2339_v24  ;;  %v2440_v36 = vunpack.c.l.s8.bf16 %v2344_v22  ;;  %v2352_v16 = vld [vmem:[#allocation10 + $0x140] sm:$0xff] }
 0x3bf   :  { %v2297_v31 = vmax.f32 %v2281_v27, 0.0  ;;  %2554 = vmatpush1.bf16.msra.mxu1 %v2416_v21  ;;  %v2304_v47 = vpack.c.bf16 %v2296_v29, %v2288_v18  ;;  %v2359_v21 = vld [vmem:[#allocation10 + $0x178] sm:$0xff]  ;;  %v2358_v29 = vld [vmem:[#allocation10 + $0x170] sm:$0xff]  ;;  %v2185_v12 = vrot.slane %v3837_v56, %v3708_v3 }
 0x3c0   :  { %2555 = vmatprep.subr.bf16.mxu1 %v2415_v26  ;;  %v2338_v26 = vld [vmem:[#allocation10 + $0xd0] sm:$0xff]  ;;  %v2471_v27 = vunpack.c.h.s8.bf16 %v2359_v21  ;;  %v2469_v18 = vunpack.c.l.s8.bf16 %v2359_v21  ;;  %v2458_v21 = vunpack.c.h.s8.bf16 %v2352_v16 }
 0x3c1   :  { %v2305_v39 = vpack.c.bf16 %v2297_v31, %v2289_v30  ;;  %v2430_v46 = vunpack.c.h.s8.bf16 %v2338_v26  ;;  %v2429_v30 = vunpack.c.l.s8.bf16 %v2339_v24  ;;  %v2337_v31 = vld [vmem:[#allocation10 + $0xc8] sm:$0xff]  ;;  %v2243_v24 = vrot.slane %v3844_v10, %v3708_v3 }
 0x3c2   :  { %v2427_v40 = vunpack.c.h.s8.bf16 %v2337_v31 }
 0x3c3   :  { %2536 = vmatprep.mubr.bf16.mxu0 %v2305_v39  ;;  %2556 = vmatpush1.bf16.msra.mxu1 %v2414_v32  ;;  %v2470_v32 = vunpack.c.h.s8.bf16 %v2358_v29  ;;  %v2357_v39 = vld [vmem:[#allocation10 + $0x168] sm:$0xff] }
 0x3c4   :  { %2537 = vmatmul.mubr.bf16.vlgmr.msra.gmra.mxu0 %v2304_v47  ;;  %2557 = vmatprep.subr.bf16.mxu1 %v2413_v28  ;;  %v2428_v28 = vunpack.c.l.s8.bf16 %v2338_v26  ;;  %v2468_v47 = vunpack.c.l.s8.bf16 %v2358_v29 }
 0x3c5   :  { %2591 = vmatpush1.bf16.msra.mxu0 %v2454_v45  ;;  %v2336_v45 = vld [vmem:[#allocation10 + $0xc0] sm:$0xff] }
 0x3c6   :  { %2592 = vmatprep.subr.bf16.mxu0 %v2453_v50  ;;  %v2467_v50 = vunpack.c.h.s8.bf16 %v2357_v39  ;;  %v2426_v5 = vunpack.c.h.s8.bf16 %v2336_v45  ;;  %v2424_v34 = vunpack.c.l.s8.bf16 %v2336_v45 }
 0x3c7   :  { %2558 = vmatpush1.bf16.msra.mxu1 %v2412_v33  ;;  %v2356_v33 = vld [vmem:[#allocation10 + $0x160] sm:$0xff] }
 0x3c8   :  { %2559 = vmatprep.subr.bf16.mxu1 %v2411_v60  ;;  %v2425_v60 = vunpack.c.l.s8.bf16 %v2337_v31  ;;  %v2466_v52 = vunpack.c.h.s8.bf16 %v2356_v33  ;;  %v2366_v31 = vld [vmem:[#allocation10 + $0x1b0] sm:$0xff] }
 0x3c9   :  { %2593 = vmatpush1.bf16.msra.mxu0 %v2452_v19  ;;  %v3851_v19 = vld [vmem:[#allocation10 + $0x1b8] sm:$0xff] }
 0x3ca   :  { %2594 = vmatprep.subr.bf16.mxu0 %v2451_v9  ;;  %v2465_v9 = vunpack.c.l.s8.bf16 %v2357_v39  ;;  %v2487_v57 = vunpack.c.h.s8.bf16 %v3851_v19  ;;  %v2486_v39 = vunpack.c.h.s8.bf16 %v2366_v31  ;;  %v2485_v45 = vunpack.c.l.s8.bf16 %v3851_v19 }
 0x3cb   :  { %2560 = vmatpush1.bf16.msra.mxu1 %v2410_v54  ;;  %v2355_v54 = vld [vmem:[#allocation10 + $0x158] sm:$0xff] }
 0x3cc   :  { %2561 = vmatprep.subr.bf16.mxu1 %v2409_v55  ;;  %v1948_v55 = vpop.f32.mrf.mxu0 }
 0x3cd   :  { %2595 = vmatpush1.bf16.msra.mxu0 %v2450_v62  ;;  %v2464_v62 = vunpack.c.l.s8.bf16 %v2356_v33 }
 0x3ce   :  { %2596 = vmatprep.subr.bf16.mxu0 %v2449_v58  ;;  %v2463_v58 = vunpack.c.h.s8.bf16 %v2355_v54  ;;  %v1950_v1 = vpop.f32.mrf.mxu0 }
 0x3cf   :  { %2562 = vmatpush1.bf16.msra.mxu1 %v2408_v61  ;;  %v2354_v61 = vld [vmem:[#allocation10 + $0x150] sm:$0xff] }
 0x3d0   :  { %2563 = vmatprep.subr.bf16.mxu1 %v2439_v63  ;;  %v2462_v63 = vunpack.c.h.s8.bf16 %v2354_v61 }
 0x3d1   :  { %2597 = vmatpush1.bf16.msra.mxu0 %v2448_v2  ;;  %v2461_v2 = vunpack.c.l.s8.bf16 %v2355_v54 }
 0x3d2   :  { %2598 = vmatprep.subr.bf16.mxu0 %v2447_v4  ;;  %v2189_v4 = vrot.slane %v3837_v56, %v3701_v59 }
 0x3d3   :  { %2564 = vmatpush2.bf16.msra.mxu1 %v2438_v7  ;;  %v1952_v7 = vpop.f32.mrf.mxu0 }
 0x3d4   :  { %2565 = vmatprep.subr.bf16.mxu1 %v2437_v11 }
 0x3d5   :  { %2599 = vmatpush1.bf16.msra.mxu0 %v2446_v25 }
 0x3d6   :  { %2600 = vmatprep.subr.bf16.mxu0 %v2445_v14 }
 0x3d7   :  { %2566 = vmatpush2.bf16.msra.mxu1 %v2436_v15  ;;  %v2460_v15 = vunpack.c.l.s8.bf16 %v2354_v61 }
 0x3d8   :  { %2567 = vmatprep.subr.bf16.mxu1 %v2435_v8  ;;  %v2459_v8 = vunpack.c.h.s8.bf16 %v2353_v6 }
 0x3d9   :  { %2601 = vmatpush1.bf16.msra.mxu0 %v2444_v38 }
 0x3da   :  { %2602 = vmatprep.subr.bf16.mxu0 %v2443_v20  ;;  %v2247_v20 = vrot.slane %v3844_v10, %v3701_v59  ;;  %v2456_v59 = vunpack.c.l.s8.bf16 %v2352_v16 }
 0x3db   :  { %2568 = vmatpush2.bf16.msra.mxu1 %v2434_v41  ;;  %v1954_v41 = vpop.f32.mrf.mxu0 }
 0x3dc   :  { %2569 = vmatprep.subr.bf16.mxu1 %v2433_v23 }
 0x3dd   :  { %2603 = vmatpush1.bf16.msra.mxu0 %v2442_v48 }
 0x3de   :  { %2604 = vmatprep.subr.bf16.mxu0 %v2441_v13 }
 0x3df   :  { %2570 = vmatpush2.bf16.msra.mxu1 %v2432_v0 }
 0x3e0   :  { %2571 = vmatprep.subr.bf16.mxu1 %v2431_v35  ;;  %v2457_v35 = vunpack.c.l.s8.bf16 %v2353_v6 }
 0x3e1   :  { %2605 = vmatpush1.bf16.msra.mxu0 %v2440_v36 }
 0x3e2   :  { %2606 = vmatprep.subr.bf16.mxu0 %v2471_v27 }
 0x3e3   :  { %2572 = vmatpush2.bf16.msra.mxu1 %v2430_v46 }
 0x3e4   :  { %2573 = vmatprep.subr.bf16.mxu1 %v2429_v30 }
 0x3e5   :  { %2607 = vmatpush2.bf16.msra.mxu0 %v2470_v32 }
 0x3e6   :  { %2608 = vmatprep.subr.bf16.mxu0 %v2469_v18 }
 0x3e7   :  { %2574 = vmatpush2.bf16.msra.mxu1 %v2428_v28 }
 0x3e8   :  { %2575 = vmatprep.subr.bf16.mxu1 %v2427_v40 }
 0x3e9   :  { %2609 = vmatpush2.bf16.msra.mxu0 %v2468_v47  ;;  %v2365_v47 = vld [vmem:[#allocation10 + $0x1a8] sm:$0xff] }
 0x3ea   :  { %2610 = vmatprep.subr.bf16.mxu0 %v2467_v50  ;;  %v2484_v50 = vunpack.c.l.s8.bf16 %v2366_v31  ;;  %v2483_v33 = vunpack.c.h.s8.bf16 %v2365_v47 }
 0x3eb   :  { %2576 = vmatpush2.bf16.msra.mxu1 %v2426_v5  ;;  %v2364_v5 = vld [vmem:[#allocation10 + $0x1a0] sm:$0xff] }
 0x3ec   :  { %2577 = vmatprep.subr.bf16.mxu1 %v2425_v60  ;;  %v2482_v60 = vunpack.c.h.s8.bf16 %v2364_v5 }
 0x3ed   :  { %2611 = vmatpush2.bf16.msra.mxu0 %v2466_v52  ;;  %v2481_v52 = vunpack.c.l.s8.bf16 %v2365_v47 }
 0x3ee   :  { %2612 = vmatprep.subr.bf16.mxu0 %v2465_v9  ;;  %v2363_v9 = vld [vmem:[#allocation10 + $0x198] sm:$0xff] }
 0x3ef   :  { %2578 = vmatpush2.bf16.msra.mxu1 %v2424_v34  ;;  %v2480_v34 = vunpack.c.l.s8.bf16 %v2364_v5  ;;  %v2479_v54 = vunpack.c.h.s8.bf16 %v2363_v9 }
 0x3f0   :  { %2633 = vmatprep.subr.bf16.mxu1 %v2487_v57  ;;  %v2477_v57 = vunpack.c.l.s8.bf16 %v2363_v9 }
 0x3f1   :  { %2613 = vmatpush2.bf16.msra.mxu0 %v2464_v62  ;;  %v2361_v62 = vld [vmem:[#allocation10 + $0x188] sm:$0xff] }
 0x3f2   :  { %v1991_v51 = vpop.f32.mrf.mxu1  ;;  %2614 = vmatprep.subr.bf16.mxu0 %v2463_v58  ;;  %v2475_v61 = vunpack.c.h.s8.bf16 %v2361_v62 }
 0x3f3   :  { %v1992_v11 = vadd.f32 %v1991_v51, %v1948_v55  ;;  %v2362_v55 = vld [vmem:[#allocation10 + $0x190] sm:$0xff]  ;;  %v2473_v51 = vunpack.c.l.s8.bf16 %v2361_v62 }
 0x3f4   :  { %v1993_v25 = vpop.f32.mrf.mxu1  ;;  %v2478_v19 = vunpack.c.h.s8.bf16 %v2362_v55  ;;  %v2476_v58 = vunpack.c.l.s8.bf16 %v2362_v55 }
 0x3f5   :  { %v1994_v14 = vadd.f32 %v1993_v25, %v1950_v1  ;;  %2615 = vmatpush2.bf16.msra.mxu0 %v2462_v63  ;;  %v2216_v23 = vmul.f32 %v2185_v12, %v1992_v11  ;;  %v2360_v1 = vld [vmem:[#allocation10 + $0x180] sm:$0xff]  ;;  %v2373_v25 = vld [vmem:[#allocation10 + $0x1e8] sm:$0xff] }
 0x3f6   :  { %v1995_v43 = vpop.f32.mrf.mxu1  ;;  %2616 = vmatprep.subr.bf16.mxu0 %v2461_v2  ;;  %v2474_v63 = vunpack.c.h.s8.bf16 %v2360_v1  ;;  %v2375_v2 = vld [vmem:[#allocation10 + $0x1f8] sm:$0xff]  ;;  %v2497_v16 = vunpack.c.l.s8.bf16 %v2373_v25 }
 0x3f7   :  { %v2217_v38 = vmul.f32 %v2189_v4, %v1994_v14  ;;  %v1996_v22 = vadd.f32 %v1995_v43, %v1952_v7  ;;  %v2274_v29 = vadd.f32 %v2243_v24, %v2216_v23  ;;  %v2503_v6 = vunpack.c.h.s8.bf16 %v2375_v2  ;;  %v2374_v7 = vld [vmem:[#allocation10 + $0x1f0] sm:$0xff]  ;;  %v2372_v43 = vld [vmem:[#allocation10 + $0x1e0] sm:$0xff] }
 0x3f8   :  { %v1997_v48 = vpop.f32.mrf.mxu1  ;;  %v2502_v11 = vunpack.c.h.s8.bf16 %v2374_v7  ;;  %v2500_v14 = vunpack.c.l.s8.bf16 %v2374_v7  ;;  %v2370_v23 = vld [vmem:[#allocation10 + $0x1d0] sm:$0xff]  ;;  %v2201_v7 = vrot.slane %v3837_v56, %v3761_v53 }
 0x3f9   :  { %v2224_v13 = vmul.f32 %v2185_v12, %v1996_v22  ;;  %v1998_v0 = vadd.f32 %v1997_v48, %v1954_v41  ;;  %2617 = vmatpush2.bf16.msra.mxu0 %v2460_v15  ;;  %v2275_v26 = vadd.f32 %v2247_v20, %v2217_v38  ;;  %v2290_v3 = vmax.f32 %v2274_v29, 0.0  ;;  %v2371_v38 = vld [vmem:[#allocation10 + $0x1d8] sm:$0xff] }
 0x3fa   :  { %2618 = vmatprep.subr.bf16.mxu0 %v2459_v8  ;;  %v2501_v12 = vunpack.c.l.s8.bf16 %v2375_v2  ;;  %v2499_v15 = vunpack.c.h.s8.bf16 %v2373_v25  ;;  %v2498_v8 = vunpack.c.h.s8.bf16 %v2372_v43  ;;  %v2496_v22 = vunpack.c.l.s8.bf16 %v2372_v43 }
 0x3fb   :  { %v2282_v36 = vadd.f32 %v2243_v24, %v2224_v13  ;;  %v2225_v27 = vmul.f32 %v2189_v4, %v1998_v0  ;;  %v2291_v32 = vmax.f32 %v2275_v26, 0.0  ;;  %v2472_v4 = vunpack.c.l.s8.bf16 %v2360_v1 }
 0x3fc   :  { %v2495_v41 = vunpack.c.h.s8.bf16 %v2371_v38  ;;  %v2494_v48 = vunpack.c.h.s8.bf16 %v2370_v23  ;;  %v2493_v0 = vunpack.c.l.s8.bf16 %v2371_v38  ;;  %v2205_v2 = vrot.slane %v3837_v56, %v3728_v37 }
 0x3fd   :  { %v2283_v46 = vadd.f32 %v2247_v20, %v2225_v27  ;;  %2619 = vmatpush2.bf16.msra.mxu0 %v2458_v21  ;;  %v2298_v30 = vmax.f32 %v2282_v36, 0.0  ;;  %v2034_v20 = vpop.f32.mrf.mxu0  ;;  %v2197_v21 = vrot.slane %v3837_v56, %v3692_v49  ;;  %v2193_v27 = vrot.slane %v3837_v56, %v3752_v17 }
 0x3fe   :  { %2620 = vmatprep.subr.bf16.mxu0 %v2457_v35  ;;  %v2369_v35 = vld [vmem:[#allocation10 + $0x1c8] sm:$0xff]  ;;  %v2259_v38 = vrot.slane %v3844_v10, %v3761_v53 }
 0x3ff   :  { %v2299_v18 = vmax.f32 %v2283_v46, 0.0  ;;  %v2306_v40 = vpack.c.bf16 %v2298_v30, %v2290_v3  ;;  %v2036_v24 = vpop.f32.mrf.mxu0  ;;  %v2491_v31 = vunpack.c.h.s8.bf16 %v2369_v35  ;;  %v2255_v3 = vrot.slane %v3844_v10, %v3692_v49 }
 0x401   :  { %v2307_v28 = vpack.c.bf16 %v2299_v18, %v2291_v32  ;;  %2621 = vmatpush2.bf16.msra.mxu0 %v2456_v59  ;;  %v2038_v26 = vpop.f32.mrf.mxu0  ;;  %v2492_v59 = vunpack.c.l.s8.bf16 %v2370_v23  ;;  %v2368_v32 = vld [vmem:[#allocation10 + $0x1c0] sm:$0xff] }
 0x402   :  { %v2490_v5 = vunpack.c.h.s8.bf16 %v2368_v32  ;;  %v2488_v49 = vunpack.c.l.s8.bf16 %v2368_v32  ;;  %v2718_v32 = vld [vmem:[#allocation11 + $0x20] sm:$0xff] }
 0x403   :  { %2579 = vmatprep.mubr.bf16.mxu1 %v2307_v28 }
 0x404   :  { %2580 = vmatmul.mubr.bf16.vlgmr.msra.gmra.mxu1 %v2306_v40 }
 0x405   :  { %2634 = vmatpush1.bf16.msra.mxu1 %v2486_v39  ;;  %v2040_v39 = vpop.f32.mrf.mxu0 }
 0x406   :  { %2635 = vmatprep.subr.bf16.mxu1 %v2485_v45  ;;  %v2251_v45 = vrot.slane %v3844_v10, %v3752_v17 }
 0x407   :  { %v2120_v1 = vpop.f32.mrf.mxu0 }
 0x409   :  { %2636 = vmatpush1.bf16.msra.mxu1 %v2484_v50 }
 0x40a   :  { %2637 = vmatprep.subr.bf16.mxu1 %v2483_v33 }
 0x40d   :  { %2638 = vmatpush1.bf16.msra.mxu1 %v2482_v60  ;;  %v2489_v60 = vunpack.c.l.s8.bf16 %v2369_v35 }
 0x40e   :  { %2639 = vmatprep.subr.bf16.mxu1 %v2481_v52 }
 0x411   :  { %2640 = vmatpush1.bf16.msra.mxu1 %v2480_v34 }
 0x412   :  { %2641 = vmatprep.subr.bf16.mxu1 %v2479_v54 }
 0x415   :  { %2642 = vmatpush1.bf16.msra.mxu1 %v2478_v19 }
 0x416   :  { %2643 = vmatprep.subr.bf16.mxu1 %v2477_v57 }
 0x419   :  { %2644 = vmatpush1.bf16.msra.mxu1 %v2476_v58 }
 0x41a   :  { %2645 = vmatprep.subr.bf16.mxu1 %v2475_v61 }
 0x41d   :  { %2646 = vmatpush1.bf16.msra.mxu1 %v2474_v63  ;;  %v2122_v63 = vpop.f32.mrf.mxu0 }
 0x41e   :  { %2647 = vmatprep.subr.bf16.mxu1 %v2473_v51 }
 0x421   :  { %2648 = vmatpush1.bf16.msra.mxu1 %v2472_v4  ;;  %v2124_v4 = vpop.f32.mrf.mxu0 }
 0x422   :  { %2649 = vmatprep.subr.bf16.mxu1 %v2503_v6 }
 0x425   :  { %2650 = vmatpush2.bf16.msra.mxu1 %v2502_v11 }
 0x426   :  { %2651 = vmatprep.subr.bf16.mxu1 %v2501_v12 }
 0x429   :  { %2652 = vmatpush2.bf16.msra.mxu1 %v2500_v14 }
 0x42a   :  { %2653 = vmatprep.subr.bf16.mxu1 %v2499_v15  ;;  %v2263_v15 = vrot.slane %v3844_v10, %v3728_v37 }
 0x42d   :  { %2654 = vmatpush2.bf16.msra.mxu1 %v2498_v8  ;;  %v2126_v8 = vpop.f32.mrf.mxu0 }
 0x42e   :  { %2655 = vmatprep.subr.bf16.mxu1 %v2497_v16 }
 0x431   :  { %2656 = vmatpush2.bf16.msra.mxu1 %v2496_v22 }
 0x432   :  { %v2077_v13 = vpop.f32.mrf.mxu1  ;;  %2657 = vmatprep.subr.bf16.mxu1 %v2495_v41 }
 0x433   :  { %v2078_v36 = vadd.f32 %v2077_v13, %v2034_v20 }
 0x434   :  { %v2079_v29 = vpop.f32.mrf.mxu1 }
 0x435   :  { %v2080_v46 = vadd.f32 %v2079_v29, %v2036_v24  ;;  %2658 = vmatpush2.bf16.msra.mxu1 %v2494_v48  ;;  %v2218_v40 = vmul.f32 %v2193_v27, %v2078_v36  ;;  %v2720_v29 = vld [vmem:[#allocation11 + $0x30] sm:$0xff] }
 0x436   :  { %v2081_v30 = vpop.f32.mrf.mxu1  ;;  %2659 = vmatprep.subr.bf16.mxu1 %v2493_v0  ;;  %v2744_v53 = vunpack.c.h.s8.bf16 %v2720_v29 }
 0x437   :  { %v2219_v18 = vmul.f32 %v2197_v21, %v2080_v46  ;;  %v2082_v28 = vadd.f32 %v2081_v30, %v2038_v26  ;;  %v2276_v54 = vadd.f32 %v2251_v45, %v2218_v40  ;;  %v2742_v30 = vunpack.c.l.s8.bf16 %v2720_v29 }
 0x438   :  { %v2083_v47 = vpop.f32.mrf.mxu1 }
 0x439   :  { %v2226_v50 = vmul.f32 %v2193_v27, %v2082_v28  ;;  %v2084_v33 = vadd.f32 %v2083_v47, %v2040_v39  ;;  %2660 = vmatpush2.bf16.msra.mxu1 %v2492_v59  ;;  %v2277_v52 = vadd.f32 %v2255_v3, %v2219_v18  ;;  %v2292_v58 = vmax.f32 %v2276_v54, 0.0  ;;  %v2721_v27 = vld [vmem:[#allocation11 + $0x38] sm:$0xff]  ;;  %v2719_v59 = vld [vmem:[#allocation11 + $0x28] sm:$0xff] }
 0x43a   :  { %2661 = vmatprep.subr.bf16.mxu1 %v2491_v31  ;;  %v2745_v46 = vunpack.c.h.s8.bf16 %v2721_v27  ;;  %v2743_v10 = vunpack.c.l.s8.bf16 %v2721_v27  ;;  %v2741_v31 = vunpack.c.h.s8.bf16 %v2719_v59  ;;  %v2740_v18 = vunpack.c.h.s8.bf16 %v2718_v32  ;;  %v2717_v28 = vld [vmem:[#allocation11 + $0x18] sm:$0xff]  ;;  %v2846_v27 = vld [vmem:[#allocation11 + $0x90] sm:$0xff] }
 0x43b   :  { %v2284_v9 = vadd.f32 %v2251_v45, %v2226_v50  ;;  %v2227_v34 = vmul.f32 %v2197_v21, %v2084_v33  ;;  %v2293_v57 = vmax.f32 %v2277_v52, 0.0  ;;  %v2738_v39 = vunpack.c.l.s8.bf16 %v2718_v32  ;;  %v2716_v45 = vld [vmem:[#allocation11 + $0x10] sm:$0xff]  ;;  %v2715_v33 = vld [vmem:[#allocation11 + $0x8] sm:$0xff]  ;;  %v2714_v52 = vld [vmem:[#allocation11] sm:$0xff] }
 0x43c   :  { %2762 = vmatprep.subr.bf16.mxu0 %v2745_v46  ;;  %v2737_v40 = vunpack.c.h.s8.bf16 %v2717_v28  ;;  %v2736_v47 = vunpack.c.h.s8.bf16 %v2716_v45  ;;  %v2735_v50 = vunpack.c.l.s8.bf16 %v2717_v28  ;;  %v2729_v54 = vld [vmem:[#allocation11 + $0x78] sm:$0xff]  ;;  %v2866_v29 = vunpack.c.h.s8.bf16 %v2846_v27 }
 0x43d   :  { %v2285_v55 = vadd.f32 %v2255_v3, %v2227_v34  ;;  %2662 = vmatpush2.bf16.msra.mxu1 %v2490_v5  ;;  %v2300_v19 = vmax.f32 %v2284_v9, 0.0  ;;  %v2739_v3 = vunpack.c.l.s8.bf16 %v2719_v59  ;;  %v2734_v5 = vunpack.c.l.s8.bf16 %v2716_v45 }
 0x43e   :  { %2663 = vmatprep.subr.bf16.mxu1 %v2489_v60  ;;  %v2733_v60 = vunpack.c.h.s8.bf16 %v2715_v33  ;;  %v2732_v9 = vunpack.c.h.s8.bf16 %v2714_v52  ;;  %v2731_v34 = vunpack.c.l.s8.bf16 %v2715_v33 }
 0x43f   :  { %v2301_v62 = vmax.f32 %v2285_v55, 0.0  ;;  %v2308_v61 = vpack.c.bf16 %v2300_v19, %v2292_v58  ;;  %v2730_v55 = vunpack.c.l.s8.bf16 %v2714_v52  ;;  %v2728_v19 = vld [vmem:[#allocation11 + $0x70] sm:$0xff]  ;;  %v2727_v58 = vld [vmem:[#allocation11 + $0x68] sm:$0xff] }
 0x441   :  { %v2309_v17 = vpack.c.bf16 %v2301_v62, %v2293_v57  ;;  %2664 = vmatpush2.bf16.msra.mxu1 %v2488_v49  ;;  %v2761_v49 = vunpack.c.h.s8.bf16 %v2729_v54  ;;  %v2760_v57 = vunpack.c.h.s8.bf16 %v2728_v19  ;;  %v2759_v62 = vunpack.c.l.s8.bf16 %v2729_v54 }
 0x443   :  { %2622 = vmatprep.mubr.bf16.mxu0 %v2309_v17  ;;  %v2758_v17 = vunpack.c.l.s8.bf16 %v2728_v19 }
 0x444   :  { %2623 = vmatmul.mubr.bf16.vlgmr.msra.gmra.mxu0 %v2308_v61  ;;  %v2757_v61 = vunpack.c.h.s8.bf16 %v2727_v58 }
 0x445   :  { %2763 = vmatpush1.bf16.msra.mxu0 %v2744_v53  ;;  %v2845_v53 = vld [vmem:[#allocation11 + $0x88] sm:$0xff] }
 0x446   :  { %2764 = vmatprep.subr.bf16.mxu0 %v2743_v10  ;;  %v2864_v10 = vunpack.c.l.s8.bf16 %v2846_v27  ;;  %v2863_v59 = vunpack.c.h.s8.bf16 %v2845_v53  ;;  %v2861_v32 = vunpack.c.l.s8.bf16 %v2845_v53 }
 0x449   :  { %2765 = vmatpush1.bf16.msra.mxu0 %v2742_v30  ;;  %v2844_v30 = vld [vmem:[#allocation11 + $0x80] sm:$0xff] }
 0x44a   :  { %2766 = vmatprep.subr.bf16.mxu0 %v2741_v31  ;;  %v2862_v31 = vunpack.c.h.s8.bf16 %v2844_v30 }
 0x44d   :  { %2767 = vmatpush1.bf16.msra.mxu0 %v2740_v18  ;;  %v2859_v18 = vld [vmem:[#allocation11 + $0xf8] sm:$0xff] }
 0x44e   :  { %2768 = vmatprep.subr.bf16.mxu0 %v2739_v3  ;;  %v2860_v3 = vunpack.c.l.s8.bf16 %v2844_v30  ;;  %v2891_v28 = vunpack.c.h.s8.bf16 %v2859_v18  ;;  %v2889_v45 = vunpack.c.l.s8.bf16 %v2859_v18 }
 0x451   :  { %2769 = vmatpush1.bf16.msra.mxu0 %v2738_v39  ;;  %v2858_v39 = vld [vmem:[#allocation11 + $0xf0] sm:$0xff] }
 0x452   :  { %2770 = vmatprep.subr.bf16.mxu0 %v2737_v40  ;;  %v2890_v40 = vunpack.c.h.s8.bf16 %v2858_v39 }
 0x455   :  { %2771 = vmatpush1.bf16.msra.mxu0 %v2736_v47  ;;  %v2857_v47 = vld [vmem:[#allocation11 + $0xe8] sm:$0xff] }
 0x456   :  { %2772 = vmatprep.subr.bf16.mxu0 %v2735_v50  ;;  %v2888_v50 = vunpack.c.l.s8.bf16 %v2858_v39  ;;  %v2887_v33 = vunpack.c.h.s8.bf16 %v2857_v47  ;;  %v2885_v52 = vunpack.c.l.s8.bf16 %v2857_v47 }
 0x459   :  { %2773 = vmatpush1.bf16.msra.mxu0 %v2734_v5  ;;  %v2856_v5 = vld [vmem:[#allocation11 + $0xe0] sm:$0xff] }
 0x45a   :  { %2774 = vmatprep.subr.bf16.mxu0 %v2733_v60  ;;  %v2886_v60 = vunpack.c.h.s8.bf16 %v2856_v5 }
 0x45d   :  { %2775 = vmatpush1.bf16.msra.mxu0 %v2732_v9  ;;  %v2884_v9 = vunpack.c.l.s8.bf16 %v2856_v5 }
 0x45e   :  { %2776 = vmatprep.subr.bf16.mxu0 %v2731_v34 }
 0x461   :  { %2777 = vmatpush1.bf16.msra.mxu0 %v2730_v55 }
 0x462   :  { %2778 = vmatprep.subr.bf16.mxu0 %v2761_v49 }
 0x465   :  { %2779 = vmatpush2.bf16.msra.mxu0 %v2760_v57 }
 0x466   :  { %2780 = vmatprep.subr.bf16.mxu0 %v2759_v62 }
 0x469   :  { %2781 = vmatpush2.bf16.msra.mxu0 %v2758_v17 }
 0x46a   :  { %2782 = vmatprep.subr.bf16.mxu0 %v2757_v61 }
 0x472   :  { %v2163_v51 = vpop.f32.mrf.mxu1 }
 0x473   :  { %v2164_v6 = vadd.f32 %v2163_v51, %v2120_v1  ;;  %v2726_v1 = vld [vmem:[#allocation11 + $0x60] sm:$0xff]  ;;  %v2755_v51 = vunpack.c.l.s8.bf16 %v2727_v58 }
 0x474   :  { %v2165_v11 = vpop.f32.mrf.mxu1 }
 0x475   :  { %v2166_v12 = vadd.f32 %v2165_v11, %v2122_v63  ;;  %v2220_v16 = vmul.f32 %v2201_v7, %v2164_v6  ;;  %v2756_v63 = vunpack.c.h.s8.bf16 %v2726_v1 }
 0x476   :  { %v2167_v25 = vpop.f32.mrf.mxu1 }
 0x477   :  { %v2221_v14 = vmul.f32 %v2205_v2, %v2166_v12  ;;  %v2168_v43 = vadd.f32 %v2167_v25, %v2124_v4  ;;  %v2278_v56 = vadd.f32 %v2259_v38, %v2220_v16  ;;  %2783 = vmatpush2.bf16.msra.mxu0 %v2756_v63  ;;  %v2725_v4 = vld [vmem:[#allocation11 + $0x58] sm:$0xff] }
 0x478   :  { %v2169_v20 = vpop.f32.mrf.mxu1  ;;  %2784 = vmatprep.subr.bf16.mxu0 %v2755_v51  ;;  %v2753_v6 = vunpack.c.h.s8.bf16 %v2725_v4  ;;  %v2751_v12 = vunpack.c.l.s8.bf16 %v2725_v4 }
 0x479   :  { %v2228_v22 = vmul.f32 %v2201_v7, %v2168_v43  ;;  %v2170_v41 = vadd.f32 %v2169_v20, %v2126_v8  ;;  %v2279_v23 = vadd.f32 %v2263_v15, %v2221_v14  ;;  %v2294_v26 = vmax.f32 %v2278_v56, 0.0  ;;  %v2724_v7 = vld [vmem:[#allocation11 + $0x50] sm:$0xff]  ;;  %v2723_v14 = vld [vmem:[#allocation11 + $0x48] sm:$0xff]  ;;  %v2722_v43 = vld [vmem:[#allocation11 + $0x40] sm:$0xff] }
 0x47a   :  { %v2752_v11 = vunpack.c.h.s8.bf16 %v2724_v7  ;;  %v2750_v25 = vunpack.c.l.s8.bf16 %v2724_v7  ;;  %v2748_v8 = vunpack.c.h.s8.bf16 %v2722_v43  ;;  %v2747_v16 = vunpack.c.l.s8.bf16 %v2723_v14  ;;  %v2851_v20 = vld [vmem:[#allocation11 + $0xb8] sm:$0xff] }
 0x47b   :  { %v2286_v24 = vadd.f32 %v2259_v38, %v2228_v22  ;;  %v2229_v48 = vmul.f32 %v2205_v2, %v2170_v41  ;;  %v2295_v21 = vmax.f32 %v2279_v23, 0.0  ;;  %v2754_v2 = vunpack.c.l.s8.bf16 %v2726_v1  ;;  %v2850_v22 = vld [vmem:[#allocation11 + $0xb0] sm:$0xff] }
 0x47c   :  { %v2746_v38 = vunpack.c.l.s8.bf16 %v2722_v43  ;;  %v2875_v41 = vunpack.c.h.s8.bf16 %v2851_v20  ;;  %v2874_v23 = vunpack.c.h.s8.bf16 %v2850_v22  ;;  %v2872_v56 = vunpack.c.l.s8.bf16 %v2850_v22 }
 0x47d   :  { %v2287_v13 = vadd.f32 %v2263_v15, %v2229_v48  ;;  %v2302_v0 = vmax.f32 %v2286_v24, 0.0  ;;  %2785 = vmatpush2.bf16.msra.mxu0 %v2754_v2  ;;  %v2749_v15 = vunpack.c.h.s8.bf16 %v2723_v14  ;;  %v2873_v24 = vunpack.c.l.s8.bf16 %v2851_v20  ;;  %v2849_v48 = vld [vmem:[#allocation11 + $0xa8] sm:$0xff]  ;;  %v2676_v2 = vld [vmem:[#allocation16 + $0x14] sm:$0x3] }
 0x47e   :  { %2786 = vmatprep.subr.bf16.mxu0 %v2753_v6  ;;  %2892 = vmatprep.subr.bf16.mxu1 %v2875_v41 }
 0x47f   :  { %v2303_v35 = vmax.f32 %v2287_v13, 0.0  ;;  %v2310_v37 = vpack.c.bf16 %v2302_v0, %v2294_v26  ;;  %v2871_v13 = vunpack.c.h.s8.bf16 %v2849_v48  ;;  %v2848_v0 = vld [vmem:[#allocation11 + $0xa0] sm:$0xff]  ;;  %v2847_v26 = vld [vmem:[#allocation11 + $0x98] sm:$0xff] }
 0x480   :  { %v2865_v46 = vunpack.c.l.s8.bf16 %v2847_v26 }
 0x481   :  { %v2311_v36 = vpack.c.bf16 %v2303_v35, %v2295_v21  ;;  %2787 = vmatpush2.bf16.msra.mxu0 %v2752_v11  ;;  %v2870_v21 = vunpack.c.h.s8.bf16 %v2848_v0  ;;  %v2869_v35 = vunpack.c.l.s8.bf16 %v2849_v48 }
 0x482   :  { %2788 = vmatprep.subr.bf16.mxu0 %v2751_v12  ;;  %v2685_v12 = vrot.slane %v2676_v2, %v3678_v42 }
 0x483   :  { %2665 = vmatprep.mubr.bf16.mxu1 %v2311_v36  ;;  %v2868_v36 = vunpack.c.l.s8.bf16 %v2848_v0 }
 0x484   :  { %2666 = vmatmul.mubr.bf16.vlgmr.msra.gmra.mxu1 %v2310_v37  ;;  %v2867_v37 = vunpack.c.h.s8.bf16 %v2847_v26  ;;  %v2538_v34 = vpop.f32.mrf.mxu0 }
 0x485   :  { %2789 = vmatpush2.bf16.msra.mxu0 %v2750_v25  ;;  %2893 = vmatpush1.bf16.msra.mxu1 %v2874_v23 }
 0x486   :  { %2790 = vmatprep.subr.bf16.mxu0 %v2749_v15  ;;  %2894 = vmatprep.subr.bf16.mxu1 %v2873_v24  ;;  %v2540_v54 = vpop.f32.mrf.mxu0  ;;  %v2681_v15 = vrot.slane %v2676_v2, %v3683_v44 }
 0x488   :  { %v2542_v55 = vpop.f32.mrf.mxu0 }
 0x489   :  { %2791 = vmatpush2.bf16.msra.mxu0 %v2748_v8  ;;  %2895 = vmatpush1.bf16.msra.mxu1 %v2872_v56 }
 0x48a   :  { %2792 = vmatprep.subr.bf16.mxu0 %v2747_v16  ;;  %2896 = vmatprep.subr.bf16.mxu1 %v2871_v13  ;;  %v2544_v19 = vpop.f32.mrf.mxu0 }
 0x48d   :  { %2793 = vmatpush2.bf16.msra.mxu0 %v2746_v38  ;;  %2897 = vmatpush1.bf16.msra.mxu1 %v2870_v21  ;;  %v2692_v38 = vld [vmem:[#allocation14 + $0x14] sm:$0x3] }
 0x48e   :  { %2898 = vmatprep.subr.bf16.mxu1 %v2869_v35  ;;  %v2701_v24 = vrot.slane %v2692_v38, %v3678_v42  ;;  %v2697_v13 = vrot.slane %v2692_v38, %v3683_v44 }
 0x491   :  { %2899 = vmatpush1.bf16.msra.mxu1 %v2868_v36 }
 0x492   :  { %2900 = vmatprep.subr.bf16.mxu1 %v2867_v37 }
 0x495   :  { %2901 = vmatpush1.bf16.msra.mxu1 %v2866_v29 }
 0x496   :  { %2902 = vmatprep.subr.bf16.mxu1 %v2865_v46 }
 0x499   :  { %2903 = vmatpush1.bf16.msra.mxu1 %v2864_v10 }
 0x49a   :  { %2904 = vmatprep.subr.bf16.mxu1 %v2863_v59 }
 0x49d   :  { %2905 = vmatpush1.bf16.msra.mxu1 %v2862_v31 }
 0x49e   :  { %2906 = vmatprep.subr.bf16.mxu1 %v2861_v32  ;;  %v2855_v32 = vld [vmem:[#allocation11 + $0xd8] sm:$0xff] }
 0x49f   :  { %v2883_v18 = vunpack.c.h.s8.bf16 %v2855_v32  ;;  %v2881_v39 = vunpack.c.l.s8.bf16 %v2855_v32 }
 0x4a1   :  { %2907 = vmatpush1.bf16.msra.mxu1 %v2860_v3  ;;  %v2854_v3 = vld [vmem:[#allocation11 + $0xd0] sm:$0xff] }
 0x4a2   :  { %2908 = vmatprep.subr.bf16.mxu1 %v2891_v28  ;;  %v2882_v28 = vunpack.c.h.s8.bf16 %v2854_v3 }
 0x4a5   :  { %2909 = vmatpush2.bf16.msra.mxu1 %v2890_v40  ;;  %v2880_v40 = vunpack.c.l.s8.bf16 %v2854_v3 }
 0x4a6   :  { %2910 = vmatprep.subr.bf16.mxu1 %v2889_v45  ;;  %v2853_v45 = vld [vmem:[#allocation11 + $0xc8] sm:$0xff] }
 0x4a7   :  { %v2879_v47 = vunpack.c.h.s8.bf16 %v2853_v45  ;;  %v2877_v5 = vunpack.c.l.s8.bf16 %v2853_v45 }
 0x4a9   :  { %2911 = vmatpush2.bf16.msra.mxu1 %v2888_v50  ;;  %v2852_v50 = vld [vmem:[#allocation11 + $0xc0] sm:$0xff] }
 0x4aa   :  { %2912 = vmatprep.subr.bf16.mxu1 %v2887_v33  ;;  %v2878_v33 = vunpack.c.h.s8.bf16 %v2852_v50 }
 0x4ad   :  { %2913 = vmatpush2.bf16.msra.mxu1 %v2886_v60  ;;  %v2876_v60 = vunpack.c.l.s8.bf16 %v2852_v50 }
 0x4ae   :  { %2914 = vmatprep.subr.bf16.mxu1 %v2885_v52  ;;  %v2981_v52 = vld [vmem:[#allocation11 + $0x138] sm:$0xff] }
 0x4b1   :  { %2915 = vmatpush2.bf16.msra.mxu1 %v2884_v9  ;;  %v2980_v9 = vld [vmem:[#allocation11 + $0x130] sm:$0xff] }
 0x4b2   :  { %2916 = vmatprep.subr.bf16.mxu1 %v2883_v18 }
 0x4b5   :  { %2917 = vmatpush2.bf16.msra.mxu1 %v2882_v28 }
 0x4b6   :  { %2918 = vmatprep.subr.bf16.mxu1 %v2881_v39 }
 0x4b9   :  { %2919 = vmatpush2.bf16.msra.mxu1 %v2880_v40 }
 0x4ba   :  { %2920 = vmatprep.subr.bf16.mxu1 %v2879_v47 }
 0x4bd   :  { %2921 = vmatpush2.bf16.msra.mxu1 %v2878_v33 }
 0x4be   :  { %2922 = vmatprep.subr.bf16.mxu1 %v2877_v5  ;;  %v2985_v5 = vld [vmem:[#allocation11 + $0x158] sm:$0xff] }
 0x4c1   :  { %2923 = vmatpush2.bf16.msra.mxu1 %v2876_v60  ;;  %v3013_v60 = vunpack.c.h.s8.bf16 %v2985_v5 }
 0x4c4   :  { %v2581_v49 = vpop.f32.mrf.mxu1 }
 0x4c5   :  { %v2582_v61 = vadd.f32 %v2581_v49, %v2538_v34  ;;  %v3005_v34 = vunpack.c.h.s8.bf16 %v2981_v52  ;;  %v2979_v49 = vld [vmem:[#allocation11 + $0x128] sm:$0xff] }
 0x4c6   :  { %v2583_v57 = vpop.f32.mrf.mxu1 }
 0x4c7   :  { %v2584_v51 = vadd.f32 %v2583_v57, %v2540_v54  ;;  %v3004_v54 = vunpack.c.h.s8.bf16 %v2980_v9  ;;  %3022 = vmatprep.subr.bf16.mxu0 %v3005_v34  ;;  %v3001_v57 = vunpack.c.h.s8.bf16 %v2979_v49  ;;  %v3011_v34 = vunpack.c.l.s8.bf16 %v2985_v5 }
 0x4c8   :  { %v2585_v58 = vpop.f32.mrf.mxu1 }
 0x4c9   :  { %v2586_v7 = vadd.f32 %v2585_v58, %v2542_v55  ;;  %v3003_v55 = vunpack.c.l.s8.bf16 %v2981_v52  ;;  %v2984_v52 = vld [vmem:[#allocation11 + $0x150] sm:$0xff] }
 0x4ca   :  { %v2587_v1 = vpop.f32.mrf.mxu1 }
 0x4cb   :  { %v2588_v8 = vadd.f32 %v2587_v1, %v2544_v19  ;;  %v3002_v19 = vunpack.c.l.s8.bf16 %v2980_v9  ;;  %v3012_v9 = vunpack.c.h.s8.bf16 %v2984_v52 }
 0x504   :  { %v2624_v62 = vpop.f32.mrf.mxu0 }
 0x505   :  { %v2625_v4 = vadd.f32 %v2624_v62, %v2582_v61  ;;  %v2978_v62 = vld [vmem:[#allocation11 + $0x120] sm:$0xff]  ;;  %v2977_v61 = vld [vmem:[#allocation11 + $0x118] sm:$0xff] }
 0x506   :  { %v2626_v17 = vpop.f32.mrf.mxu0  ;;  %v3000_v58 = vunpack.c.h.s8.bf16 %v2978_v62  ;;  %v2998_v1 = vunpack.c.l.s8.bf16 %v2978_v62 }
 0x507   :  { %v2627_v11 = vadd.f32 %v2626_v17, %v2584_v51  ;;  %v2999_v17 = vunpack.c.l.s8.bf16 %v2979_v49  ;;  %v2976_v51 = vld [vmem:[#allocation11 + $0x110] sm:$0xff] }
 0x508   :  { %v2628_v63 = vpop.f32.mrf.mxu0  ;;  %v2996_v2 = vunpack.c.h.s8.bf16 %v2976_v51 }
 0x509   :  { %v2629_v16 = vadd.f32 %v2628_v63, %v2586_v7  ;;  %v2997_v63 = vunpack.c.h.s8.bf16 %v2977_v61  ;;  %v2994_v7 = vunpack.c.l.s8.bf16 %v2976_v51 }
 0x50a   :  { %v2630_v25 = vpop.f32.mrf.mxu0 }
 0x50b   :  { %v2631_v41 = vadd.f32 %v2630_v25, %v2588_v8 }
 0x544   :  { %v2667_v6 = vpop.f32.mrf.mxu1 }
 0x545   :  { %v2668_v14 = vadd.f32 %v2667_v6, %v2625_v4  ;;  %v2995_v4 = vunpack.c.l.s8.bf16 %v2977_v61  ;;  %v2975_v6 = vld [vmem:[#allocation11 + $0x108] sm:$0xff]  ;;  %v3106_v61 = vld [vmem:[#allocation13 + $0x18] sm:$0xff] }
 0x546   :  { %v2669_v43 = vpop.f32.mrf.mxu1 }
 0x547   :  { %v2670_v20 = vadd.f32 %v2669_v43, %v2627_v11  ;;  %v2688_v56 = vmul.f32 %v2681_v15, %v2668_v14  ;;  %v2993_v11 = vunpack.c.h.s8.bf16 %v2975_v6  ;;  %v2991_v14 = vunpack.c.l.s8.bf16 %v2975_v6 }
 0x548   :  { %v2671_v22 = vpop.f32.mrf.mxu1 }
 0x549   :  { %v2689_v23 = vmul.f32 %v2685_v12, %v2670_v20  ;;  %v2672_v48 = vadd.f32 %v2671_v22, %v2629_v16  ;;  %v2704_v27 = vadd.f32 %v2697_v13, %v2688_v56  ;;  %v2988_v16 = vld [vmem:[#allocation11 + $0x170] sm:$0xff]  ;;  %v2987_v22 = vld [vmem:[#allocation11 + $0x168] sm:$0xff] }
 0x54a   :  { %v2673_v0 = vpop.f32.mrf.mxu1  ;;  %v3020_v38 = vunpack.c.h.s8.bf16 %v2988_v16  ;;  %v3015_v56 = vunpack.c.l.s8.bf16 %v2987_v22 }
 0x54b   :  { %v2690_v21 = vmul.f32 %v2681_v15, %v2672_v48  ;;  %v2674_v35 = vadd.f32 %v2673_v0, %v2631_v41  ;;  %v2705_v26 = vadd.f32 %v2701_v24, %v2689_v23  ;;  %v2708_v59 = vmax.f32 %v2704_v27, 0.0  ;;  %v2989_v15 = vld [vmem:[#allocation11 + $0x178] sm:$0xff]  ;;  %v2805_v0 = vld [vmem:[#allocation16 + $0x16] sm:$0x3] }
 0x54c   :  { %v3021_v8 = vunpack.c.h.s8.bf16 %v2989_v15  ;;  %v3019_v20 = vunpack.c.l.s8.bf16 %v2989_v15  ;;  %v3018_v41 = vunpack.c.l.s8.bf16 %v2988_v16  ;;  %v3017_v23 = vunpack.c.h.s8.bf16 %v2987_v22  ;;  %v2951_v16 = vld [vmem:[#allocation14 + $0x18] sm:$0x3] }
 0x54d   :  { %v2706_v36 = vadd.f32 %v2697_v13, %v2690_v21  ;;  %v2691_v37 = vmul.f32 %v2685_v12, %v2674_v35  ;;  %v2709_v53 = vmax.f32 %v2705_v26, 0.0  ;;  %v2974_v12 = vld [vmem:[#allocation11 + $0x100] sm:$0xff]  ;;  %v2814_v21 = vrot.slane %v2805_v0, %v3678_v42 }
 0x54e   :  { %v2992_v25 = vunpack.c.h.s8.bf16 %v2974_v12  ;;  %v2990_v43 = vunpack.c.l.s8.bf16 %v2974_v12  ;;  %v2810_v26 = vrot.slane %v2805_v0, %v3683_v44  ;;  %v2960_v22 = vrot.slane %v2951_v16, %v3678_v42 }
 0x54f   :  { %v2707_v29 = vadd.f32 %v2701_v24, %v2691_v37  ;;  %v2710_v46 = vmax.f32 %v2706_v36, 0.0  ;;  %v2986_v24 = vld [vmem:[#allocation11 + $0x160] sm:$0xff]  ;;  %v2821_v36 = vld [vmem:[#allocation14 + $0x16] sm:$0x3] }
 0x550   :  { %v3016_v48 = vunpack.c.h.s8.bf16 %v2986_v24  ;;  %v3014_v13 = vunpack.c.l.s8.bf16 %v2986_v24 }
 0x551   :  { %v2711_v10 = vmax.f32 %v2707_v29, 0.0  ;;  %v2712_v31 = vpack.c.bf16 %v2710_v46, %v2708_v59  ;;  %v2830_v29 = vrot.slane %v2821_v36, %v3678_v42 }
 0x553   :  { %v2713_v30 = vpack.c.bf16 %v2711_v10, %v2709_v53  ;;  %v2826_v53 = vrot.slane %v2821_v36, %v3683_v44 }
 0x555   :  { %2794 = vmatprep.mubr.bf16.mxu0 %v2713_v30 }
 0x556   :  { %2795 = vmatmul.mubr.bf16.vlgmr.msra.gmra.mxu0 %v2712_v31 }
 0x557   :  { %3023 = vmatpush1.bf16.msra.mxu0 %v3004_v54  ;;  %v3010_v54 = vunpack.c.l.s8.bf16 %v2984_v52  ;;  %v3081_v52 = vld [vmem:[#allocation14 + $0x1a] sm:$0x3] }
 0x558   :  { %3024 = vmatprep.subr.bf16.mxu0 %v3003_v55  ;;  %v2983_v55 = vld [vmem:[#allocation11 + $0x148] sm:$0xff] }
 0x559   :  { %v3009_v49 = vunpack.c.h.s8.bf16 %v2983_v55  ;;  %v3007_v62 = vunpack.c.l.s8.bf16 %v2983_v55 }
 0x55b   :  { %3025 = vmatpush1.bf16.msra.mxu0 %v3002_v19  ;;  %v2982_v19 = vld [vmem:[#allocation11 + $0x140] sm:$0xff] }
 0x55c   :  { %3026 = vmatprep.subr.bf16.mxu0 %v3001_v57  ;;  %v3008_v57 = vunpack.c.h.s8.bf16 %v2982_v19 }
 0x55f   :  { %3027 = vmatpush1.bf16.msra.mxu0 %v3000_v58  ;;  %v3006_v58 = vunpack.c.l.s8.bf16 %v2982_v19 }
 0x560   :  { %3028 = vmatprep.subr.bf16.mxu0 %v2999_v17  ;;  %v3110_v17 = vld [vmem:[#allocation13 + $0x38] sm:$0xff] }
 0x561   :  { %v3125_v51 = vunpack.c.l.s8.bf16 %v3110_v17 }
 0x563   :  { %3029 = vmatpush1.bf16.msra.mxu0 %v2998_v1  ;;  %v3126_v1 = vunpack.c.h.s8.bf16 %v3110_v17 }
 0x564   :  { %3030 = vmatprep.subr.bf16.mxu0 %v2997_v63  ;;  %v3118_v63 = vunpack.c.h.s8.bf16 %v3106_v61 }
 0x565   :  { %3243 = vmatprep.subr.bf16.mxu1 %v3126_v1 }
 0x567   :  { %3031 = vmatpush1.bf16.msra.mxu0 %v2996_v2  ;;  %v3109_v2 = vld [vmem:[#allocation13 + $0x30] sm:$0xff] }
 0x568   :  { %3032 = vmatprep.subr.bf16.mxu0 %v2995_v4  ;;  %v3117_v4 = vunpack.c.l.s8.bf16 %v3106_v61  ;;  %v3124_v6 = vunpack.c.h.s8.bf16 %v3109_v2  ;;  %v3123_v12 = vunpack.c.l.s8.bf16 %v3109_v2 }
 0x56b   :  { %3033 = vmatpush1.bf16.msra.mxu0 %v2994_v7  ;;  %v3105_v7 = vld [vmem:[#allocation13 + $0x10] sm:$0xff] }
 0x56c   :  { %3034 = vmatprep.subr.bf16.mxu0 %v2993_v11  ;;  %v3116_v11 = vunpack.c.h.s8.bf16 %v3105_v7 }
 0x56f   :  { %3035 = vmatpush1.bf16.msra.mxu0 %v2992_v25  ;;  %v3115_v25 = vunpack.c.l.s8.bf16 %v3105_v7 }
 0x570   :  { %3036 = vmatprep.subr.bf16.mxu0 %v2991_v14  ;;  %v2935_v14 = vld [vmem:[#allocation16 + $0x18] sm:$0x3] }
 0x571   :  { %v2944_v15 = vrot.slane %v2935_v14, %v3678_v42 }
 0x573   :  { %3037 = vmatpush1.bf16.msra.mxu0 %v2990_v43 }
 0x574   :  { %3038 = vmatprep.subr.bf16.mxu0 %v3021_v8  ;;  %v2940_v8 = vrot.slane %v2935_v14, %v3683_v44  ;;  %v3242_v14 = vld [vmem:[#allocation14 + $0x1c] ss:$0 sm:$0xff] }
 0x577   :  { %3039 = vmatpush2.bf16.msra.mxu0 %v3020_v38 }
 0x578   :  { %3040 = vmatprep.subr.bf16.mxu0 %v3019_v20 }
 0x57b   :  { %3041 = vmatpush2.bf16.msra.mxu0 %v3018_v41 }
 0x57c   :  { %3042 = vmatprep.subr.bf16.mxu0 %v3017_v23  ;;  %v2956_v23 = vrot.slane %v2951_v16, %v3683_v44 }
 0x57f   :  { %3043 = vmatpush2.bf16.msra.mxu0 %v3016_v48 }
 0x580   :  { %3044 = vmatprep.subr.bf16.mxu0 %v3015_v56 }
 0x583   :  { %3045 = vmatpush2.bf16.msra.mxu0 %v3014_v13 }
 0x584   :  { %3046 = vmatprep.subr.bf16.mxu0 %v3013_v60 }
 0x587   :  { %3047 = vmatpush2.bf16.msra.mxu0 %v3012_v9 }
 0x588   :  { %3048 = vmatprep.subr.bf16.mxu0 %v3011_v34 }
 0x58b   :  { %3049 = vmatpush2.bf16.msra.mxu0 %v3010_v54  ;;  %v3090_v54 = vrot.slane %v3081_v52, %v3678_v42 }
 0x58c   :  { %3050 = vmatprep.subr.bf16.mxu0 %v3009_v49  ;;  %v3086_v49 = vrot.slane %v3081_v52, %v3683_v44 }
 0x58f   :  { %3051 = vmatpush2.bf16.msra.mxu0 %v3008_v57 }
 0x590   :  { %3052 = vmatprep.subr.bf16.mxu0 %v3007_v62 }
 0x593   :  { %3053 = vmatpush2.bf16.msra.mxu0 %v3006_v58 }
 0x616   :  { %v2796_v35 = vpop.f32.mrf.mxu0 }
 0x617   :  { %v2817_v46 = vmul.f32 %v2810_v26, %v2796_v35 }
 0x618   :  { %v2798_v37 = vpop.f32.mrf.mxu0 }
 0x619   :  { %v2818_v27 = vmul.f32 %v2814_v21, %v2798_v37  ;;  %v2833_v3 = vadd.f32 %v2826_v53, %v2817_v46 }
 0x61a   :  { %v2800_v10 = vpop.f32.mrf.mxu0 }
 0x61b   :  { %v2819_v59 = vmul.f32 %v2810_v26, %v2800_v10  ;;  %v2834_v31 = vadd.f32 %v2830_v29, %v2818_v27  ;;  %v2837_v47 = vmax.f32 %v2833_v3, 0.0  ;;  %v3108_v10 = vld [vmem:[#allocation13 + $0x28] sm:$0xff]  ;;  %v3107_v3 = vld [vmem:[#allocation13 + $0x20] sm:$0xff] }
 0x61c   :  { %v2802_v30 = vpop.f32.mrf.mxu0 }
 0x61d   :  { %v2835_v32 = vadd.f32 %v2826_v53, %v2819_v59  ;;  %v2820_v18 = vmul.f32 %v2814_v21, %v2802_v30  ;;  %v2838_v40 = vmax.f32 %v2834_v31, 0.0  ;;  %v3122_v59 = vunpack.c.h.s8.bf16 %v3108_v10  ;;  %v3104_v30 = vld [vmem:[#allocation13 + $0x8] sm:$0xff] }
 0x61e   :  { %v3114_v31 = vunpack.c.h.s8.bf16 %v3104_v30 }
 0x61f   :  { %v2836_v28 = vadd.f32 %v2830_v29, %v2820_v18  ;;  %v2839_v39 = vmax.f32 %v2835_v32, 0.0  ;;  %v3121_v32 = vunpack.c.l.s8.bf16 %v3108_v10  ;;  %v3113_v18 = vunpack.c.l.s8.bf16 %v3104_v30 }
 0x621   :  { %v2840_v45 = vmax.f32 %v2836_v28, 0.0  ;;  %v2841_v33 = vpack.c.bf16 %v2839_v39, %v2837_v47  ;;  %v3120_v28 = vunpack.c.h.s8.bf16 %v3107_v3  ;;  %v3103_v39 = vld [vmem:[#allocation13] sm:$0xff] }
 0x622   :  { %v3111_v47 = vunpack.c.l.s8.bf16 %v3103_v39 }
 0x623   :  { %v2842_v50 = vpack.c.bf16 %v2840_v45, %v2838_v40  ;;  %v3112_v40 = vunpack.c.h.s8.bf16 %v3103_v39  ;;  %v3119_v45 = vunpack.c.l.s8.bf16 %v3107_v3 }
 0x625   :  { %2924 = vmatprep.mubr.bf16.mxu1 %v2842_v50  ;;  %v3065_v50 = vld [vmem:[#allocation16 + $0x1a] sm:$0x3] }
 0x626   :  { %2925 = vmatmul.mubr.bf16.vlgmr.msra.gmra.mxu1 %v2841_v33  ;;  %v3074_v33 = vrot.slane %v3065_v50, %v3678_v42  ;;  %v3070_v60 = vrot.slane %v3065_v50, %v3683_v44 }
 0x627   :  { %3244 = vmatpush3.bf16.msra.mxu1 %v3118_v63 }
 0x628   :  { %3245 = vmatprep.subr.bf16.mxu1 %v3125_v51 }
 0x62b   :  { %3246 = vmatpush3.bf16.msra.mxu1 %v3117_v4 }
 0x62c   :  { %3247 = vmatprep.subr.bf16.mxu1 %v3124_v6 }
 0x62f   :  { %3248 = vmatpush3.bf16.msra.mxu1 %v3116_v11 }
 0x630   :  { %3249 = vmatprep.subr.bf16.mxu1 %v3123_v12 }
 0x633   :  { %3250 = vmatpush3.bf16.msra.mxu1 %v3115_v25  ;;  %v3241_v25 = vld [vmem:[#allocation16 + $0x1c] ss:$0 sm:$0xff] }
 0x634   :  { %3251 = vmatprep.subr.bf16.mxu1 %v3122_v59 }
 0x637   :  { %3252 = vmatpush3.bf16.msra.mxu1 %v3114_v31 }
 0x638   :  { %3253 = vmatprep.subr.bf16.mxu1 %v3121_v32 }
 0x63b   :  { %3254 = vmatpush3.bf16.msra.mxu1 %v3113_v18 }
 0x63c   :  { %3255 = vmatprep.subr.bf16.mxu1 %v3120_v28 }
 0x63f   :  { %3256 = vmatpush3.bf16.msra.mxu1 %v3112_v40 }
 0x640   :  { %3257 = vmatprep.subr.bf16.mxu1 %v3119_v45 }
 0x643   :  { %3258 = vmatpush3.bf16.msra.mxu1 %v3111_v47 }
 0x6e6   :  { %v2926_v43 = vpop.f32.mrf.mxu1 }
 0x6e7   :  { %v2947_v41 = vmul.f32 %v2940_v8, %v2926_v43 }
 0x6e8   :  { %v2928_v38 = vpop.f32.mrf.mxu1 }
 0x6e9   :  { %v2948_v20 = vmul.f32 %v2944_v15, %v2928_v38  ;;  %v2963_v35 = vadd.f32 %v2956_v23, %v2947_v41 }
 0x6ea   :  { %v2930_v24 = vpop.f32.mrf.mxu1 }
 0x6eb   :  { %v2949_v48 = vmul.f32 %v2940_v8, %v2930_v24  ;;  %v2964_v13 = vadd.f32 %v2960_v22, %v2948_v20  ;;  %v2967_v29 = vmax.f32 %v2963_v35, 0.0 }
 0x6ec   :  { %v2932_v56 = vpop.f32.mrf.mxu1 }
 0x6ed   :  { %v2965_v0 = vadd.f32 %v2956_v23, %v2949_v48  ;;  %v2950_v21 = vmul.f32 %v2944_v15, %v2932_v56  ;;  %v2968_v37 = vmax.f32 %v2964_v13, 0.0 }
 0x6ef   :  { %v2966_v26 = vadd.f32 %v2960_v22, %v2950_v21  ;;  %v2969_v36 = vmax.f32 %v2965_v0, 0.0 }
 0x6f1   :  { %v2970_v27 = vmax.f32 %v2966_v26, 0.0  ;;  %v2971_v53 = vpack.c.bf16 %v2969_v36, %v2967_v29 }
 0x6f3   :  { %v2972_v46 = vpack.c.bf16 %v2970_v27, %v2968_v37 }
 0x6f5   :  { %3054 = vmatprep.mubr.bf16.mxu0 %v2972_v46 }
 0x6f6   :  { %3055 = vmatmul.mubr.bf16.vlgmr.msra.gmra.mxu0 %v2971_v53 }
 0x7b6   :  { %v3056_v5 = vpop.f32.mrf.mxu0 }
 0x7b7   :  { %v3077_v55 = vmul.f32 %v3070_v60, %v3056_v5 }
 0x7b8   :  { %v3058_v9 = vpop.f32.mrf.mxu0 }
 0x7b9   :  { %v3078_v34 = vmul.f32 %v3074_v33, %v3058_v9  ;;  %v3093_v1 = vadd.f32 %v3086_v49, %v3077_v55 }
 0x7ba   :  { %v3060_v19 = vpop.f32.mrf.mxu0 }
 0x7bb   :  { %v3079_v57 = vmul.f32 %v3070_v60, %v3060_v19  ;;  %v3094_v58 = vadd.f32 %v3090_v54, %v3078_v34  ;;  %v3097_v6 = vmax.f32 %v3093_v1, 0.0 }
 0x7bc   :  { %v3062_v62 = vpop.f32.mrf.mxu0 }
 0x7bd   :  { %v3095_v17 = vadd.f32 %v3086_v49, %v3079_v57  ;;  %v3080_v61 = vmul.f32 %v3074_v33, %v3062_v62  ;;  %v3098_v2 = vmax.f32 %v3094_v58, 0.0 }
 0x7bf   :  { %v3096_v63 = vadd.f32 %v3090_v54, %v3080_v61  ;;  %v3099_v51 = vmax.f32 %v3095_v17, 0.0 }
 0x7c1   :  { %v3100_v4 = vmax.f32 %v3096_v63, 0.0  ;;  %v3101_v11 = vpack.c.bf16 %v3099_v51, %v3097_v6 }
 0x7c3   :  { %v3102_v7 = vpack.c.bf16 %v3100_v4, %v3098_v2 }
 0x7c5   :  { %3159 = vmatprep.mubr.bf16.mxu1 %v3102_v7 }
 0x7c6   :  { %3160 = vmatmul.mubr.bf16.vlgmr.msra.gmra.mxu1 %v3101_v11 }
 0x886   :  { %v3259_v42 = vpop.f32.mrf.mxu1 }
 0x888   :  { %v3260_v12 = vpop.f32.mrf.mxu1 }
 0x889   :  { %v3261_v44 = vadd.f32 %v3260_v12, %v3259_v42 }
 0x88a   :  { %v3262_v15 = vpop.f32.mrf.mxu1 }
 0x88b   :  { %v3175_v43 = vmul.f32 %v3261_v44, %v3241_v25 }
 0x88c   :  { %v3263_v8 = vpop.f32.mrf.mxu1 }
 0x88d   :  { %v3184_v16 = vadd.f32 %v3242_v14, %v3175_v43  ;;  %v3264_v38 = vadd.f32 %v3263_v8, %v3262_v15 }
 0x88f   :  { %3186 = vst [vmem:[#allocation17] sm:$0xff] %v3184_v16  ;;  %v3176_v20 = vmul.f32 %v3264_v38, %v3241_v25 }
 0x891   :  { %v3185_v22 = vadd.f32 %v3242_v14, %v3176_v20 }
 0x893   :  { %3187 = vst [vmem:[#allocation17 + $0x8] sm:$0xff] %v3185_v22 }
 0x894   :  { %3475 = shalt.err (!%p3472_p7)
}
 0x895   :  { %3199 = dma.vmem_to_hbm [thread:$0]  %s3194_s8, 256, %s3910_s9, [#allocation4], %s3505_s5, %s3505_s5, %s3506_s16  }
 0x896   :  { %3494 = dma.done.wait [#allocation4], 256  }
 0x897   :  { %3495 = vsyncadd [#allocation4], 4294967040 }
 0x898   :  { %3203 = vsyncpa [#allocation3], 1 }
 0x899   :  { %3204 = vsyncpa [#allocation6], 1 }
 0x89a   :  { %3205 = vsyncpa [#allocation9], 1 }
 0x89b   :  { %3206 = vsyncpa [#allocation12], 1 }
 0x89c   :  { %3207 = vsyncpa [#allocation15], 1 }
 0x89d   :  { %3208 = vsyncpa [#allocation4], 1 }

</bundles_post_ra>
